<compile_context>
chip_gen: v5e
topology: v5e:2x2
jax: 0.10.0
libtpu: 0.0.40
codegen_flags: <defaults>
</compile_context>

<pallas_src>
import functools
import math

import jax
import jax.numpy as jnp
from jax.experimental import pallas as pl
from jax.experimental.pallas import tpu as pltpu

LN_EPS = 1e-12  # ViTConfig.layer_norm_eps default

_PARALLEL_1D = pltpu.CompilerParams(dimension_semantics=("parallel",))


def _row_tile(m, target=512):
    """Largest row tile <= target that evenly divides m (multiple of 8), else full m."""
    if m <= target:
        return m
    for tm in range((target // 8) * 8, 0, -8):
        if m % tm == 0:
            return tm
    return m


# ----------------------------- in-kernel helpers -----------------------------

def _layernorm_f32(x, g, b):
    mu = jnp.mean(x, axis=-1, keepdims=True)
    var = jnp.mean(jnp.square(x - mu), axis=-1, keepdims=True)
    return (x - mu) * jax.lax.rsqrt(var + LN_EPS) * g + b


def _erf_f32(x):
    # Abramowitz & Stegun 7.1.26 (|err| < 1.5e-7): built from exp/mul/add only so it
    # lowers cleanly in Mosaic (exact lax.erf has no guaranteed Pallas TPU lowering).
    a1, a2, a3, a4, a5 = (0.254829592, -0.284496736, 1.421413741,
                          -1.453152027, 1.061405429)
    p = 0.3275911
    sgn = jnp.where(x < 0.0, -1.0, 1.0)
    z = jnp.abs(x)
    t = 1.0 / (1.0 + p * z)
    poly = ((((a5 * t + a4) * t + a3) * t + a2) * t + a1) * t
    return sgn * (1.0 - poly * jnp.exp(-z * z))


def _gelu_exact(x):
    # HF ViT default hidden_act='gelu' is the exact erf-GELU (not the tanh approx).
    return 0.5 * x * (1.0 + _erf_f32(x * 0.7071067811865476))


# ----------------------------- Pallas kernels -----------------------------

def _patch_proj_kernel(x_ref, w_ref, b_ref, o_ref):
    acc = jnp.dot(x_ref[...], w_ref[...], preferred_element_type=jnp.float32)
    o_ref[...] = (acc + b_ref[...]).astype(o_ref.dtype)


def _ln_qkv_kernel(x_ref, g_ref, b_ref, w_ref, bias_ref, o_ref):
    x = x_ref[...].astype(jnp.float32)
    h = _layernorm_f32(x, g_ref[...], b_ref[...])
    # Feed the MXU in the model dtype (bf16-native on v6e/v7x); accumulate in f32.
    acc = jnp.dot(h.astype(x_ref.dtype), w_ref[...], preferred_element_type=jnp.float32)
    o_ref[...] = (acc + bias_ref[...]).astype(o_ref.dtype)


def _attn_proj_res_kernel(qkv_ref, x_ref, wo_ref, bo_ref, o_ref, *, heads, scale):
    H = x_ref.shape[2]
    d = H // heads
    qkv = qkv_ref[0]                                               # (T, 3H) packed q|k|v
    acc = x_ref[0].astype(jnp.float32) + bo_ref[...].astype(jnp.float32)  # residual + bias
    # TODO(synk): for T >~ 512 switch to a flash-style online-softmax loop over kv tiles
    # instead of materializing per-head (T, T) scores.
    for h in range(heads):
        q = qkv[:, h * d:(h + 1) * d].astype(jnp.float32) * scale  # scale folded into q
        k = qkv[:, H + h * d:H + (h + 1) * d].astype(jnp.float32)
        v = qkv[:, 2 * H + h * d:2 * H + (h + 1) * d]
        s = jax.lax.dot_general(q, k, (((1,), (1,)), ((), ())),
                                preferred_element_type=jnp.float32)        # (T, T)
        s = s - jnp.max(s, axis=-1, keepdims=True)
        p = jnp.exp(s)
        p = p * pl.reciprocal(jnp.sum(p, axis=-1, keepdims=True), approx=True)
        ctx = jnp.dot(p.astype(v.dtype), v, preferred_element_type=jnp.float32)  # (T, d)
        # Output projection accumulated per head: ctx_h @ wo[h*d:(h+1)*d, :] -> (T, H).
        acc = acc + jnp.dot(ctx.astype(wo_ref.dtype), wo_ref[h * d:(h + 1) * d, :],
                            preferred_element_type=jnp.float32)
    o_ref[...] = acc[None].astype(o_ref.dtype)


def _ln_mlp_res_kernel(x_ref, g_ref, b_ref, w1_ref, b1_ref, w2_ref, b2_ref, o_ref):
    x = x_ref[...].astype(jnp.float32)
    h = _layernorm_f32(x, g_ref[...], b_ref[...])
    h1 = jnp.dot(h.astype(x_ref.dtype), w1_ref[...],
                 preferred_element_type=jnp.float32) + b1_ref[...]
    h1 = _gelu_exact(h1)
    out = jnp.dot(h1.astype(x_ref.dtype), w2_ref[...],
                  preferred_element_type=jnp.float32) + b2_ref[...]
    o_ref[...] = (x + out).astype(o_ref.dtype)                     # residual in-kernel


def _ln_kernel(x_ref, g_ref, b_ref, o_ref):
    y = _layernorm_f32(x_ref[...].astype(jnp.float32), g_ref[...], b_ref[...])
    o_ref[...] = y.astype(o_ref.dtype)


# ----------------------------- pallas_call wrappers -----------------------------

def patch_proj(x, w, b):
    """x: (M, K) patches, w: (K, H), b: (H,) -> (M, H)."""
    M, K = x.shape
    N = w.shape[1]
    tm = _row_tile(M)
    return pl.pallas_call(
        _patch_proj_kernel,
        grid=(M // tm,),
        in_specs=[pl.BlockSpec((tm, K), lambda i: (i, 0)),
                  pl.BlockSpec((K, N), lambda i: (0, 0)),
                  pl.BlockSpec((1, N), lambda i: (0, 0))],
        out_specs=pl.BlockSpec((tm, N), lambda i: (i, 0)),
        out_shape=jax.ShapeDtypeStruct((M, N), x.dtype),
        compiler_params=_PARALLEL_1D,
    )(x, w, b.reshape(1, N))


def ln_qkv(x, g, b, w, bias):
    """LayerNorm(x) @ w + bias with w = [wq|wk|wv] (H, 3H)."""
    M, H = x.shape
    N = w.shape[1]
    tm = _row_tile(M)
    return pl.pallas_call(
        _ln_qkv_kernel,
        grid=(M // tm,),
        in_specs=[pl.BlockSpec((tm, H), lambda i: (i, 0)),
                  pl.BlockSpec((1, H), lambda i: (0, 0)),
                  pl.BlockSpec((1, H), lambda i: (0, 0)),
                  pl.BlockSpec((H, N), lambda i: (0, 0)),
                  pl.BlockSpec((1, N), lambda i: (0, 0))],
        out_specs=pl.BlockSpec((tm, N), lambda i: (i, 0)),
        out_shape=jax.ShapeDtypeStruct((M, N), x.dtype),
        compiler_params=_PARALLEL_1D,
    )(x, g.reshape(1, H), b.reshape(1, H), w, bias.reshape(1, N))


def attn_proj_residual(qkv, x, wo, bo, heads):
    """x + MHA(qkv) @ wo + bo, gridded over batch; heads sliced from packed qkv."""
    B, T, H3 = qkv.shape
    H = x.shape[2]
    scale = 1.0 / math.sqrt(H // heads)
    return pl.pallas_call(
        functools.partial(_attn_proj_res_kernel, heads=heads, scale=scale),
        grid=(B,),
        in_specs=[pl.BlockSpec((1, T, H3), lambda b: (b, 0, 0)),
                  pl.BlockSpec((1, T, H), lambda b: (b, 0, 0)),
                  pl.BlockSpec((H, H), lambda b: (0, 0)),
                  pl.BlockSpec((1, H), lambda b: (0, 0))],
        out_specs=pl.BlockSpec((1, T, H), lambda b: (b, 0, 0)),
        out_shape=jax.ShapeDtypeStruct((B, T, H), x.dtype),
        input_output_aliases={1: 0},   # residual written back into x's buffer
        compiler_params=_PARALLEL_1D,
    )(qkv, x, wo, bo.reshape(1, H))


def ln_mlp_residual(x, g, b, w1, b1, w2, b2):
    """x + GELU(LN(x) @ w1 + b1) @ w2 + b2, tiled over token rows."""
    M, H = x.shape
    I = w1.shape[1]
    tm = _row_tile(M)
    # TODO(synk): for production ViT sizes (H>=768, I>=3072) tile the I dimension with a
    # VMEM scratch accumulator (+ pl.when finalize) so both MLP weights need not be
    # resident at once within v7x's 64 MiB VMEM.
    return pl.pallas_call(
        _ln_mlp_res_kernel,
        grid=(M // tm,),
        in_specs=[pl.BlockSpec((tm, H), lambda i: (i, 0)),
                  pl.BlockSpec((1, H), lambda i: (0, 0)),
                  pl.BlockSpec((1, H), lambda i: (0, 0)),
                  pl.BlockSpec((H, I), lambda i: (0, 0)),
                  pl.BlockSpec((1, I), lambda i: (0, 0)),
                  pl.BlockSpec((I, H), lambda i: (0, 0)),
                  pl.BlockSpec((1, H), lambda i: (0, 0))],
        out_specs=pl.BlockSpec((tm, H), lambda i: (i, 0)),
        out_shape=jax.ShapeDtypeStruct((M, H), x.dtype),
        input_output_aliases={0: 0},   # residual written back into x's buffer
        compiler_params=_PARALLEL_1D,
    )(x, g.reshape(1, H), b.reshape(1, H), w1, b1.reshape(1, I), w2, b2.reshape(1, H))


def layernorm(x, g, b):
    M, H = x.shape
    tm = _row_tile(M)
    return pl.pallas_call(
        _ln_kernel,
        grid=(M // tm,),
        in_specs=[pl.BlockSpec((tm, H), lambda i: (i, 0)),
                  pl.BlockSpec((1, H), lambda i: (0, 0)),
                  pl.BlockSpec((1, H), lambda i: (0, 0))],
        out_specs=pl.BlockSpec((tm, H), lambda i: (i, 0)),
        out_shape=jax.ShapeDtypeStruct((M, H), x.dtype),
        compiler_params=_PARALLEL_1D,
    )(x, g.reshape(1, H), b.reshape(1, H))


# ----------------------------- ViT forward (glue + kernels) -----------------------------

def vit_forward(image, params, cfg):
    B, C, Hi, Wi = image.shape
    P, H, heads = cfg['patch'], cfg['hidden'], cfg['heads']
    Hn, Wn = Hi // P, Wi // P
    N = Hn * Wn
    T = N + 1

    # Conv2d(C, H, P, stride=P) == patchify (flatten each patch in (c, kh, kw) order,
    # matching torch Conv2d weight layout) followed by a tiled matmul.
    patches = (image.reshape(B, C, Hn, P, Wn, P)
                    .transpose(0, 2, 4, 1, 3, 5)
                    .reshape(B * N, C * P * P))
    x = patch_proj(patches, params['patch_w'], params['patch_b']).reshape(B, N, H)

    cls = jnp.broadcast_to(params['cls'], (B, 1, H))
    # TODO(synk): interpolate_pos_encoding's bicubic resize is the identity here because
    # the position table matches the patch grid; mismatched-grid interpolation is not
    # implemented in-kernel.
    x = jnp.concatenate([cls, x], axis=1) + params['pos']          # (B, T, H)

    for L in params['layers']:
        # Fused QKV: one (H, 3H) matmul instead of three (H, H) matmuls.
        # (For real checkpoints these concats would be done once at weight-load time.)
        wqkv = jnp.concatenate([L['wq'], L['wk'], L['wv']], axis=1)
        bqkv = jnp.concatenate([L['bq'], L['bk'], L['bv']])
        qkv = ln_qkv(x.reshape(B * T, H), L['ln1_g'], L['ln1_b'], wqkv, bqkv)
        x = attn_proj_residual(qkv.reshape(B, T, 3 * H), x, L['wo'], L['bo'], heads)
        x = ln_mlp_residual(x.reshape(B * T, H), L['ln2_g'], L['ln2_b'],
                            L['w1'], L['b1'], L['w2'], L['b2']).reshape(B, T, H)

    out = layernorm(x.reshape(B * T, H), params['lnf_g'], params['lnf_b'])
    return out.reshape(B, T, H)          # last_hidden_state


# ----------------------------- pure-JAX reference (correctness check) -----------------------------

def _ln_ref(x, g, b):
    mu = jnp.mean(x, -1, keepdims=True)
    var = jnp.mean(jnp.square(x - mu), -1, keepdims=True)
    return (x - mu) * jax.lax.rsqrt(var + LN_EPS) * g + b


def vit_forward_ref(image, params, cfg):
    hp = jax.lax.Precision.HIGHEST
    B, C, Hi, Wi = image.shape
    P, H, heads = cfg['patch'], cfg['hidden'], cfg['heads']
    Hn, Wn = Hi // P, Wi // P
    N = Hn * Wn
    d = H // heads
    patches = (image.reshape(B, C, Hn, P, Wn, P)
                    .transpose(0, 2, 4, 1, 3, 5)
                    .reshape(B, N, C * P * P))
    x = jnp.dot(patches, params['patch_w'], precision=hp) + params['patch_b']
    x = jnp.concatenate([jnp.broadcast_to(params['cls'], (B, 1, H)), x], axis=1) + params['pos']
    T = N + 1
    for L in params['layers']:
        h1 = _ln_ref(x, L['ln1_g'], L['ln1_b'])
        q = (jnp.dot(h1, L['wq'], precision=hp) + L['bq']).reshape(B, T, heads, d).transpose(0, 2, 1, 3)
        k = (jnp.dot(h1, L['wk'], precision=hp) + L['bk']).reshape(B, T, heads, d).transpose(0, 2, 1, 3)
        v = (jnp.dot(h1, L['wv'], precision=hp) + L['bv']).reshape(B, T, heads, d).transpose(0, 2, 1, 3)
        s = jnp.einsum('bhtd,bhsd->bhts', q, k, precision=hp) / math.sqrt(d)
        p = jax.nn.softmax(s, axis=-1)
        ctx = jnp.einsum('bhts,bhsd->bhtd', p, v, precision=hp).transpose(0, 2, 1, 3).reshape(B, T, H)
        x = x + jnp.dot(ctx, L['wo'], precision=hp) + L['bo']
        h2 = _ln_ref(x, L['ln2_g'], L['ln2_b'])
        m = jax.nn.gelu(jnp.dot(h2, L['w1'], precision=hp) + L['b1'], approximate=False)
        x = x + jnp.dot(m, L['w2'], precision=hp) + L['b2']
    return _ln_ref(x, params['lnf_g'], params['lnf_b'])


# ----------------------------- deterministic synthetic params -----------------------------

def init_params(key, cfg):
    P, C, H, heads, I, nL = (cfg['patch'], cfg['channels'], cfg['hidden'],
                             cfg['heads'], cfg['mlp'], cfg['layers'])
    N = (cfg['image'] // P) ** 2
    std = 0.02

    def nrm(k, shape):
        return std * jax.random.normal(k, shape, jnp.float32)

    keys = iter(jax.random.split(key, 8 + 12 * nL))
    params = {
        'patch_w': nrm(next(keys), (C * P * P, H)),
        'patch_b': nrm(next(keys), (H,)),
        'cls':     nrm(next(keys), (1, 1, H)),
        'pos':     nrm(next(keys), (1, N + 1, H)),
        'lnf_g':   jnp.ones((H,), jnp.float32),
        'lnf_b':   jnp.zeros((H,), jnp.float32),
        'layers':  [],
    }
    for _ in range(nL):
        params['layers'].append({
            'ln1_g': jnp.ones((H,), jnp.float32), 'ln1_b': jnp.zeros((H,), jnp.float32),
            'wq': nrm(next(keys), (H, H)), 'bq': nrm(next(keys), (H,)),
            'wk': nrm(next(keys), (H, H)), 'bk': nrm(next(keys), (H,)),
            'wv': nrm(next(keys), (H, H)), 'bv': nrm(next(keys), (H,)),
            'wo': nrm(next(keys), (H, H)), 'bo': nrm(next(keys), (H,)),
            'ln2_g': jnp.ones((H,), jnp.float32), 'ln2_b': jnp.zeros((H,), jnp.float32),
            'w1': nrm(next(keys), (H, I)), 'b1': nrm(next(keys), (I,)),
            'w2': nrm(next(keys), (I, H)), 'b2': nrm(next(keys), (H,)),
        })
    return params


if __name__ == "__main__":
    # Lane-dense toy config: hidden=128 (full 128-lane vregs), heads=4 (d=32), T=17.
    cfg = dict(image=32, channels=3, patch=8, hidden=128, heads=4, mlp=256, layers=2)

    root = jax.random.PRNGKey(0)
    k_img, k_par = jax.random.split(root)
    image = jax.random.normal(k_img, (2, cfg['channels'], cfg['image'], cfg['image']),
                              jnp.float32)
    params = init_params(k_par, cfg)

    fwd = jax.jit(functools.partial(vit_forward, cfg=cfg))
    out = jax.block_until_ready(fwd(image, params))

    T = (cfg['image'] // cfg['patch']) ** 2 + 1
    assert out.shape == (2, T, cfg['hidden']), out.shape

    ref = jax.block_until_ready(jax.jit(functools.partial(vit_forward_ref, cfg=cfg))(image, params))
    err = float(jnp.max(jnp.abs(out - ref)))
    assert jnp.allclose(out, ref, atol=2e-2, rtol=2e-2), err

    print("KERNEL_OK")
</pallas_src>

<mosaic_0001>
module attributes {stable_mosaic.version = 11 : i64} {
  func.func @_patch_proj_kernel(%arg0: i32, %arg1: memref<32x192xf32, #tpu.memory_space<vmem>>, %arg2: memref<192x128xf32, #tpu.memory_space<vmem>>, %arg3: memref<1x128xf32, #tpu.memory_space<vmem>>, %arg4: memref<32x128xf32, #tpu.memory_space<vmem>>) attributes {dimension_semantics = [#tpu.dimension_semantics<parallel>], iteration_bounds = array<i64: 1>, scalar_prefetch = 0 : i64, scratch_operands = 0 : i64, tpu.core_type = #tpu.core_type<tc>, window_params = [{transform_indices = @transform_0, window_bounds = array<i64: 32, 192>}, {pipeline_mode = #tpu.pipeline_mode<synchronous>, transform_indices = @transform_1, window_bounds = array<i64: 192, 128>}, {pipeline_mode = #tpu.pipeline_mode<synchronous>, transform_indices = @transform_2, window_bounds = array<i64: 1, 128>}, {transform_indices = @transform_3, window_bounds = array<i64: 32, 128>}]} {
    %c0 = arith.constant 0 : index
    %c0_0 = arith.constant 0 : index
    %0 = vector.load %arg1[%c0, %c0_0] : memref<32x192xf32, #tpu.memory_space<vmem>>, vector<32x192xf32>
    %c0_1 = arith.constant 0 : index
    %c0_2 = arith.constant 0 : index
    %1 = vector.load %arg2[%c0_1, %c0_2] : memref<192x128xf32, #tpu.memory_space<vmem>>, vector<192x128xf32>
    %cst = arith.constant dense<0.000000e+00> : vector<32x128xf32>
    %2 = tpu.matmul %0, %1, %cst {dimension_numbers = #tpu.dot_dimension_numbers<[1], [0], [0], [1], [0, 0, 1, 1], [], []>} : vector<32x192xf32>, vector<192x128xf32>, vector<32x128xf32> -> vector<32x128xf32>
    %c0_3 = arith.constant 0 : index
    %c0_4 = arith.constant 0 : index
    %3 = vector.load %arg3[%c0_3, %c0_4] : memref<1x128xf32, #tpu.memory_space<vmem>>, vector<1x128xf32>
    %4 = vector.broadcast %3 : vector<1x128xf32> to vector<32x128xf32>
    %5 = arith.addf %2, %4 : vector<32x128xf32>
    %c0_5 = arith.constant 0 : index
    %c0_6 = arith.constant 0 : index
    %6 = vector.load %arg4[%c0_5, %c0_6] : memref<32x128xf32, #tpu.memory_space<vmem>>, vector<32x128xf32>
    tpu.vector_store %arg4[%c0_5, %c0_6], %5 {strides = array<i32>} : memref<32x128xf32, #tpu.memory_space<vmem>>, vector<32x128xf32>,
    return
  }
  func.func @transform_0(%arg0: i32) -> (i32, i32) {
    %c0_i32 = arith.constant 0 : i32
    %c0_i32_0 = arith.constant 0 : i32
    return %arg0, %c0_i32 : i32, i32
  }
  func.func @transform_1(%arg0: i32) -> (i32, i32) {
    %c0_i32 = arith.constant 0 : i32
    %c0_i32_0 = arith.constant 0 : i32
    %c0_i32_1 = arith.constant 0 : i32
    return %c0_i32, %c0_i32_0 : i32, i32
  }
  func.func @transform_2(%arg0: i32) -> (i32, i32) {
    %c0_i32 = arith.constant 0 : i32
    %c0_i32_0 = arith.constant 0 : i32
    %c0_i32_1 = arith.constant 0 : i32
    return %c0_i32, %c0_i32_0 : i32, i32
  }
  func.func @transform_3(%arg0: i32) -> (i32, i32) {
    %c0_i32 = arith.constant 0 : i32
    %c0_i32_0 = arith.constant 0 : i32
    return %arg0, %c0_i32 : i32, i32
  }
}

module attributes {stable_mosaic.version = 11 : i64} {
  func.func @_ln_qkv_kernel(%arg0: i32, %arg1: memref<34x128xf32, #tpu.memory_space<vmem>>, %arg2: memref<1x128xf32, #tpu.memory_space<vmem>>, %arg3: memref<1x128xf32, #tpu.memory_space<vmem>>, %arg4: memref<128x384xf32, #tpu.memory_space<vmem>>, %arg5: memref<1x384xf32, #tpu.memory_space<vmem>>, %arg6: memref<34x384xf32, #tpu.memory_space<vmem>>) attributes {dimension_semantics = [#tpu.dimension_semantics<parallel>], iteration_bounds = array<i64: 1>, scalar_prefetch = 0 : i64, scratch_operands = 0 : i64, tpu.core_type = #tpu.core_type<tc>, window_params = [{transform_indices = @transform_0, window_bounds = array<i64: 34, 128>}, {pipeline_mode = #tpu.pipeline_mode<synchronous>, transform_indices = @transform_1, window_bounds = array<i64: 1, 128>}, {pipeline_mode = #tpu.pipeline_mode<synchronous>, transform_indices = @transform_2, window_bounds = array<i64: 1, 128>}, {pipeline_mode = #tpu.pipeline_mode<synchronous>, transform_indices = @transform_3, window_bounds = array<i64: 128, 384>}, {pipeline_mode = #tpu.pipeline_mode<synchronous>, transform_indices = @transform_4, window_bounds = array<i64: 1, 384>}, {transform_indices = @transform_5, window_bounds = array<i64: 34, 384>}]} {
    %c0 = arith.constant 0 : index
    %c0_0 = arith.constant 0 : index
    %0 = vector.load %arg1[%c0, %c0_0] : memref<34x128xf32, #tpu.memory_space<vmem>>, vector<34x128xf32>
    %c0_1 = arith.constant 0 : index
    %c0_2 = arith.constant 0 : index
    %1 = vector.load %arg2[%c0_1, %c0_2] : memref<1x128xf32, #tpu.memory_space<vmem>>, vector<1x128xf32>
    %c0_3 = arith.constant 0 : index
    %c0_4 = arith.constant 0 : index
    %2 = vector.load %arg3[%c0_3, %c0_4] : memref<1x128xf32, #tpu.memory_space<vmem>>, vector<1x128xf32>
    %cst = arith.constant dense<0.000000e+00> : vector<34xf32>
    %3 = vector.multi_reduction <add>, %0, %cst [1] : vector<34x128xf32> to vector<34xf32>
    %4 = vector.shape_cast %3 : vector<34xf32> to vector<34x1xf32>
    %cst_5 = arith.constant 1.280000e+02 : f32
    %5 = vector.broadcast %cst_5 : f32 to vector<34x1xf32>
    %6 = arith.divf %4, %5 : vector<34x1xf32>
    %7 = vector.broadcast %6 : vector<34x1xf32> to vector<34x128xf32>
    %8 = arith.subf %0, %7 : vector<34x128xf32>
    %9 = arith.mulf %8, %8 : vector<34x128xf32>
    %cst_6 = arith.constant dense<0.000000e+00> : vector<34xf32>
    %10 = vector.multi_reduction <add>, %9, %cst_6 [1] : vector<34x128xf32> to vector<34xf32>
    %11 = vector.shape_cast %10 : vector<34xf32> to vector<34x1xf32>
    %cst_7 = arith.constant 1.280000e+02 : f32
    %12 = vector.broadcast %cst_7 : f32 to vector<34x1xf32>
    %13 = arith.divf %11, %12 : vector<34x1xf32>
    %14 = vector.broadcast %6 : vector<34x1xf32> to vector<34x128xf32>
    %15 = arith.subf %0, %14 : vector<34x128xf32>
    %cst_8 = arith.constant 9.99999996E-13 : f32
    %16 = vector.broadcast %cst_8 : f32 to vector<34x1xf32>
    %17 = arith.addf %13, %16 : vector<34x1xf32>
    %18 = math.rsqrt %17 : vector<34x1xf32>
    %19 = vector.broadcast %18 : vector<34x1xf32> to vector<34x128xf32>
    %20 = arith.mulf %15, %19 : vector<34x128xf32>
    %21 = vector.broadcast %1 : vector<1x128xf32> to vector<34x128xf32>
    %22 = arith.mulf %20, %21 : vector<34x128xf32>
    %23 = vector.broadcast %2 : vector<1x128xf32> to vector<34x128xf32>
    %24 = arith.addf %22, %23 : vector<34x128xf32>
    %c0_9 = arith.constant 0 : index
    %c0_10 = arith.constant 0 : index
    %25 = vector.load %arg4[%c0_9, %c0_10] : memref<128x384xf32, #tpu.memory_space<vmem>>, vector<128x384xf32>
    %cst_11 = arith.constant dense<0.000000e+00> : vector<34x384xf32>
    %26 = tpu.matmul %24, %25, %cst_11 {dimension_numbers = #tpu.dot_dimension_numbers<[1], [0], [0], [1], [0, 0, 1, 1], [], []>} : vector<34x128xf32>, vector<128x384xf32>, vector<34x384xf32> -> vector<34x384xf32>
    %c0_12 = arith.constant 0 : index
    %c0_13 = arith.constant 0 : index
    %27 = vector.load %arg5[%c0_12, %c0_13] : memref<1x384xf32, #tpu.memory_space<vmem>>, vector<1x384xf32>
    %28 = vector.broadcast %27 : vector<1x384xf32> to vector<34x384xf32>
    %29 = arith.addf %26, %28 : vector<34x384xf32>
    %c0_14 = arith.constant 0 : index
    %c0_15 = arith.constant 0 : index
    %30 = vector.load %arg6[%c0_14, %c0_15] : memref<34x384xf32, #tpu.memory_space<vmem>>, vector<34x384xf32>
    tpu.vector_store %arg6[%c0_14, %c0_15], %29 {strides = array<i32>} : memref<34x384xf32, #tpu.memory_space<vmem>>, vector<34x384xf32>,
    return
  }
  func.func @transform_0(%arg0: i32) -> (i32, i32) {
    %c0_i32 = arith.constant 0 : i32
    %c0_i32_0 = arith.constant 0 : i32
    return %arg0, %c0_i32 : i32, i32
  }
  func.func @transform_1(%arg0: i32) -> (i32, i32) {
    %c0_i32 = arith.constant 0 : i32
    %c0_i32_0 = arith.constant 0 : i32
    %c0_i32_1 = arith.constant 0 : i32
    return %c0_i32, %c0_i32_0 : i32, i32
  }
  func.func @transform_2(%arg0: i32) -> (i32, i32) {
    %c0_i32 = arith.constant 0 : i32
    %c0_i32_0 = arith.constant 0 : i32
    %c0_i32_1 = arith.constant 0 : i32
    return %c0_i32, %c0_i32_0 : i32, i32
  }
  func.func @transform_3(%arg0: i32) -> (i32, i32) {
    %c0_i32 = arith.constant 0 : i32
    %c0_i32_0 = arith.constant 0 : i32
    %c0_i32_1 = arith.constant 0 : i32
    return %c0_i32, %c0_i32_0 : i32, i32
  }
  func.func @transform_4(%arg0: i32) -> (i32, i32) {
    %c0_i32 = arith.constant 0 : i32
    %c0_i32_0 = arith.constant 0 : i32
    %c0_i32_1 = arith.constant 0 : i32
    return %c0_i32, %c0_i32_0 : i32, i32
  }
  func.func @transform_5(%arg0: i32) -> (i32, i32) {
    %c0_i32 = arith.constant 0 : i32
    %c0_i32_0 = arith.constant 0 : i32
    return %arg0, %c0_i32 : i32, i32
  }
}

module attributes {stable_mosaic.version = 11 : i64} {
  func.func @_ln_mlp_res_kernel(%arg0: i32, %arg1: memref<34x128xf32, #tpu.memory_space<vmem>>, %arg2: memref<1x128xf32, #tpu.memory_space<vmem>>, %arg3: memref<1x128xf32, #tpu.memory_space<vmem>>, %arg4: memref<128x256xf32, #tpu.memory_space<vmem>>, %arg5: memref<1x256xf32, #tpu.memory_space<vmem>>, %arg6: memref<256x128xf32, #tpu.memory_space<vmem>>, %arg7: memref<1x128xf32, #tpu.memory_space<vmem>>, %arg8: memref<34x128xf32, #tpu.memory_space<vmem>>) attributes {dimension_semantics = [#tpu.dimension_semantics<parallel>], iteration_bounds = array<i64: 1>, scalar_prefetch = 0 : i64, scratch_operands = 0 : i64, tpu.core_type = #tpu.core_type<tc>, window_params = [{transform_indices = @transform_0, window_bounds = array<i64: 34, 128>}, {pipeline_mode = #tpu.pipeline_mode<synchronous>, transform_indices = @transform_1, window_bounds = array<i64: 1, 128>}, {pipeline_mode = #tpu.pipeline_mode<synchronous>, transform_indices = @transform_2, window_bounds = array<i64: 1, 128>}, {pipeline_mode = #tpu.pipeline_mode<synchronous>, transform_indices = @transform_3, window_bounds = array<i64: 128, 256>}, {pipeline_mode = #tpu.pipeline_mode<synchronous>, transform_indices = @transform_4, window_bounds = array<i64: 1, 256>}, {pipeline_mode = #tpu.pipeline_mode<synchronous>, transform_indices = @transform_5, window_bounds = array<i64: 256, 128>}, {pipeline_mode = #tpu.pipeline_mode<synchronous>, transform_indices = @transform_6, window_bounds = array<i64: 1, 128>}, {transform_indices = @transform_7, window_bounds = array<i64: 34, 128>}]} {
    %c0 = arith.constant 0 : index
    %c0_0 = arith.constant 0 : index
    %0 = vector.load %arg1[%c0, %c0_0] : memref<34x128xf32, #tpu.memory_space<vmem>>, vector<34x128xf32>
    %c0_1 = arith.constant 0 : index
    %c0_2 = arith.constant 0 : index
    %1 = vector.load %arg2[%c0_1, %c0_2] : memref<1x128xf32, #tpu.memory_space<vmem>>, vector<1x128xf32>
    %c0_3 = arith.constant 0 : index
    %c0_4 = arith.constant 0 : index
    %2 = vector.load %arg3[%c0_3, %c0_4] : memref<1x128xf32, #tpu.memory_space<vmem>>, vector<1x128xf32>
    %cst = arith.constant dense<0.000000e+00> : vector<34xf32>
    %3 = vector.multi_reduction <add>, %0, %cst [1] : vector<34x128xf32> to vector<34xf32>
    %4 = vector.shape_cast %3 : vector<34xf32> to vector<34x1xf32>
    %cst_5 = arith.constant 1.280000e+02 : f32
    %5 = vector.broadcast %cst_5 : f32 to vector<34x1xf32>
    %6 = arith.divf %4, %5 : vector<34x1xf32>
    %7 = vector.broadcast %6 : vector<34x1xf32> to vector<34x128xf32>
    %8 = arith.subf %0, %7 : vector<34x128xf32>
    %9 = arith.mulf %8, %8 : vector<34x128xf32>
    %cst_6 = arith.constant dense<0.000000e+00> : vector<34xf32>
    %10 = vector.multi_reduction <add>, %9, %cst_6 [1] : vector<34x128xf32> to vector<34xf32>
    %11 = vector.shape_cast %10 : vector<34xf32> to vector<34x1xf32>
    %cst_7 = arith.constant 1.280000e+02 : f32
    %12 = vector.broadcast %cst_7 : f32 to vector<34x1xf32>
    %13 = arith.divf %11, %12 : vector<34x1xf32>
    %14 = vector.broadcast %6 : vector<34x1xf32> to vector<34x128xf32>
    %15 = arith.subf %0, %14 : vector<34x128xf32>
    %cst_8 = arith.constant 9.99999996E-13 : f32
    %16 = vector.broadcast %cst_8 : f32 to vector<34x1xf32>
    %17 = arith.addf %13, %16 : vector<34x1xf32>
    %18 = math.rsqrt %17 : vector<34x1xf32>
    %19 = vector.broadcast %18 : vector<34x1xf32> to vector<34x128xf32>
    %20 = arith.mulf %15, %19 : vector<34x128xf32>
    %21 = vector.broadcast %1 : vector<1x128xf32> to vector<34x128xf32>
    %22 = arith.mulf %20, %21 : vector<34x128xf32>
    %23 = vector.broadcast %2 : vector<1x128xf32> to vector<34x128xf32>
    %24 = arith.addf %22, %23 : vector<34x128xf32>
    %c0_9 = arith.constant 0 : index
    %c0_10 = arith.constant 0 : index
    %25 = vector.load %arg4[%c0_9, %c0_10] : memref<128x256xf32, #tpu.memory_space<vmem>>, vector<128x256xf32>
    %cst_11 = arith.constant dense<0.000000e+00> : vector<34x256xf32>
    %26 = tpu.matmul %24, %25, %cst_11 {dimension_numbers = #tpu.dot_dimension_numbers<[1], [0], [0], [1], [0, 0, 1, 1], [], []>} : vector<34x128xf32>, vector<128x256xf32>, vector<34x256xf32> -> vector<34x256xf32>
    %c0_12 = arith.constant 0 : index
    %c0_13 = arith.constant 0 : index
    %27 = vector.load %arg5[%c0_12, %c0_13] : memref<1x256xf32, #tpu.memory_space<vmem>>, vector<1x256xf32>
    %28 = vector.broadcast %27 : vector<1x256xf32> to vector<34x256xf32>
    %29 = arith.addf %26, %28 : vector<34x256xf32>
    %cst_14 = arith.constant 5.000000e-01 : f32
    %30 = vector.broadcast %cst_14 : f32 to vector<34x256xf32>
    %31 = arith.mulf %30, %29 : vector<34x256xf32>
    %cst_15 = arith.constant 0.707106769 : f32
    %32 = vector.broadcast %cst_15 : f32 to vector<34x256xf32>
    %33 = arith.mulf %29, %32 : vector<34x256xf32>
    %cst_16 = arith.constant 0.000000e+00 : f32
    %34 = vector.broadcast %cst_16 : f32 to vector<34x256xf32>
    %35 = arith.cmpf olt, %33, %34 : vector<34x256xf32>
    %cst_17 = arith.constant -1.000000e+00 : f32
    %cst_18 = arith.constant 1.000000e+00 : f32
    %36 = vector.broadcast %cst_17 : f32 to vector<34x256xf32>
    %37 = vector.broadcast %cst_18 : f32 to vector<34x256xf32>
    %38 = arith.select %35, %36, %37 : vector<34x256xi1>, vector<34x256xf32>
    %39 = math.absf %33 : vector<34x256xf32>
    %cst_19 = arith.constant 0.327591091 : f32
    %40 = vector.broadcast %cst_19 : f32 to vector<34x256xf32>
    %41 = arith.mulf %40, %39 : vector<34x256xf32>
    %cst_20 = arith.constant 1.000000e+00 : f32
    %42 = vector.broadcast %cst_20 : f32 to vector<34x256xf32>
    %43 = arith.addf %42, %41 : vector<34x256xf32>
    %cst_21 = arith.constant 1.000000e+00 : f32
    %44 = vector.broadcast %cst_21 : f32 to vector<34x256xf32>
    %45 = arith.divf %44, %43 : vector<34x256xf32>
    %cst_22 = arith.constant 1.06140542 : f32
    %46 = vector.broadcast %cst_22 : f32 to vector<34x256xf32>
    %47 = arith.mulf %46, %45 : vector<34x256xf32>
    %cst_23 = arith.constant -1.45315206 : f32
    %48 = vector.broadcast %cst_23 : f32 to vector<34x256xf32>
    %49 = arith.addf %47, %48 : vector<34x256xf32>
    %50 = arith.mulf %49, %45 : vector<34x256xf32>
    %cst_24 = arith.constant 1.42141378 : f32
    %51 = vector.broadcast %cst_24 : f32 to vector<34x256xf32>
    %52 = arith.addf %50, %51 : vector<34x256xf32>
    %53 = arith.mulf %52, %45 : vector<34x256xf32>
    %cst_25 = arith.constant -0.284496725 : f32
    %54 = vector.broadcast %cst_25 : f32 to vector<34x256xf32>
    %55 = arith.addf %53, %54 : vector<34x256xf32>
    %56 = arith.mulf %55, %45 : vector<34x256xf32>
    %cst_26 = arith.constant 0.254829586 : f32
    %57 = vector.broadcast %cst_26 : f32 to vector<34x256xf32>
    %58 = arith.addf %56, %57 : vector<34x256xf32>
    %59 = arith.mulf %58, %45 : vector<34x256xf32>
    %cst_27 = arith.constant 0.000000e+00 : f32
    %60 = vector.broadcast %cst_27 : f32 to vector<34x256xf32>
    %61 = arith.subf %60, %39 : vector<34x256xf32>
    %62 = arith.mulf %61, %39 : vector<34x256xf32>
    %63 = math.exp %62 : vector<34x256xf32>
    %64 = arith.mulf %59, %63 : vector<34x256xf32>
    %cst_28 = arith.constant 1.000000e+00 : f32
    %65 = vector.broadcast %cst_28 : f32 to vector<34x256xf32>
    %66 = arith.subf %65, %64 : vector<34x256xf32>
    %67 = arith.mulf %38, %66 : vector<34x256xf32>
    %cst_29 = arith.constant 1.000000e+00 : f32
    %68 = vector.broadcast %cst_29 : f32 to vector<34x256xf32>
    %69 = arith.addf %68, %67 : vector<34x256xf32>
    %70 = arith.mulf %31, %69 : vector<34x256xf32>
    %c0_30 = arith.constant 0 : index
    %c0_31 = arith.constant 0 : index
    %71 = vector.load %arg6[%c0_30, %c0_31] : memref<256x128xf32, #tpu.memory_space<vmem>>, vector<256x128xf32>
    %cst_32 = arith.constant dense<0.000000e+00> : vector<34x128xf32>
    %72 = tpu.matmul %70, %71, %cst_32 {dimension_numbers = #tpu.dot_dimension_numbers<[1], [0], [0], [1], [0, 0, 1, 1], [], []>} : vector<34x256xf32>, vector<256x128xf32>, vector<34x128xf32> -> vector<34x128xf32>
    %c0_33 = arith.constant 0 : index
    %c0_34 = arith.constant 0 : index
    %73 = vector.load %arg7[%c0_33, %c0_34] : memref<1x128xf32, #tpu.memory_space<vmem>>, vector<1x128xf32>
    %74 = vector.broadcast %73 : vector<1x128xf32> to vector<34x128xf32>
    %75 = arith.addf %72, %74 : vector<34x128xf32>
    %76 = arith.addf %0, %75 : vector<34x128xf32>
    %c0_35 = arith.constant 0 : index
    %c0_36 = arith.constant 0 : index
    %77 = vector.load %arg8[%c0_35, %c0_36] : memref<34x128xf32, #tpu.memory_space<vmem>>, vector<34x128xf32>
    tpu.vector_store %arg8[%c0_35, %c0_36], %76 {strides = array<i32>} : memref<34x128xf32, #tpu.memory_space<vmem>>, vector<34x128xf32>,
    return
  }
  func.func @transform_0(%arg0: i32) -> (i32, i32) {
    %c0_i32 = arith.constant 0 : i32
    %c0_i32_0 = arith.constant 0 : i32
    return %arg0, %c0_i32 : i32, i32
  }
  func.func @transform_1(%arg0: i32) -> (i32, i32) {
    %c0_i32 = arith.constant 0 : i32
    %c0_i32_0 = arith.constant 0 : i32
    %c0_i32_1 = arith.constant 0 : i32
    return %c0_i32, %c0_i32_0 : i32, i32
  }
  func.func @transform_2(%arg0: i32) -> (i32, i32) {
    %c0_i32 = arith.constant 0 : i32
    %c0_i32_0 = arith.constant 0 : i32
    %c0_i32_1 = arith.constant 0 : i32
    return %c0_i32, %c0_i32_0 : i32, i32
  }
  func.func @transform_3(%arg0: i32) -> (i32, i32) {
    %c0_i32 = arith.constant 0 : i32
    %c0_i32_0 = arith.constant 0 : i32
    %c0_i32_1 = arith.constant 0 : i32
    return %c0_i32, %c0_i32_0 : i32, i32
  }
  func.func @transform_4(%arg0: i32) -> (i32, i32) {
    %c0_i32 = arith.constant 0 : i32
    %c0_i32_0 = arith.constant 0 : i32
    %c0_i32_1 = arith.constant 0 : i32
    return %c0_i32, %c0_i32_0 : i32, i32
  }
  func.func @transform_5(%arg0: i32) -> (i32, i32) {
    %c0_i32 = arith.constant 0 : i32
    %c0_i32_0 = arith.constant 0 : i32
    %c0_i32_1 = arith.constant 0 : i32
    return %c0_i32, %c0_i32_0 : i32, i32
  }
  func.func @transform_6(%arg0: i32) -> (i32, i32) {
    %c0_i32 = arith.constant 0 : i32
    %c0_i32_0 = arith.constant 0 : i32
    %c0_i32_1 = arith.constant 0 : i32
    return %c0_i32, %c0_i32_0 : i32, i32
  }
  func.func @transform_7(%arg0: i32) -> (i32, i32) {
    %c0_i32 = arith.constant 0 : i32
    %c0_i32_0 = arith.constant 0 : i32
    return %arg0, %c0_i32 : i32, i32
  }
}

module attributes {stable_mosaic.version = 11 : i64} {
  func.func @_attn_proj_res_kernel(%arg0: i32, %arg1: memref<1x17x384xf32, #tpu.memory_space<vmem>>, %arg2: memref<1x17x128xf32, #tpu.memory_space<vmem>>, %arg3: memref<128x128xf32, #tpu.memory_space<vmem>>, %arg4: memref<1x128xf32, #tpu.memory_space<vmem>>, %arg5: memref<1x17x128xf32, #tpu.memory_space<vmem>>) attributes {dimension_semantics = [#tpu.dimension_semantics<parallel>], iteration_bounds = array<i64: 2>, scalar_prefetch = 0 : i64, scratch_operands = 0 : i64, tpu.core_type = #tpu.core_type<tc>, window_params = [{transform_indices = @transform_0, window_bounds = array<i64: 1, 17, 384>}, {transform_indices = @transform_1, window_bounds = array<i64: 1, 17, 128>}, {pipeline_mode = #tpu.pipeline_mode<synchronous>, transform_indices = @transform_2, window_bounds = array<i64: 128, 128>}, {pipeline_mode = #tpu.pipeline_mode<synchronous>, transform_indices = @transform_3, window_bounds = array<i64: 1, 128>}, {transform_indices = @transform_4, window_bounds = array<i64: 1, 17, 128>}]} {
    %c0 = arith.constant 0 : index
    %c0_0 = arith.constant 0 : index
    %c0_1 = arith.constant 0 : index
    %0 = vector.load %arg1[%c0, %c0_0, %c0_1] : memref<1x17x384xf32, #tpu.memory_space<vmem>>, vector<1x17x384xf32>
    %1 = vector.shape_cast %0 : vector<1x17x384xf32> to vector<17x384xf32>
    %c0_2 = arith.constant 0 : index
    %c0_3 = arith.constant 0 : index
    %c0_4 = arith.constant 0 : index
    %2 = vector.load %arg2[%c0_2, %c0_3, %c0_4] : memref<1x17x128xf32, #tpu.memory_space<vmem>>, vector<1x17x128xf32>
    %3 = vector.shape_cast %2 : vector<1x17x128xf32> to vector<17x128xf32>
    %c0_5 = arith.constant 0 : index
    %c0_6 = arith.constant 0 : index
    %4 = vector.load %arg4[%c0_5, %c0_6] : memref<1x128xf32, #tpu.memory_space<vmem>>, vector<1x128xf32>
    %5 = vector.broadcast %4 : vector<1x128xf32> to vector<17x128xf32>
    %6 = arith.addf %3, %5 : vector<17x128xf32>
    %7 = vector.extract_strided_slice %1 {offsets = [0, 0], sizes = [17, 32], strides = [1, 1]} : vector<17x384xf32> to vector<17x32xf32>
    %cst = arith.constant 0.176776692 : f32
    %8 = vector.broadcast %cst : f32 to vector<17x32xf32>
    %9 = arith.mulf %7, %8 : vector<17x32xf32>
    %10 = vector.extract_strided_slice %1 {offsets = [0, 128], sizes = [17, 32], strides = [1, 1]} : vector<17x384xf32> to vector<17x32xf32>
    %11 = vector.extract_strided_slice %1 {offsets = [0, 256], sizes = [17, 32], strides = [1, 1]} : vector<17x384xf32> to vector<17x32xf32>
    %cst_7 = arith.constant dense<0.000000e+00> : vector<17x17xf32>
    %12 = tpu.matmul %9, %10, %cst_7 {dimension_numbers = #tpu.dot_dimension_numbers<[1], [1], [0], [0], [0, 0, 1, 0], [], []>} : vector<17x32xf32>, vector<17x32xf32>, vector<17x17xf32> -> vector<17x17xf32>
    %cst_8 = arith.constant dense<0xFF800000> : vector<17xf32>
    %13 = vector.multi_reduction <maximumf>, %12, %cst_8 [1] : vector<17x17xf32> to vector<17xf32>
    %14 = vector.shape_cast %13 : vector<17xf32> to vector<17x1xf32>
    %15 = vector.broadcast %14 : vector<17x1xf32> to vector<17x17xf32>
    %16 = arith.subf %12, %15 : vector<17x17xf32>
    %17 = math.exp %16 : vector<17x17xf32>
    %cst_9 = arith.constant dense<0.000000e+00> : vector<17xf32>
    %18 = vector.multi_reduction <add>, %17, %cst_9 [1] : vector<17x17xf32> to vector<17xf32>
    %19 = vector.shape_cast %18 : vector<17xf32> to vector<17x1xf32>
    %20 = tpu.reciprocal %19 {approx = true} : vector<17x1xf32> -> vector<17x1xf32>
    %21 = vector.broadcast %20 : vector<17x1xf32> to vector<17x17xf32>
    %22 = arith.mulf %17, %21 : vector<17x17xf32>
    %cst_10 = arith.constant dense<0.000000e+00> : vector<17x32xf32>
    %23 = tpu.matmul %22, %11, %cst_10 {dimension_numbers = #tpu.dot_dimension_numbers<[1], [0], [0], [1], [0, 0, 1, 1], [], []>} : vector<17x17xf32>, vector<17x32xf32>, vector<17x32xf32> -> vector<17x32xf32>
    %c0_11 = arith.constant 0 : index
    %c0_12 = arith.constant 0 : index
    %24 = vector.load %arg3[%c0_11, %c0_12] : memref<128x128xf32, #tpu.memory_space<vmem>>, vector<32x128xf32>
    %cst_13 = arith.constant dense<0.000000e+00> : vector<17x128xf32>
    %25 = tpu.matmul %23, %24, %cst_13 {dimension_numbers = #tpu.dot_dimension_numbers<[1], [0], [0], [1], [0, 0, 1, 1], [], []>} : vector<17x32xf32>, vector<32x128xf32>, vector<17x128xf32> -> vector<17x128xf32>
    %26 = arith.addf %6, %25 : vector<17x128xf32>
    %27 = vector.extract_strided_slice %1 {offsets = [0, 32], sizes = [17, 32], strides = [1, 1]} : vector<17x384xf32> to vector<17x32xf32>
    %cst_14 = arith.constant 0.176776692 : f32
    %28 = vector.broadcast %cst_14 : f32 to vector<17x32xf32>
    %29 = arith.mulf %27, %28 : vector<17x32xf32>
    %30 = vector.extract_strided_slice %1 {offsets = [0, 160], sizes = [17, 32], strides = [1, 1]} : vector<17x384xf32> to vector<17x32xf32>
    %31 = vector.extract_strided_slice %1 {offsets = [0, 288], sizes = [17, 32], strides = [1, 1]} : vector<17x384xf32> to vector<17x32xf32>
    %cst_15 = arith.constant dense<0.000000e+00> : vector<17x17xf32>
    %32 = tpu.matmul %29, %30, %cst_15 {dimension_numbers = #tpu.dot_dimension_numbers<[1], [1], [0], [0], [0, 0, 1, 0], [], []>} : vector<17x32xf32>, vector<17x32xf32>, vector<17x17xf32> -> vector<17x17xf32>
    %cst_16 = arith.constant dense<0xFF800000> : vector<17xf32>
    %33 = vector.multi_reduction <maximumf>, %32, %cst_16 [1] : vector<17x17xf32> to vector<17xf32>
    %34 = vector.shape_cast %33 : vector<17xf32> to vector<17x1xf32>
    %35 = vector.broadcast %34 : vector<17x1xf32> to vector<17x17xf32>
    %36 = arith.subf %32, %35 : vector<17x17xf32>
    %37 = math.exp %36 : vector<17x17xf32>
    %cst_17 = arith.constant dense<0.000000e+00> : vector<17xf32>
    %38 = vector.multi_reduction <add>, %37, %cst_17 [1] : vector<17x17xf32> to vector<17xf32>
    %39 = vector.shape_cast %38 : vector<17xf32> to vector<17x1xf32>
    %40 = tpu.reciprocal %39 {approx = true} : vector<17x1xf32> -> vector<17x1xf32>
    %41 = vector.broadcast %40 : vector<17x1xf32> to vector<17x17xf32>
    %42 = arith.mulf %37, %41 : vector<17x17xf32>
    %cst_18 = arith.constant dense<0.000000e+00> : vector<17x32xf32>
    %43 = tpu.matmul %42, %31, %cst_18 {dimension_numbers = #tpu.dot_dimension_numbers<[1], [0], [0], [1], [0, 0, 1, 1], [], []>} : vector<17x17xf32>, vector<17x32xf32>, vector<17x32xf32> -> vector<17x32xf32>
    %c32 = arith.constant 32 : index
    %c0_19 = arith.constant 0 : index
    %44 = vector.load %arg3[%c32, %c0_19] : memref<128x128xf32, #tpu.memory_space<vmem>>, vector<32x128xf32>
    %cst_20 = arith.constant dense<0.000000e+00> : vector<17x128xf32>
    %45 = tpu.matmul %43, %44, %cst_20 {dimension_numbers = #tpu.dot_dimension_numbers<[1], [0], [0], [1], [0, 0, 1, 1], [], []>} : vector<17x32xf32>, vector<32x128xf32>, vector<17x128xf32> -> vector<17x128xf32>
    %46 = arith.addf %26, %45 : vector<17x128xf32>
    %47 = vector.extract_strided_slice %1 {offsets = [0, 64], sizes = [17, 32], strides = [1, 1]} : vector<17x384xf32> to vector<17x32xf32>
    %cst_21 = arith.constant 0.176776692 : f32
    %48 = vector.broadcast %cst_21 : f32 to vector<17x32xf32>
    %49 = arith.mulf %47, %48 : vector<17x32xf32>
    %50 = vector.extract_strided_slice %1 {offsets = [0, 192], sizes = [17, 32], strides = [1, 1]} : vector<17x384xf32> to vector<17x32xf32>
    %51 = vector.extract_strided_slice %1 {offsets = [0, 320], sizes = [17, 32], strides = [1, 1]} : vector<17x384xf32> to vector<17x32xf32>
    %cst_22 = arith.constant dense<0.000000e+00> : vector<17x17xf32>
    %52 = tpu.matmul %49, %50, %cst_22 {dimension_numbers = #tpu.dot_dimension_numbers<[1], [1], [0], [0], [0, 0, 1, 0], [], []>} : vector<17x32xf32>, vector<17x32xf32>, vector<17x17xf32> -> vector<17x17xf32>
    %cst_23 = arith.constant dense<0xFF800000> : vector<17xf32>
    %53 = vector.multi_reduction <maximumf>, %52, %cst_23 [1] : vector<17x17xf32> to vector<17xf32>
    %54 = vector.shape_cast %53 : vector<17xf32> to vector<17x1xf32>
    %55 = vector.broadcast %54 : vector<17x1xf32> to vector<17x17xf32>
    %56 = arith.subf %52, %55 : vector<17x17xf32>
    %57 = math.exp %56 : vector<17x17xf32>
    %cst_24 = arith.constant dense<0.000000e+00> : vector<17xf32>
    %58 = vector.multi_reduction <add>, %57, %cst_24 [1] : vector<17x17xf32> to vector<17xf32>
    %59 = vector.shape_cast %58 : vector<17xf32> to vector<17x1xf32>
    %60 = tpu.reciprocal %59 {approx = true} : vector<17x1xf32> -> vector<17x1xf32>
    %61 = vector.broadcast %60 : vector<17x1xf32> to vector<17x17xf32>
    %62 = arith.mulf %57, %61 : vector<17x17xf32>
    %cst_25 = arith.constant dense<0.000000e+00> : vector<17x32xf32>
    %63 = tpu.matmul %62, %51, %cst_25 {dimension_numbers = #tpu.dot_dimension_numbers<[1], [0], [0], [1], [0, 0, 1, 1], [], []>} : vector<17x17xf32>, vector<17x32xf32>, vector<17x32xf32> -> vector<17x32xf32>
    %c64 = arith.constant 64 : index
    %c0_26 = arith.constant 0 : index
    %64 = vector.load %arg3[%c64, %c0_26] : memref<128x128xf32, #tpu.memory_space<vmem>>, vector<32x128xf32>
    %cst_27 = arith.constant dense<0.000000e+00> : vector<17x128xf32>
    %65 = tpu.matmul %63, %64, %cst_27 {dimension_numbers = #tpu.dot_dimension_numbers<[1], [0], [0], [1], [0, 0, 1, 1], [], []>} : vector<17x32xf32>, vector<32x128xf32>, vector<17x128xf32> -> vector<17x128xf32>
    %66 = arith.addf %46, %65 : vector<17x128xf32>
    %67 = vector.extract_strided_slice %1 {offsets = [0, 96], sizes = [17, 32], strides = [1, 1]} : vector<17x384xf32> to vector<17x32xf32>
    %cst_28 = arith.constant 0.176776692 : f32
    %68 = vector.broadcast %cst_28 : f32 to vector<17x32xf32>
    %69 = arith.mulf %67, %68 : vector<17x32xf32>
    %70 = vector.extract_strided_slice %1 {offsets = [0, 224], sizes = [17, 32], strides = [1, 1]} : vector<17x384xf32> to vector<17x32xf32>
    %71 = vector.extract_strided_slice %1 {offsets = [0, 352], sizes = [17, 32], strides = [1, 1]} : vector<17x384xf32> to vector<17x32xf32>
    %cst_29 = arith.constant dense<0.000000e+00> : vector<17x17xf32>
    %72 = tpu.matmul %69, %70, %cst_29 {dimension_numbers = #tpu.dot_dimension_numbers<[1], [1], [0], [0], [0, 0, 1, 0], [], []>} : vector<17x32xf32>, vector<17x32xf32>, vector<17x17xf32> -> vector<17x17xf32>
    %cst_30 = arith.constant dense<0xFF800000> : vector<17xf32>
    %73 = vector.multi_reduction <maximumf>, %72, %cst_30 [1] : vector<17x17xf32> to vector<17xf32>
    %74 = vector.shape_cast %73 : vector<17xf32> to vector<17x1xf32>
    %75 = vector.broadcast %74 : vector<17x1xf32> to vector<17x17xf32>
    %76 = arith.subf %72, %75 : vector<17x17xf32>
    %77 = math.exp %76 : vector<17x17xf32>
    %cst_31 = arith.constant dense<0.000000e+00> : vector<17xf32>
    %78 = vector.multi_reduction <add>, %77, %cst_31 [1] : vector<17x17xf32> to vector<17xf32>
    %79 = vector.shape_cast %78 : vector<17xf32> to vector<17x1xf32>
    %80 = tpu.reciprocal %79 {approx = true} : vector<17x1xf32> -> vector<17x1xf32>
    %81 = vector.broadcast %80 : vector<17x1xf32> to vector<17x17xf32>
    %82 = arith.mulf %77, %81 : vector<17x17xf32>
    %cst_32 = arith.constant dense<0.000000e+00> : vector<17x32xf32>
    %83 = tpu.matmul %82, %71, %cst_32 {dimension_numbers = #tpu.dot_dimension_numbers<[1], [0], [0], [1], [0, 0, 1, 1], [], []>} : vector<17x17xf32>, vector<17x32xf32>, vector<17x32xf32> -> vector<17x32xf32>
    %c96 = arith.constant 96 : index
    %c0_33 = arith.constant 0 : index
    %84 = vector.load %arg3[%c96, %c0_33] : memref<128x128xf32, #tpu.memory_space<vmem>>, vector<32x128xf32>
    %cst_34 = arith.constant dense<0.000000e+00> : vector<17x128xf32>
    %85 = tpu.matmul %83, %84, %cst_34 {dimension_numbers = #tpu.dot_dimension_numbers<[1], [0], [0], [1], [0, 0, 1, 1], [], []>} : vector<17x32xf32>, vector<32x128xf32>, vector<17x128xf32> -> vector<17x128xf32>
    %86 = arith.addf %66, %85 : vector<17x128xf32>
    %87 = vector.shape_cast %86 : vector<17x128xf32> to vector<1x17x128xf32>
    %c0_35 = arith.constant 0 : index
    %c0_36 = arith.constant 0 : index
    %c0_37 = arith.constant 0 : index
    %88 = vector.load %arg5[%c0_35, %c0_36, %c0_37] : memref<1x17x128xf32, #tpu.memory_space<vmem>>, vector<1x17x128xf32>
    tpu.vector_store %arg5[%c0_35, %c0_36, %c0_37], %87 {strides = array<i32>} : memref<1x17x128xf32, #tpu.memory_space<vmem>>, vector<1x17x128xf32>,
    return
  }
  func.func @transform_0(%arg0: i32) -> (i32, i32, i32) {
    %c0_i32 = arith.constant 0 : i32
    %c0_i32_0 = arith.constant 0 : i32
    %c0_i32_1 = arith.constant 0 : i32
    return %arg0, %c0_i32, %c0_i32_0 : i32, i32, i32
  }
  func.func @transform_1(%arg0: i32) -> (i32, i32, i32) {
    %c0_i32 = arith.constant 0 : i32
    %c0_i32_0 = arith.constant 0 : i32
    %c0_i32_1 = arith.constant 0 : i32
    return %arg0, %c0_i32, %c0_i32_0 : i32, i32, i32
  }
  func.func @transform_2(%arg0: i32) -> (i32, i32) {
    %c0_i32 = arith.constant 0 : i32
    %c0_i32_0 = arith.constant 0 : i32
    %c0_i32_1 = arith.constant 0 : i32
    return %c0_i32, %c0_i32_0 : i32, i32
  }
  func.func @transform_3(%arg0: i32) -> (i32, i32) {
    %c0_i32 = arith.constant 0 : i32
    %c0_i32_0 = arith.constant 0 : i32
    %c0_i32_1 = arith.constant 0 : i32
    return %c0_i32, %c0_i32_0 : i32, i32
  }
  func.func @transform_4(%arg0: i32) -> (i32, i32, i32) {
    %c0_i32 = arith.constant 0 : i32
    %c0_i32_0 = arith.constant 0 : i32
    %c0_i32_1 = arith.constant 0 : i32
    return %arg0, %c0_i32, %c0_i32_0 : i32, i32, i32
  }
}

module attributes {stable_mosaic.version = 11 : i64} {
  func.func @_ln_kernel(%arg0: i32, %arg1: memref<34x128xf32, #tpu.memory_space<vmem>>, %arg2: memref<1x128xf32, #tpu.memory_space<vmem>>, %arg3: memref<1x128xf32, #tpu.memory_space<vmem>>, %arg4: memref<34x128xf32, #tpu.memory_space<vmem>>) attributes {dimension_semantics = [#tpu.dimension_semantics<parallel>], iteration_bounds = array<i64: 1>, scalar_prefetch = 0 : i64, scratch_operands = 0 : i64, tpu.core_type = #tpu.core_type<tc>, window_params = [{transform_indices = @transform_0, window_bounds = array<i64: 34, 128>}, {pipeline_mode = #tpu.pipeline_mode<synchronous>, transform_indices = @transform_1, window_bounds = array<i64: 1, 128>}, {pipeline_mode = #tpu.pipeline_mode<synchronous>, transform_indices = @transform_2, window_bounds = array<i64: 1, 128>}, {transform_indices = @transform_3, window_bounds = array<i64: 34, 128>}]} {
    %c0 = arith.constant 0 : index
    %c0_0 = arith.constant 0 : index
    %0 = vector.load %arg1[%c0, %c0_0] : memref<34x128xf32, #tpu.memory_space<vmem>>, vector<34x128xf32>
    %c0_1 = arith.constant 0 : index
    %c0_2 = arith.constant 0 : index
    %1 = vector.load %arg2[%c0_1, %c0_2] : memref<1x128xf32, #tpu.memory_space<vmem>>, vector<1x128xf32>
    %c0_3 = arith.constant 0 : index
    %c0_4 = arith.constant 0 : index
    %2 = vector.load %arg3[%c0_3, %c0_4] : memref<1x128xf32, #tpu.memory_space<vmem>>, vector<1x128xf32>
    %cst = arith.constant dense<0.000000e+00> : vector<34xf32>
    %3 = vector.multi_reduction <add>, %0, %cst [1] : vector<34x128xf32> to vector<34xf32>
    %4 = vector.shape_cast %3 : vector<34xf32> to vector<34x1xf32>
    %cst_5 = arith.constant 1.280000e+02 : f32
    %5 = vector.broadcast %cst_5 : f32 to vector<34x1xf32>
    %6 = arith.divf %4, %5 : vector<34x1xf32>
    %7 = vector.broadcast %6 : vector<34x1xf32> to vector<34x128xf32>
    %8 = arith.subf %0, %7 : vector<34x128xf32>
    %9 = arith.mulf %8, %8 : vector<34x128xf32>
    %cst_6 = arith.constant dense<0.000000e+00> : vector<34xf32>
    %10 = vector.multi_reduction <add>, %9, %cst_6 [1] : vector<34x128xf32> to vector<34xf32>
    %11 = vector.shape_cast %10 : vector<34xf32> to vector<34x1xf32>
    %cst_7 = arith.constant 1.280000e+02 : f32
    %12 = vector.broadcast %cst_7 : f32 to vector<34x1xf32>
    %13 = arith.divf %11, %12 : vector<34x1xf32>
    %14 = vector.broadcast %6 : vector<34x1xf32> to vector<34x128xf32>
    %15 = arith.subf %0, %14 : vector<34x128xf32>
    %cst_8 = arith.constant 9.99999996E-13 : f32
    %16 = vector.broadcast %cst_8 : f32 to vector<34x1xf32>
    %17 = arith.addf %13, %16 : vector<34x1xf32>
    %18 = math.rsqrt %17 : vector<34x1xf32>
    %19 = vector.broadcast %18 : vector<34x1xf32> to vector<34x128xf32>
    %20 = arith.mulf %15, %19 : vector<34x128xf32>
    %21 = vector.broadcast %1 : vector<1x128xf32> to vector<34x128xf32>
    %22 = arith.mulf %20, %21 : vector<34x128xf32>
    %23 = vector.broadcast %2 : vector<1x128xf32> to vector<34x128xf32>
    %24 = arith.addf %22, %23 : vector<34x128xf32>
    %c0_9 = arith.constant 0 : index
    %c0_10 = arith.constant 0 : index
    %25 = vector.load %arg4[%c0_9, %c0_10] : memref<34x128xf32, #tpu.memory_space<vmem>>, vector<34x128xf32>
    tpu.vector_store %arg4[%c0_9, %c0_10], %24 {strides = array<i32>} : memref<34x128xf32, #tpu.memory_space<vmem>>, vector<34x128xf32>,
    return
  }
  func.func @transform_0(%arg0: i32) -> (i32, i32) {
    %c0_i32 = arith.constant 0 : i32
    %c0_i32_0 = arith.constant 0 : i32
    return %arg0, %c0_i32 : i32, i32
  }
  func.func @transform_1(%arg0: i32) -> (i32, i32) {
    %c0_i32 = arith.constant 0 : i32
    %c0_i32_0 = arith.constant 0 : i32
    %c0_i32_1 = arith.constant 0 : i32
    return %c0_i32, %c0_i32_0 : i32, i32
  }
  func.func @transform_2(%arg0: i32) -> (i32, i32) {
    %c0_i32 = arith.constant 0 : i32
    %c0_i32_0 = arith.constant 0 : i32
    %c0_i32_1 = arith.constant 0 : i32
    return %c0_i32, %c0_i32_0 : i32, i32
  }
  func.func @transform_3(%arg0: i32) -> (i32, i32) {
    %c0_i32 = arith.constant 0 : i32
    %c0_i32_0 = arith.constant 0 : i32
    return %arg0, %c0_i32 : i32, i32
  }
}

</mosaic_0001>

<bundles_post_ra>
// kernel: vit_forward.8
= control target key start
LH: loop header
LB: loop body
LE: loop exit
PB: predicated region body
PF: predicated region fallthrough
CT: control target
= control target key end

     0   :  { %vm50_vm0 = vcmask 523264   ;;  %s301_s1 = inlined_call_operand.vmem [shape: f32[192,128], index: 1, kind: input, shape index: {}]   ;;  %s302_s0 = inlined_call_operand.vmem [shape: f32[32,192], index: 0, kind: input, shape index: {}]   ;;  %s303_s2 = inlined_call_operand.vmem [shape: f32[1,128], index: 2, kind: input, shape index: {}]   ;;  %s304_s3 = inlined_call_operand.vmem [shape: f32[32,128], index: 3, kind: output, shape index: {}]  }
   0x1   :  { %v37_v0 = vld [vmem:[%s301_s1 + $0x78] sm:$0xff]  ;;  %v36_v1 = vld [vmem:[%s301_s1 + $0x70] sm:$0xff]  ;;  %v35_v3 = vld [vmem:[%s301_s1 + $0x68] sm:$0xff] }
   0x2   :  { %63 = vmatpush.msra.mxu0 %v37_v0  ;;  %133 = vmatpush.msra.mxu2 %v37_v0  ;;  %v45_v2 = vld [vmem:[%s301_s1 + $0xb8] sm:$0xff]  ;;  %v44_v4 = vld [vmem:[%s301_s1 + $0xb0] sm:$0xff]  ;;  %v43_v5 = vld [vmem:[%s301_s1 + $0xa8] sm:$0xff] }
   0x3   :  { %134 = vmatpush.msra.mxu3 %v37_v0  ;;  %100 = vmatpush.msra.mxu1 %v45_v2  ;;  %v34_v6 = vld [vmem:[%s301_s1 + $0x60] sm:$0xff]  ;;  %v33_v8 = vld [vmem:[%s301_s1 + $0x58] sm:$0xff]  ;;  %v32_v10 = vld [vmem:[%s301_s1 + $0x50] sm:$0xff] }
   0x4   :  { %64 = vmatpush.msra.mxu0 %v36_v1  ;;  %135 = vmatpush.msra.mxu2 %v36_v1  ;;  %v42_v7 = vld [vmem:[%s301_s1 + $0xa0] sm:$0xff]  ;;  %v41_v9 = vld [vmem:[%s301_s1 + $0x98] sm:$0xff]  ;;  %v40_v11 = vld [vmem:[%s301_s1 + $0x90] sm:$0xff] }
   0x5   :  { %136 = vmatpush.msra.mxu3 %v36_v1  ;;  %101 = vmatpush.msra.mxu1 %v44_v4  ;;  %v31_v12 = vld [vmem:[%s301_s1 + $0x48] sm:$0xff]  ;;  %v30_v14 = vld [vmem:[%s301_s1 + $0x40] sm:$0xff]  ;;  %v29_v16 = vld [vmem:[%s301_s1 + $0x38] sm:$0xff] }
   0x6   :  { %65 = vmatpush.msra.mxu0 %v35_v3  ;;  %137 = vmatpush.msra.mxu2 %v35_v3  ;;  %v39_v13 = vld [vmem:[%s301_s1 + $0x88] sm:$0xff]  ;;  %v38_v15 = vld [vmem:[%s301_s1 + $0x80] sm:$0xff]  ;;  %v28_v18 = vld [vmem:[%s301_s1 + $0x30] sm:$0xff] }
   0x7   :  { %138 = vmatpush.msra.mxu3 %v35_v3  ;;  %102 = vmatpush.msra.mxu1 %v43_v5  ;;  %v15_v17 = vld [vmem:[%s302_s0 + $0x8] sm:$0xff]  ;;  %v26_v20 = vld [vmem:[%s301_s1 + $0x20] sm:$0xff]  ;;  %v25_v21 = vld [vmem:[%s301_s1 + $0x18] sm:$0xff] }
   0x8   :  { %66 = vmatpush.msra.mxu0 %v34_v6  ;;  %139 = vmatpush.msra.mxu2 %v34_v6  ;;  %v27_v19 = vld [vmem:[%s301_s1 + $0x28] sm:$0xff]  ;;  %v17_v22 = vld [vmem:[%s302_s0 + $0x18] sm:$0xff]  ;;  %v24_v23 = vld [vmem:[%s301_s1 + $0x10] sm:$0xff] }
   0x9   :  { %140 = vmatpush.msra.mxu3 %v34_v6  ;;  %103 = vmatpush.msra.mxu1 %v42_v7  ;;  %v23_v24 = vld [vmem:[%s301_s1 + $0x8] sm:$0xff]  ;;  %v22_v25 = vld [vmem:[%s301_s1] sm:$0xff]  ;;  %v16_v27 = vld [vmem:[%s302_s0 + $0x10] sm:$0xff] }
   0xa   :  { %67 = vmatpush.msra.mxu0 %v33_v8  ;;  %141 = vmatpush.msra.mxu2 %v33_v8  ;;  %v14_v26 = vld [vmem:[%s302_s0] sm:$0xff]  ;;  %v19_v29 = vld [vmem:[%s302_s0 + $0x28] sm:$0xff]  ;;  %v20_v30 = vld [vmem:[%s302_s0 + $0x30] sm:$0xff] }
   0xb   :  { %142 = vmatpush.msra.mxu3 %v33_v8  ;;  %104 = vmatpush.msra.mxu1 %v41_v9  ;;  %v18_v28 = vld [vmem:[%s302_s0 + $0x20] sm:$0xff]  ;;  %v21_v31 = vld [vmem:[%s302_s0 + $0x38] sm:$0xff] }
   0xc   :  { %68 = vmatpush.msra.mxu0 %v32_v10  ;;  %143 = vmatpush.msra.mxu2 %v32_v10  ;;  %v165_v34 = vld [vmem:[%s303_s2] ss:$0 sm:$0xff] }
   0xd   :  { %144 = vmatpush.msra.mxu3 %v32_v10  ;;  %105 = vmatpush.msra.mxu1 %v40_v11 }
   0xe   :  { %69 = vmatpush.msra.mxu0 %v31_v12  ;;  %145 = vmatpush.msra.mxu2 %v31_v12 }
   0xf   :  { %146 = vmatpush.msra.mxu3 %v31_v12  ;;  %106 = vmatpush.msra.mxu1 %v39_v13 }
  0x10   :  { %70 = vmatpush.msra.mxu0 %v30_v14  ;;  %147 = vmatpush.msra.mxu2 %v30_v14 }
  0x11   :  { %148 = vmatpush.msra.mxu3 %v30_v14  ;;  %107 = vmatpush.msra.mxu1 %v38_v15 }
  0x12   :  { %71 = vmatpush.msra.mxu0 %v29_v16  ;;  %149 = vmatpush.msra.mxu2 %v29_v16 }
  0x13   :  { %150 = vmatpush.msra.mxu3 %v29_v16  ;;  %129 = vmatmul.msk.f32.vlgmr.msra.gmra.mxu1 %vm50_vm0, %v15_v17 }
  0x14   :  { %72 = vmatpush.msra.mxu0 %v28_v18  ;;  %151 = vmatpush.msra.mxu2 %v28_v18 }
  0x15   :  { %152 = vmatpush.msra.mxu3 %v28_v18 }
  0x16   :  { %73 = vmatpush.msra.mxu0 %v27_v19  ;;  %153 = vmatpush.msra.mxu2 %v27_v19 }
  0x17   :  { %154 = vmatpush.msra.mxu3 %v27_v19 }
  0x18   :  { %74 = vmatpush.msra.mxu0 %v26_v20  ;;  %155 = vmatpush.msra.mxu2 %v26_v20 }
  0x19   :  { %156 = vmatpush.msra.mxu3 %v26_v20 }
  0x1a   :  { %75 = vmatpush.msra.mxu0 %v25_v21  ;;  %157 = vmatpush.msra.mxu2 %v25_v21 }
  0x1b   :  { %158 = vmatpush.msra.mxu3 %v25_v21  ;;  %130 = vmatmul.msk.f32.gmra.mxu1 %vm50_vm0, %v17_v22 }
  0x1c   :  { %76 = vmatpush.msra.mxu0 %v24_v23  ;;  %159 = vmatpush.msra.mxu2 %v24_v23 }
  0x1d   :  { %160 = vmatpush.msra.mxu3 %v24_v23 }
  0x1e   :  { %77 = vmatpush.msra.mxu0 %v23_v24  ;;  %161 = vmatpush.msra.mxu2 %v23_v24 }
  0x1f   :  { %162 = vmatpush.msra.mxu3 %v23_v24 }
  0x20   :  { %78 = vmatpush.msra.mxu0 %v22_v25  ;;  %163 = vmatpush.msra.mxu2 %v22_v25 }
  0x21   :  { %164 = vmatpush.msra.mxu3 %v22_v25  ;;  %79 = vmatmul.f32.vlgmr.msra.gmra.mxu0 %v14_v26 }
  0x22   :  { %82 = vmatmul.f32.vlgmr.msra.gmra.mxu2 %v16_v27  ;;  %85 = vmatmul.f32.vlgmr.msra.gmra.mxu3 %v18_v28 }
  0x23   :  { %131 = vmatmul.msk.f32.gmra.mxu1 %vm50_vm0, %v19_v29 }
  0x2a   :  { %88 = vmatmul.f32.gmra.mxu3 %v20_v30 }
  0x2b   :  { %132 = vmatmul.msk.f32.gmra.mxu1 %vm50_vm0, %v21_v31 }
  0x90   :  { %v109_v32 = vpop.f32.mrf.mxu1 }
  0x98   :  { %v112_v33 = vpop.f32.mrf.mxu1 }
  0x9e   :  { %v80_v35 = vpop.f32.mrf.mxu0 }
  0x9f   :  { %v81_v36 = vadd.f32 %v165_v34, %v80_v35 }
  0xa0   :  { %v115_v38 = vpop.f32.mrf.mxu1 }
  0xa1   :  { %v110_v37 = vadd.f32 %v109_v32, %v81_v36 }
  0xa3   :  { %121 = vst [vmem:[%s304_s3] sm:$0xff] %v110_v37 }
  0xa5   :  { %v83_v39 = vpop.f32.mrf.mxu2  ;;  %v86_v40 = vpop.f32.mrf.mxu3 }
  0xa6   :  { %v84_v41 = vadd.f32 %v165_v34, %v83_v39  ;;  %v87_v42 = vadd.f32 %v165_v34, %v86_v40 }
  0xa8   :  { %v113_v43 = vadd.f32 %v112_v33, %v84_v41  ;;  %v116_v44 = vadd.f32 %v115_v38, %v87_v42  ;;  %v118_v46 = vpop.f32.mrf.mxu1 }
  0xaa   :  { %122 = vst [vmem:[%s304_s3 + $0x8] sm:$0xff] %v113_v43 }
  0xab   :  { %123 = vst [vmem:[%s304_s3 + $0x10] sm:$0xff] %v116_v44 }
  0xad   :  { %v89_v45 = vpop.f32.mrf.mxu3 }
  0xae   :  { %v90_v47 = vadd.f32 %v165_v34, %v89_v45 }
  0xb0   :  { %v119_v48 = vadd.f32 %v118_v46, %v90_v47 }
  0xb2   :  { %124 = vst [vmem:[%s304_s3 + $0x18] sm:$0xff] %v119_v48 }

// kernel: vit_forward.15
= control target key start
LH: loop header
LB: loop body
LE: loop exit
PB: predicated region body
PF: predicated region fallthrough
CT: control target
= control target key end

     0   :  { %vm29_vm0 = vcmask 1041408   ;;  %v171_v6 = vmov 128.0   ;;  %s250_s0 = inlined_call_operand.vmem [shape: f32[34,128], index: 0, kind: input, shape index: {}]   ;;  %s251_s1 = inlined_call_operand.vmem [shape: f32[1,128], index: 1, kind: input, shape index: {}]   ;;  %s252_s2 = inlined_call_operand.vmem [shape: f32[1,128], index: 2, kind: input, shape index: {}]   ;;  %s253_s3 = inlined_call_operand.vmem [shape: f32[34,128], index: 3, kind: output, shape index: {}]  }
   0x1   :  { %v15_v0 = vld [vmem:[%s250_s0 + $0x8] sm:$0xff]  ;;  %v18_v1 = vld [vmem:[%s250_s0 + $0x20] sm:$0x3]  ;;  %v17_v3 = vld [vmem:[%s250_s0 + $0x18] sm:$0xff]  ;;  %159 = vrcp.f32 %v171_v6 }
   0x2   :  { %23 = vadd.xlane.f32.xlu1 %v15_v0  ;;  %v30_v2 = vsel %vm29_vm0, %v18_v1, 0.0  ;;  %27 = vadd.xlane.f32.xlu2 %v17_v3  ;;  %v16_v4 = vld [vmem:[%s250_s0 + $0x10] sm:$0xff]  ;;  %v14_v5 = vld [vmem:[%s250_s0] sm:$0xff] }
   0x3   :  { %31 = vadd.xlane.f32.xlu0 %v30_v2  ;;  %v157_v59 = vld [vmem:[%s251_s1] ss:$0 sm:$0xff] }
   0x7   :  { %v160_v7 = vpop.eup %159 }
   0x8   :  { %v34_v8 = vmul.f32 128.0, %v160_v7  ;;  %vm38_vm1 = vweird.f32 %v160_v7 }
   0xa   :  { %25 = vadd.xlane.f32.xlu1 %v16_v4  ;;  %v35_v9 = vsub.f32 1.0, %v34_v8 }
   0xb   :  { %21 = vadd.xlane.f32.xlu0 %v14_v5 }
   0xc   :  { %v36_v10 = vmul.f32 %v160_v7, %v35_v9 }
   0xe   :  { %v37_v11 = vadd.f32 %v160_v7, %v36_v10 }
  0x10   :  { %v39_v12 = vsel %vm38_vm1, %v160_v7, %v37_v11 }
  0x75   :  { %v24_v13 = vpop.xlane.xlu1 %23  ;;  %v28_v23 = vpop.xlane.xlu2 %27 }
  0x76   :  { %v41_v14 = vmul.f32 %v39_v12, %v24_v13  ;;  %v32_v15 = vpop.xlane.xlu0 %31  ;;  %v43_v28 = vmul.f32 %v39_v12, %v28_v23 }
  0x77   :  { %v44_v16 = vmul.f32 %v39_v12, %v32_v15 }
  0x78   :  { %v46_v17 = vsub.f32 %v15_v0, %v41_v14  ;;  %v221_v32 = vsub.f32 %v17_v3, %v43_v28  ;;  %v158_v0 = vld [vmem:[%s252_s2] ss:$0 sm:$0xff] }
  0x79   :  { %v208_v19 = vsub.f32 %v18_v1, %v44_v16 }
  0x7a   :  { %v51_v18 = vmul.f32 %v46_v17, %v46_v17  ;;  %v53_v33 = vmul.f32 %v221_v32, %v221_v32 }
  0x7b   :  { %v54_v25 = vmul.f32 %v208_v19, %v208_v19 }
  0x7c   :  { %57 = vadd.xlane.f32.xlu0 %v51_v18 }
  0x7d   :  { %v26_v20 = vpop.xlane.xlu1 %25  ;;  %v63_v30 = vsel %vm29_vm0, %v54_v25, 0.0 }
  0x7e   :  { %v42_v21 = vmul.f32 %v39_v12, %v26_v20  ;;  %v22_v22 = vpop.xlane.xlu0 %21 }
  0x7f   :  { %v40_v24 = vmul.f32 %v39_v12, %v22_v22 }
  0x80   :  { %v212_v26 = vsub.f32 %v16_v4, %v42_v21 }
  0x81   :  { %v214_v27 = vsub.f32 %v14_v5, %v40_v24 }
  0x82   :  { %v52_v29 = vmul.f32 %v212_v26, %v212_v26 }
  0x83   :  { %v50_v31 = vmul.f32 %v214_v27, %v214_v27 }
  0x84   :  { %59 = vadd.xlane.f32.xlu1 %v52_v29  ;;  %64 = vadd.xlane.f32.xlu0 %v63_v30 }
  0x85   :  { %55 = vadd.xlane.f32.xlu2 %v50_v31 }
  0x8d   :  { %61 = vadd.xlane.f32.xlu2 %v53_v33 }
  0xef   :  { %v58_v34 = vpop.xlane.xlu0 %57 }
  0xf0   :  { %v67_v35 = vmul.f32 %v58_v34, %v39_v12 }
  0xf2   :  { %v72_v36 = vadd.f32 1e-12, %v67_v35 }
  0xf4   :  { %161 = vrsqrt.f32 %v72_v36  ;;  %vm92_vm2 = vweird.f32 %v72_v36 }
  0xf7   :  { %v60_v37 = vpop.xlane.xlu1 %59  ;;  %v65_v38 = vpop.xlane.xlu0 %64 }
  0xf8   :  { %v68_v39 = vmul.f32 %v60_v37, %v39_v12  ;;  %v70_v40 = vmul.f32 %v65_v38, %v39_v12  ;;  %v56_v41 = vpop.xlane.xlu2 %55 }
  0xf9   :  { %v66_v42 = vmul.f32 %v56_v41, %v39_v12 }
  0xfa   :  { %v162_v43 = vpop.eup %161  ;;  %v73_v44 = vadd.f32 1e-12, %v68_v39  ;;  %v75_v45 = vadd.f32 1e-12, %v70_v40 }
  0xfb   :  { %v87_v46 = vmul.f32 %v162_v43, %v72_v36  ;;  %v71_v47 = vadd.f32 1e-12, %v66_v42  ;;  %vm93_vm3 = vweird.f32 %v162_v43 }
  0xfc   :  { %163 = vrsqrt.f32 %v73_v44  ;;  %vm94_vm4 = vmor %vm92_vm2, %vm93_vm3  ;;  %vm102_vm5 = vweird.f32 %v73_v44  ;;  %vm122_vm10 = vweird.f32 %v75_v45 }
  0xfd   :  { %v88_v48 = vmul.f32 %v162_v43, %v87_v46  ;;  %165 = vrsqrt.f32 %v75_v45  ;;  %vm82_vm12 = vweird.f32 %v71_v47 }
  0xfe   :  { %167 = vrsqrt.f32 %v71_v47 }
  0xff   :  { %v89_v49 = vmul.f32 0.5, %v88_v48 }
 0x100   :  { %v62_v50 = vpop.xlane.xlu2 %61 }
 0x101   :  { %v90_v51 = vsub.f32 1.5, %v89_v49  ;;  %v69_v52 = vmul.f32 %v62_v50, %v39_v12 }
 0x102   :  { %v164_v53 = vpop.eup %163 }
 0x103   :  { %v166_v54 = vpop.eup %165  ;;  %v91_v55 = vmul.f32 %v162_v43, %v90_v51  ;;  %v97_v56 = vmul.f32 %v164_v53, %v73_v44  ;;  %v74_v57 = vadd.f32 1e-12, %v69_v52  ;;  %vm103_vm6 = vweird.f32 %v164_v53 }
 0x104   :  { %v168_v58 = vpop.eup %167  ;;  %v117_v60 = vmul.f32 %v166_v54, %v75_v45  ;;  %vm123_vm7 = vweird.f32 %v166_v54  ;;  %vm104_vm9 = vmor %vm102_vm5, %vm103_vm6 }
 0x105   :  { %v95_v61 = vsel %vm94_vm4, %v162_v43, %v91_v55  ;;  %v98_v62 = vmul.f32 %v164_v53, %v97_v56  ;;  %v77_v63 = vmul.f32 %v168_v58, %v71_v47  ;;  %169 = vrsqrt.f32 %v74_v57  ;;  %vm124_vm11 = vmor %vm122_vm10, %vm123_vm7 }
 0x106   :  { %v127_v1 = vmul.f32 %v95_v61, %v46_v17  ;;  %v118_v2 = vmul.f32 %v166_v54, %v117_v60  ;;  %vm83_vm8 = vweird.f32 %v168_v58  ;;  %vm112_vm15 = vweird.f32 %v74_v57 }
 0x107   :  { %v99_v3 = vmul.f32 0.5, %v98_v62  ;;  %v78_v4 = vmul.f32 %v168_v58, %v77_v63  ;;  %vm84_vm13 = vmor %vm82_vm12, %vm83_vm8 }
 0x108   :  { %v135_v5 = vmul.f32 %v157_v59, %v127_v1  ;;  %v119_v6 = vmul.f32 0.5, %v118_v2 }
 0x109   :  { %v100_v7 = vsub.f32 1.5, %v99_v3  ;;  %v79_v8 = vmul.f32 0.5, %v78_v4 }
 0x10a   :  { %v143_v9 = vadd.f32 %v158_v0, %v135_v5  ;;  %v120_v10 = vsub.f32 1.5, %v119_v6 }
 0x10b   :  { %v101_v11 = vmul.f32 %v164_v53, %v100_v7  ;;  %v80_v12 = vsub.f32 1.5, %v79_v8  ;;  %v170_v13 = vpop.eup %169 }
 0x10c   :  { %148 = vst [vmem:[%s253_s3 + $0x8] sm:$0xff] %v143_v9  ;;  %v121_v14 = vmul.f32 %v166_v54, %v120_v10  ;;  %v107_v17 = vmul.f32 %v170_v13, %v74_v57  ;;  %vm113_vm14 = vweird.f32 %v170_v13 }
 0x10d   :  { %v105_v15 = vsel %vm104_vm9, %v164_v53, %v101_v11  ;;  %v81_v16 = vmul.f32 %v168_v58, %v80_v12  ;;  %vm114_vm0 = vmor %vm112_vm15, %vm113_vm14 }
 0x10e   :  { %v128_v18 = vmul.f32 %v105_v15, %v212_v26  ;;  %v125_v20 = vsel %vm124_vm11, %v166_v54, %v121_v14  ;;  %v108_v23 = vmul.f32 %v170_v13, %v107_v17 }
 0x10f   :  { %v130_v21 = vmul.f32 %v125_v20, %v208_v19  ;;  %v85_v22 = vsel %vm84_vm13, %v168_v58, %v81_v16 }
 0x110   :  { %v136_v24 = vmul.f32 %v157_v59, %v128_v18  ;;  %v126_v25 = vmul.f32 %v85_v22, %v214_v27  ;;  %v109_v29 = vmul.f32 0.5, %v108_v23 }
 0x111   :  { %v138_v28 = vmul.f32 %v157_v59, %v130_v21 }
 0x112   :  { %v144_v30 = vadd.f32 %v158_v0, %v136_v24  ;;  %v134_v31 = vmul.f32 %v157_v59, %v126_v25  ;;  %v110_v34 = vsub.f32 1.5, %v109_v29 }
 0x113   :  { %v146_v33 = vadd.f32 %v158_v0, %v138_v28 }
 0x114   :  { %149 = vst [vmem:[%s253_s3 + $0x10] sm:$0xff] %v144_v30  ;;  %v142_v26 = vadd.f32 %v158_v0, %v134_v31  ;;  %v111_v19 = vmul.f32 %v170_v13, %v110_v34 }
 0x115   :  { %151 = vst [vmem:[%s253_s3 + $0x20] sm:$0x3] %v146_v33 }
 0x116   :  { %147 = vst [vmem:[%s253_s3] sm:$0xff] %v142_v26  ;;  %v115_v27 = vsel %vm114_vm0, %v170_v13, %v111_v19 }
 0x117   :  { %v129_v35 = vmul.f32 %v115_v27, %v221_v32 }
 0x119   :  { %v137_v36 = vmul.f32 %v157_v59, %v129_v35 }
 0x11b   :  { %v145_v37 = vadd.f32 %v158_v0, %v137_v36 }
 0x11d   :  { %150 = vst [vmem:[%s253_s3 + $0x18] sm:$0xff] %v145_v37 }

// kernel: vit_forward.9
= control target key start
LH: loop header
LB: loop body
LE: loop exit
PB: predicated region body
PF: predicated region fallthrough
CT: control target
= control target key end

     0   :  { %vm35_vm0 = vcmask 1041408   ;;  %v355_v6 = vmov 128.0   ;;  %s644_s0 = inlined_call_operand.vmem [shape: f32[34,128], index: 0, kind: input, shape index: {}]   ;;  %s645_s3 = inlined_call_operand.vmem [shape: f32[128,384], index: 3, kind: input, shape index: {}]   ;;  %s646_s1 = inlined_call_operand.vmem [shape: f32[1,128], index: 1, kind: input, shape index: {}]   ;;  %s647_s2 = inlined_call_operand.vmem [shape: f32[1,128], index: 2, kind: input, shape index: {}]   ;;  %s648_s4 = inlined_call_operand.vmem [shape: f32[1,384], index: 4, kind: input, shape index: {}]   ;;  %s649_s5 = inlined_call_operand.vmem [shape: f32[34,384], index: 5, kind: output, shape index: {}]  }
   0x1   :  { %v22_v0 = vld [vmem:[%s644_s0 + $0x10] sm:$0xff]  ;;  %v20_v1 = vld [vmem:[%s644_s0] sm:$0xff]  ;;  %v23_v4 = vld [vmem:[%s644_s0 + $0x18] sm:$0xff]  ;;  %343 = vrcp.f32 %v355_v6 }
   0x2   :  { %31 = vadd.xlane.f32.xlu1 %v22_v0  ;;  %27 = vadd.xlane.f32.xlu0 %v20_v1  ;;  %v24_v2 = vld [vmem:[%s644_s0 + $0x20] sm:$0x3]  ;;  %v21_v5 = vld [vmem:[%s644_s0 + $0x8] sm:$0xff]  ;;  %v199_v12 = vld [vmem:[%s645_s3 + $0x170] sm:$0xff] }
   0x3   :  { %v36_v3 = vsel %vm35_vm0, %v24_v2, 0.0  ;;  %v198_v11 = vld [vmem:[%s645_s3 + $0x168] sm:$0xff]  ;;  %v200_v13 = vld [vmem:[%s645_s3 + $0x178] sm:$0xff]  ;;  %241 = vmatpush.msra.mxu1 %v199_v12  ;;  %v195_v14 = vld [vmem:[%s645_s3 + $0x150] sm:$0xff] }
   0x4   :  { %37 = vadd.xlane.f32.xlu2 %v36_v3  ;;  %209 = vmatpush.msra.mxu0 %v198_v11  ;;  %v196_v15 = vld [vmem:[%s645_s3 + $0x158] sm:$0xff]  ;;  %v197_v16 = vld [vmem:[%s645_s3 + $0x160] sm:$0xff]  ;;  %v194_v42 = vld [vmem:[%s645_s3 + $0x148] sm:$0xff] }
   0x5   :  { %273 = vmatpush.msra.mxu2 %v200_v13  ;;  %324 = vmatpush.msra.mxu3 %v198_v11  ;;  %v192_v40 = vld [vmem:[%s645_s3 + $0x138] sm:$0xff]  ;;  %v193_v41 = vld [vmem:[%s645_s3 + $0x140] sm:$0xff]  ;;  %v190_v44 = vld [vmem:[%s645_s3 + $0x128] sm:$0xff] }
   0x6   :  { %210 = vmatpush.msra.mxu0 %v195_v14  ;;  %242 = vmatpush.msra.mxu1 %v196_v15  ;;  %v189_v43 = vld [vmem:[%s645_s3 + $0x120] sm:$0xff]  ;;  %v191_v45 = vld [vmem:[%s645_s3 + $0x130] sm:$0xff]  ;;  %v186_v46 = vld [vmem:[%s645_s3 + $0x108] sm:$0xff] }
   0x7   :  { %v344_v7 = vpop.eup %343  ;;  %274 = vmatpush.msra.mxu2 %v197_v16  ;;  %325 = vmatpush.msra.mxu3 %v195_v14  ;;  %v187_v47 = vld [vmem:[%s645_s3 + $0x110] sm:$0xff]  ;;  %v188_v48 = vld [vmem:[%s645_s3 + $0x118] sm:$0xff]  ;;  %v185_v51 = vld [vmem:[%s645_s3 + $0x100] sm:$0xff] }
   0x8   :  { %v40_v8 = vmul.f32 128.0, %v344_v7  ;;  %vm44_vm1 = vweird.f32 %v344_v7  ;;  %211 = vmatpush.msra.mxu0 %v192_v40  ;;  %243 = vmatpush.msra.mxu1 %v193_v41  ;;  %v183_v49 = vld [vmem:[%s645_s3 + $0xf0] sm:$0xff]  ;;  %v184_v50 = vld [vmem:[%s645_s3 + $0xf8] sm:$0xff]  ;;  %v181_v53 = vld [vmem:[%s645_s3 + $0xe0] sm:$0xff] }
   0x9   :  { %275 = vmatpush.msra.mxu2 %v194_v42  ;;  %326 = vmatpush.msra.mxu3 %v192_v40  ;;  %v180_v52 = vld [vmem:[%s645_s3 + $0xd8] sm:$0xff]  ;;  %v182_v54 = vld [vmem:[%s645_s3 + $0xe8] sm:$0xff]  ;;  %v177_v55 = vld [vmem:[%s645_s3 + $0xc0] sm:$0xff] }
   0xa   :  { %33 = vadd.xlane.f32.xlu1 %v23_v4  ;;  %29 = vadd.xlane.f32.xlu0 %v21_v5  ;;  %v41_v9 = vsub.f32 1.0, %v40_v8  ;;  %v178_v56 = vld [vmem:[%s645_s3 + $0xc8] sm:$0xff]  ;;  %v179_v57 = vld [vmem:[%s645_s3 + $0xd0] sm:$0xff]  ;;  %v176_v60 = vld [vmem:[%s645_s3 + $0xb8] sm:$0xff] }
   0xb   :  { %212 = vmatpush.msra.mxu0 %v189_v43  ;;  %244 = vmatpush.msra.mxu1 %v190_v44  ;;  %v174_v58 = vld [vmem:[%s645_s3 + $0xa8] sm:$0xff]  ;;  %v175_v59 = vld [vmem:[%s645_s3 + $0xb0] sm:$0xff]  ;;  %v172_v62 = vld [vmem:[%s645_s3 + $0x98] sm:$0xff] }
   0xc   :  { %v42_v10 = vmul.f32 %v344_v7, %v41_v9  ;;  %276 = vmatpush.msra.mxu2 %v191_v45  ;;  %327 = vmatpush.msra.mxu3 %v189_v43  ;;  %v171_v61 = vld [vmem:[%s645_s3 + $0x90] sm:$0xff]  ;;  %v173_v63 = vld [vmem:[%s645_s3 + $0xa0] sm:$0xff]  ;;  %v162_v6 = vld [vmem:[%s645_s3 + $0x48] sm:$0xff] }
   0xd   :  { %213 = vmatpush.msra.mxu0 %v186_v46  ;;  %245 = vmatpush.msra.mxu1 %v187_v47  ;;  %v165_v3 = vld [vmem:[%s645_s3 + $0x60] sm:$0xff]  ;;  %v164_v8 = vld [vmem:[%s645_s3 + $0x58] sm:$0xff]  ;;  %v159_v9 = vld [vmem:[%s645_s3 + $0x30] sm:$0xff] }
   0xe   :  { %v43_v17 = vadd.f32 %v344_v7, %v42_v10  ;;  %277 = vmatpush.msra.mxu2 %v188_v48  ;;  %328 = vmatpush.msra.mxu3 %v186_v46  ;;  %v160_v10 = vld [vmem:[%s645_s3 + $0x38] sm:$0xff]  ;;  %v161_v11 = vld [vmem:[%s645_s3 + $0x40] sm:$0xff]  ;;  %v158_v14 = vld [vmem:[%s645_s3 + $0x28] sm:$0xff] }
   0xf   :  { %214 = vmatpush.msra.mxu0 %v183_v49  ;;  %246 = vmatpush.msra.mxu1 %v184_v50  ;;  %v156_v12 = vld [vmem:[%s645_s3 + $0x18] sm:$0xff]  ;;  %v157_v13 = vld [vmem:[%s645_s3 + $0x20] sm:$0xff]  ;;  %v154_v16 = vld [vmem:[%s645_s3 + $0x8] sm:$0xff] }
  0x10   :  { %v420_v18 = vsel %vm44_vm1, %v344_v7, %v43_v17  ;;  %278 = vmatpush.msra.mxu2 %v185_v51  ;;  %329 = vmatpush.msra.mxu3 %v183_v49  ;;  %v163_v7 = vld [vmem:[%s645_s3 + $0x50] sm:$0xff]  ;;  %v153_v15 = vld [vmem:[%s645_s3] sm:$0xff] }
  0x11   :  { %215 = vmatpush.msra.mxu0 %v180_v52  ;;  %247 = vmatpush.msra.mxu1 %v181_v53  ;;  %v155_v17 = vld [vmem:[%s645_s3 + $0x10] sm:$0xff]  ;;  %v341_v53 = vld [vmem:[%s646_s1] ss:$0 sm:$0xff] }
  0x12   :  { %279 = vmatpush.msra.mxu2 %v182_v54  ;;  %330 = vmatpush.msra.mxu3 %v180_v52 }
  0x13   :  { %216 = vmatpush.msra.mxu0 %v177_v55  ;;  %248 = vmatpush.msra.mxu1 %v178_v56  ;;  %v342_v56 = vld [vmem:[%s647_s2] ss:$0 sm:$0xff] }
  0x14   :  { %280 = vmatpush.msra.mxu2 %v179_v57  ;;  %331 = vmatpush.msra.mxu3 %v177_v55 }
  0x15   :  { %217 = vmatpush.msra.mxu0 %v174_v58  ;;  %249 = vmatpush.msra.mxu1 %v175_v59 }
  0x16   :  { %281 = vmatpush.msra.mxu2 %v176_v60  ;;  %332 = vmatpush.msra.mxu3 %v174_v58 }
  0x17   :  { %218 = vmatpush.msra.mxu0 %v171_v61  ;;  %250 = vmatpush.msra.mxu1 %v172_v62 }
  0x18   :  { %282 = vmatpush.msra.mxu2 %v173_v63  ;;  %333 = vmatpush.msra.mxu3 %v171_v61 }
  0x75   :  { %v32_v19 = vpop.xlane.xlu1 %31  ;;  %v28_v20 = vpop.xlane.xlu0 %27 }
  0x76   :  { %v48_v21 = vmul.f32 %v420_v18, %v32_v19  ;;  %v46_v22 = vmul.f32 %v420_v18, %v28_v20 }
  0x77   :  { %v38_v27 = vpop.xlane.xlu2 %37 }
  0x78   :  { %v424_v23 = vsub.f32 %v22_v0, %v48_v21  ;;  %v426_v24 = vsub.f32 %v20_v1, %v46_v22  ;;  %v50_v30 = vmul.f32 %v420_v18, %v38_v27  ;;  %v168_v0 = vld [vmem:[%s645_s3 + $0x78] sm:$0xff]  ;;  %v169_v1 = vld [vmem:[%s645_s3 + $0x80] sm:$0xff] }
  0x79   :  { %219 = vmatpush.msra.mxu0 %v168_v0  ;;  %251 = vmatpush.msra.mxu1 %v169_v1 }
  0x7a   :  { %v58_v25 = vmul.f32 %v424_v23, %v424_v23  ;;  %v56_v26 = vmul.f32 %v426_v24, %v426_v24  ;;  %v439_v35 = vsub.f32 %v24_v2, %v50_v30  ;;  %v170_v2 = vld [vmem:[%s645_s3 + $0x88] sm:$0xff]  ;;  %334 = vmatpush.msra.mxu3 %v168_v0 }
  0x7b   :  { %283 = vmatpush.msra.mxu2 %v170_v2  ;;  %220 = vmatpush.msra.mxu0 %v165_v3 }
  0x7c   :  { %65 = vadd.xlane.f32.xlu1 %v58_v25  ;;  %61 = vadd.xlane.f32.xlu2 %v56_v26  ;;  %v60_v38 = vmul.f32 %v439_v35, %v439_v35 }
  0x7d   :  { %v34_v28 = vpop.xlane.xlu1 %33  ;;  %v30_v29 = vpop.xlane.xlu0 %29  ;;  %335 = vmatpush.msra.mxu3 %v165_v3  ;;  %221 = vmatpush.msra.mxu0 %v162_v6 }
  0x7e   :  { %v49_v31 = vmul.f32 %v420_v18, %v34_v28  ;;  %v47_v32 = vmul.f32 %v420_v18, %v30_v29  ;;  %v69_v39 = vsel %vm35_vm0, %v60_v38, 0.0 }
  0x7f   :  { %336 = vmatpush.msra.mxu3 %v162_v6  ;;  %222 = vmatpush.msra.mxu0 %v159_v9 }
  0x80   :  { %v435_v33 = vsub.f32 %v23_v4, %v49_v31  ;;  %v437_v34 = vsub.f32 %v21_v5, %v47_v32  ;;  %v166_v4 = vld [vmem:[%s645_s3 + $0x68] sm:$0xff]  ;;  %v167_v5 = vld [vmem:[%s645_s3 + $0x70] sm:$0xff] }
  0x81   :  { %252 = vmatpush.msra.mxu1 %v166_v4  ;;  %284 = vmatpush.msra.mxu2 %v167_v5 }
  0x82   :  { %v59_v36 = vmul.f32 %v435_v33, %v435_v33  ;;  %v57_v37 = vmul.f32 %v437_v34, %v437_v34  ;;  %337 = vmatpush.msra.mxu3 %v159_v9  ;;  %223 = vmatpush.msra.mxu0 %v156_v12 }
  0x83   :  { %253 = vmatpush.msra.mxu1 %v163_v7  ;;  %285 = vmatpush.msra.mxu2 %v164_v8 }
  0x84   :  { %67 = vadd.xlane.f32.xlu2 %v59_v36  ;;  %63 = vadd.xlane.f32.xlu0 %v57_v37 }
  0x85   :  { %254 = vmatpush.msra.mxu1 %v160_v10  ;;  %286 = vmatpush.msra.mxu2 %v161_v11 }
  0x86   :  { %338 = vmatpush.msra.mxu3 %v156_v12  ;;  %224 = vmatpush.msra.mxu0 %v153_v15 }
  0x87   :  { %255 = vmatpush.msra.mxu1 %v157_v13  ;;  %287 = vmatpush.msra.mxu2 %v158_v14 }
  0x88   :  { %339 = vmatpush.msra.mxu3 %v153_v15 }
  0x89   :  { %256 = vmatpush.msra.mxu1 %v154_v16  ;;  %288 = vmatpush.msra.mxu2 %v155_v17 }
  0x8c   :  { %70 = vadd.xlane.f32.xlu0 %v69_v39 }
  0xef   :  { %v66_v19 = vpop.xlane.xlu1 %65  ;;  %v62_v20 = vpop.xlane.xlu2 %61 }
  0xf0   :  { %v74_v21 = vmul.f32 %v66_v19, %v420_v18  ;;  %v72_v22 = vmul.f32 %v62_v20, %v420_v18 }
  0xf2   :  { %v79_v25 = vadd.f32 1e-12, %v74_v21  ;;  %v77_v26 = vadd.f32 1e-12, %v72_v22 }
  0xf4   :  { %345 = vrsqrt.f32 %v79_v25  ;;  %vm88_vm3 = vweird.f32 %v77_v26  ;;  %vm108_vm5 = vweird.f32 %v79_v25 }
  0xf5   :  { %347 = vrsqrt.f32 %v77_v26 }
  0xf7   :  { %v68_v27 = vpop.xlane.xlu2 %67  ;;  %v64_v28 = vpop.xlane.xlu0 %63 }
  0xf8   :  { %v75_v29 = vmul.f32 %v68_v27, %v420_v18  ;;  %v73_v30 = vmul.f32 %v64_v28, %v420_v18 }
  0xfa   :  { %v346_v31 = vpop.eup %345  ;;  %v80_v32 = vadd.f32 1e-12, %v75_v29  ;;  %v78_v36 = vadd.f32 1e-12, %v73_v30 }
  0xfb   :  { %v348_v37 = vpop.eup %347  ;;  %v103_v38 = vmul.f32 %v346_v31, %v79_v25  ;;  %vm109_vm6 = vweird.f32 %v346_v31 }
  0xfc   :  { %v83_v39 = vmul.f32 %v348_v37, %v77_v26  ;;  %349 = vrsqrt.f32 %v80_v32  ;;  %vm89_vm2 = vweird.f32 %v348_v37  ;;  %vm98_vm8 = vweird.f32 %v78_v36  ;;  %vm586_vm9 = vmor %vm108_vm5, %vm109_vm6 }
  0xfd   :  { %351 = vrsqrt.f32 %v78_v36  ;;  %v104_v41 = vmul.f32 %v346_v31, %v103_v38  ;;  %vm90_vm4 = vmor %vm88_vm3, %vm89_vm2  ;;  %vm118_vm11 = vweird.f32 %v80_v32 }
  0xfe   :  { %v84_v40 = vmul.f32 %v348_v37, %v83_v39 }
  0xff   :  { %v71_v42 = vpop.xlane.xlu0 %70  ;;  %v105_v49 = vmul.f32 0.5, %v104_v41 }
 0x100   :  { %v85_v43 = vmul.f32 0.5, %v84_v40  ;;  %v76_v44 = vmul.f32 %v71_v42, %v420_v18 }
 0x101   :  { %v106_v57 = vsub.f32 1.5, %v105_v49 }
 0x102   :  { %v350_v45 = vpop.eup %349  ;;  %v86_v46 = vsub.f32 1.5, %v85_v43  ;;  %v81_v47 = vadd.f32 1e-12, %v76_v44 }
 0x103   :  { %v352_v48 = vpop.eup %351  ;;  %v113_v51 = vmul.f32 %v350_v45, %v80_v32  ;;  %v107_v0 = vmul.f32 %v346_v31, %v106_v57  ;;  %vm119_vm12 = vweird.f32 %v350_v45 }
 0x104   :  { %v87_v50 = vmul.f32 %v348_v37, %v86_v46  ;;  %v93_v52 = vmul.f32 %v352_v48, %v78_v36  ;;  %353 = vrsqrt.f32 %v81_v47  ;;  %vm99_vm7 = vweird.f32 %v352_v48  ;;  %vm120_vm13 = vmor %vm118_vm11, %vm119_vm12 }
 0x105   :  { %v114_v58 = vmul.f32 %v350_v45, %v113_v51  ;;  %vm100_vm10 = vmor %vm98_vm8, %vm99_vm7  ;;  %v111_v6 = vsel %vm586_vm9, %v346_v31, %v107_v0  ;;  %vm128_vm14 = vweird.f32 %v81_v47 }
 0x106   :  { %v91_v54 = vsel %vm90_vm4, %v348_v37, %v87_v50  ;;  %v94_v55 = vmul.f32 %v352_v48, %v93_v52  ;;  %v134_v11 = vmul.f32 %v111_v6, %v424_v23 }
 0x107   :  { %v132_v18 = vmul.f32 %v91_v54, %v426_v24  ;;  %v115_v24 = vmul.f32 0.5, %v114_v58 }
 0x108   :  { %v95_v59 = vmul.f32 0.5, %v94_v55  ;;  %v142_v14 = vmul.f32 %v341_v53, %v134_v11 }
 0x109   :  { %v140_v60 = vmul.f32 %v341_v53, %v132_v18  ;;  %v116_v7 = vsub.f32 1.5, %v115_v24 }
 0x10a   :  { %v354_v61 = vpop.eup %353  ;;  %v96_v62 = vsub.f32 1.5, %v95_v59  ;;  %v150_v16 = vadd.f32 %v342_v56, %v142_v14 }
 0x10b   :  { %v148_v63 = vadd.f32 %v342_v56, %v140_v60  ;;  %v123_v3 = vmul.f32 %v354_v61, %v81_v47  ;;  %v117_v12 = vmul.f32 %v350_v45, %v116_v7  ;;  %vm129_vm15 = vweird.f32 %v354_v61 }
 0x10c   :  { %v97_v2 = vmul.f32 %v352_v48, %v96_v62  ;;  %vm130_vm0 = vmor %vm128_vm14, %vm129_vm15 }
 0x10d   :  { %225 = vmatmul.f32.vlgmr.msra.gmra.mxu0 %v148_v63  ;;  %257 = vmatmul.f32.vlgmr.msra.gmra.mxu1 %v148_v63  ;;  %v124_v8 = vmul.f32 %v354_v61, %v123_v3  ;;  %v121_v15 = vsel %vm120_vm13, %v350_v45, %v117_v12 }
 0x10e   :  { %v101_v4 = vsel %vm100_vm10, %v352_v48, %v97_v2  ;;  %289 = vmatmul.f32.vlgmr.msra.gmra.mxu2 %v148_v63  ;;  %v135_v17 = vmul.f32 %v121_v15, %v435_v33  ;;  %v201_v33 = vld [vmem:[%s648_s4] sm:$0x7] }
 0x10f   :  { %v133_v5 = vmul.f32 %v101_v4, %v437_v34  ;;  %v125_v13 = vmul.f32 0.5, %v124_v8  ;;  %v203_v27 = vperm.slane %v201_v33, 0  ;;  %v204_v28 = vperm.slane %v201_v33, 1 }
 0x110   :  { %v143_v23 = vmul.f32 %v341_v53, %v135_v17 }
 0x111   :  { %v141_v9 = vmul.f32 %v341_v53, %v133_v5  ;;  %v126_v34 = vsub.f32 1.5, %v125_v13 }
 0x112   :  { %v151_v21 = vadd.f32 %v342_v56, %v143_v23 }
 0x113   :  { %v149_v10 = vadd.f32 %v342_v56, %v141_v9  ;;  %v127_v19 = vmul.f32 %v354_v61, %v126_v34 }
 0x115   :  { %228 = vmatmul.f32.vlgmr.msra.gmra.mxu3 %v149_v10  ;;  %260 = vmatmul.f32.gmra.mxu1 %v149_v10  ;;  %v131_v20 = vsel %vm130_vm0, %v354_v61, %v127_v19 }
 0x116   :  { %292 = vmatmul.f32.gmra.mxu2 %v149_v10  ;;  %v136_v22 = vmul.f32 %v131_v20, %v439_v35  ;;  %v205_v35 = vperm.slane %v201_v33, 2 }
 0x118   :  { %v144_v25 = vmul.f32 %v341_v53, %v136_v22 }
 0x11a   :  { %v152_v26 = vadd.f32 %v342_v56, %v144_v25 }
 0x11d   :  { %231 = vmatmul.f32.gmra.mxu3 %v150_v16  ;;  %263 = vmatmul.f32.gmra.mxu1 %v150_v16 }
 0x11e   :  { %295 = vmatmul.f32.gmra.mxu2 %v150_v16 }
 0x125   :  { %234 = vmatmul.f32.gmra.mxu3 %v151_v21  ;;  %266 = vmatmul.f32.gmra.mxu1 %v151_v21 }
 0x126   :  { %298 = vmatmul.f32.gmra.mxu2 %v151_v21 }
 0x12d   :  { %237 = vmatmul.f32.gmra.mxu3 %v152_v26  ;;  %269 = vmatmul.f32.gmra.mxu1 %v152_v26 }
 0x12e   :  { %301 = vmatmul.f32.gmra.mxu2 %v152_v26 }
 0x18a   :  { %v226_v29 = vpop.f32.mrf.mxu0  ;;  %v258_v30 = vpop.f32.mrf.mxu1 }
 0x18b   :  { %v227_v31 = vadd.f32 %v226_v29, %v203_v27  ;;  %v259_v32 = vadd.f32 %v258_v30, %v204_v28 }
 0x18d   :  { %305 = vst [vmem:[%s649_s5] sm:$0xff] %v227_v31 }
 0x18e   :  { %306 = vst [vmem:[%s649_s5 + $0x8] sm:$0xff] %v259_v32 }
 0x191   :  { %v290_v36 = vpop.f32.mrf.mxu2 }
 0x192   :  { %v291_v37 = vadd.f32 %v290_v36, %v205_v35  ;;  %v261_v38 = vpop.f32.mrf.mxu1 }
 0x193   :  { %v262_v39 = vadd.f32 %v261_v38, %v204_v28 }
 0x194   :  { %307 = vst [vmem:[%s649_s5 + $0x10] sm:$0xff] %v291_v37 }
 0x195   :  { %309 = vst [vmem:[%s649_s5 + $0x20] sm:$0xff] %v262_v39 }
 0x198   :  { %v229_v40 = vpop.f32.mrf.mxu3 }
 0x199   :  { %v230_v41 = vadd.f32 %v229_v40, %v203_v27  ;;  %v293_v42 = vpop.f32.mrf.mxu2 }
 0x19a   :  { %v294_v43 = vadd.f32 %v293_v42, %v205_v35  ;;  %v264_v44 = vpop.f32.mrf.mxu1 }
 0x19b   :  { %308 = vst [vmem:[%s649_s5 + $0x18] sm:$0xff] %v230_v41  ;;  %v265_v45 = vadd.f32 %v264_v44, %v204_v28 }
 0x19c   :  { %310 = vst [vmem:[%s649_s5 + $0x28] sm:$0xff] %v294_v43 }
 0x19d   :  { %312 = vst [vmem:[%s649_s5 + $0x38] sm:$0xff] %v265_v45 }
 0x1a0   :  { %v232_v46 = vpop.f32.mrf.mxu3 }
 0x1a1   :  { %v233_v47 = vadd.f32 %v232_v46, %v203_v27  ;;  %v296_v48 = vpop.f32.mrf.mxu2 }
 0x1a2   :  { %v297_v49 = vadd.f32 %v296_v48, %v205_v35  ;;  %v267_v50 = vpop.f32.mrf.mxu1 }
 0x1a3   :  { %311 = vst [vmem:[%s649_s5 + $0x30] sm:$0xff] %v233_v47  ;;  %v268_v51 = vadd.f32 %v267_v50, %v204_v28 }
 0x1a4   :  { %313 = vst [vmem:[%s649_s5 + $0x40] sm:$0xff] %v297_v49 }
 0x1a5   :  { %315 = vst [vmem:[%s649_s5 + $0x50] sm:$0xff] %v268_v51 }
 0x1a8   :  { %v235_v52 = vpop.f32.mrf.mxu3 }
 0x1a9   :  { %v236_v53 = vadd.f32 %v235_v52, %v203_v27  ;;  %v299_v54 = vpop.f32.mrf.mxu2 }
 0x1aa   :  { %v300_v55 = vadd.f32 %v299_v54, %v205_v35  ;;  %v270_v18 = vpop.f32.mrf.mxu1 }
 0x1ab   :  { %314 = vst [vmem:[%s649_s5 + $0x48] sm:$0xff] %v236_v53  ;;  %v271_v56 = vadd.f32 %v270_v18, %v204_v28 }
 0x1ac   :  { %316 = vst [vmem:[%s649_s5 + $0x58] sm:$0xff] %v300_v55 }
 0x1ad   :  { %318 = vst [vmem:[%s649_s5 + $0x68] sm:$0x3] %v271_v56 }
 0x1b0   :  { %v238_v57 = vpop.f32.mrf.mxu3 }
 0x1b1   :  { %v239_v58 = vadd.f32 %v238_v57, %v203_v27  ;;  %v302_v59 = vpop.f32.mrf.mxu2 }
 0x1b2   :  { %v303_v60 = vadd.f32 %v302_v59, %v205_v35 }
 0x1b3   :  { %317 = vst [vmem:[%s649_s5 + $0x60] sm:$0x3] %v239_v58 }
 0x1b4   :  { %319 = vst [vmem:[%s649_s5 + $0x70] sm:$0x3] %v303_v60 }

// kernel: vit_forward.11
= control target key start
LH: loop header
LB: loop body
LE: loop exit
PB: predicated region body
PF: predicated region fallthrough
CT: control target
= control target key end

     0   :  { %vm41_vm0 = vcmask 1041408   ;;  %v837_v6 = vmov 128.0   ;;  %s1654_s0 = inlined_call_operand.vmem [shape: f32[34,128], index: 0, kind: input, shape index: {}, may-alias: {0,7}]   ;;  %s1655_s3 = inlined_call_operand.vmem [shape: f32[128,256], index: 3, kind: input, shape index: {}]   ;;  %s1656_s1 = inlined_call_operand.vmem [shape: f32[1,128], index: 1, kind: input, shape index: {}]   ;;  %s1657_s2 = inlined_call_operand.vmem [shape: f32[1,128], index: 2, kind: input, shape index: {}]   ;;  %s1658_s4 = inlined_call_operand.vmem [shape: f32[1,256], index: 4, kind: input, shape index: {}]   ;;  %s1659_s5 = inlined_call_operand.vmem [shape: f32[256,128], index: 5, kind: input, shape index: {}]   ;;  %s1660_s6 = inlined_call_operand.vmem [shape: f32[1,128], index: 6, kind: input, shape index: {}]   ;;  %s1661_s7 = inlined_call_operand.vmem [shape: f32[34,128], index: 7, kind: output, shape index: {}, may-alias: {0,7}]  }
   0x1   :  { %v28_v0 = vld [vmem:[%s1654_s0 + $0x10] sm:$0xff]  ;;  %v26_v1 = vld [vmem:[%s1654_s0] sm:$0xff]  ;;  %v29_v4 = vld [vmem:[%s1654_s0 + $0x18] sm:$0xff]  ;;  %780 = vrcp.f32 %v837_v6 }
   0x2   :  { %37 = vadd.xlane.f32.xlu1 %v28_v0  ;;  %33 = vadd.xlane.f32.xlu0 %v26_v1  ;;  %v30_v2 = vld [vmem:[%s1654_s0 + $0x20] sm:$0x3]  ;;  %v27_v5 = vld [vmem:[%s1654_s0 + $0x8] sm:$0xff]  ;;  %v189_v11 = vld [vmem:[%s1655_s3 + $0xf0] sm:$0xff] }
   0x3   :  { %v42_v3 = vsel %vm41_vm0, %v30_v2, 0.0  ;;  %v190_v12 = vld [vmem:[%s1655_s3 + $0xf8] sm:$0xff]  ;;  %v187_v13 = vld [vmem:[%s1655_s3 + $0xe0] sm:$0xff]  ;;  %197 = vmatpush.msra.mxu0 %v189_v11  ;;  %v188_v14 = vld [vmem:[%s1655_s3 + $0xe8] sm:$0xff] }
   0x4   :  { %43 = vadd.xlane.f32.xlu2 %v42_v3  ;;  %229 = vmatpush.msra.mxu1 %v190_v12  ;;  %v185_v38 = vld [vmem:[%s1655_s3 + $0xd0] sm:$0xff]  ;;  %v186_v39 = vld [vmem:[%s1655_s3 + $0xd8] sm:$0xff]  ;;  %v183_v40 = vld [vmem:[%s1655_s3 + $0xc0] sm:$0xff] }
   0x5   :  { %198 = vmatpush.msra.mxu0 %v187_v13  ;;  %v184_v41 = vld [vmem:[%s1655_s3 + $0xc8] sm:$0xff]  ;;  %v181_v42 = vld [vmem:[%s1655_s3 + $0xb0] sm:$0xff]  ;;  %v182_v43 = vld [vmem:[%s1655_s3 + $0xb8] sm:$0xff] }
   0x6   :  { %230 = vmatpush.msra.mxu1 %v188_v14  ;;  %v179_v44 = vld [vmem:[%s1655_s3 + $0xa0] sm:$0xff]  ;;  %v180_v45 = vld [vmem:[%s1655_s3 + $0xa8] sm:$0xff]  ;;  %v177_v46 = vld [vmem:[%s1655_s3 + $0x90] sm:$0xff] }
   0x7   :  { %v781_v7 = vpop.eup %780  ;;  %199 = vmatpush.msra.mxu0 %v185_v38  ;;  %v178_v47 = vld [vmem:[%s1655_s3 + $0x98] sm:$0xff]  ;;  %v175_v48 = vld [vmem:[%s1655_s3 + $0x80] sm:$0xff]  ;;  %v176_v49 = vld [vmem:[%s1655_s3 + $0x88] sm:$0xff] }
   0x8   :  { %v46_v8 = vmul.f32 128.0, %v781_v7  ;;  %vm50_vm1 = vweird.f32 %v781_v7  ;;  %231 = vmatpush.msra.mxu1 %v186_v39  ;;  %v173_v50 = vld [vmem:[%s1655_s3 + $0x70] sm:$0xff]  ;;  %v174_v51 = vld [vmem:[%s1655_s3 + $0x78] sm:$0xff]  ;;  %v171_v52 = vld [vmem:[%s1655_s3 + $0x60] sm:$0xff] }
   0x9   :  { %200 = vmatpush.msra.mxu0 %v183_v40  ;;  %v172_v53 = vld [vmem:[%s1655_s3 + $0x68] sm:$0xff]  ;;  %v169_v54 = vld [vmem:[%s1655_s3 + $0x50] sm:$0xff]  ;;  %v170_v55 = vld [vmem:[%s1655_s3 + $0x58] sm:$0xff] }
   0xa   :  { %39 = vadd.xlane.f32.xlu1 %v29_v4  ;;  %35 = vadd.xlane.f32.xlu0 %v27_v5  ;;  %v47_v9 = vsub.f32 1.0, %v46_v8  ;;  %v167_v56 = vld [vmem:[%s1655_s3 + $0x40] sm:$0xff]  ;;  %v168_v57 = vld [vmem:[%s1655_s3 + $0x48] sm:$0xff]  ;;  %v165_v58 = vld [vmem:[%s1655_s3 + $0x30] sm:$0xff] }
   0xb   :  { %232 = vmatpush.msra.mxu1 %v184_v41  ;;  %201 = vmatpush.msra.mxu0 %v181_v42  ;;  %v166_v59 = vld [vmem:[%s1655_s3 + $0x38] sm:$0xff]  ;;  %v163_v60 = vld [vmem:[%s1655_s3 + $0x20] sm:$0xff]  ;;  %v164_v61 = vld [vmem:[%s1655_s3 + $0x28] sm:$0xff] }
   0xc   :  { %v48_v10 = vmul.f32 %v781_v7, %v47_v9  ;;  %v161_v62 = vld [vmem:[%s1655_s3 + $0x10] sm:$0xff]  ;;  %v162_v63 = vld [vmem:[%s1655_s3 + $0x18] sm:$0xff]  ;;  %v778_v40 = vld [vmem:[%s1657_s2] ss:$0 sm:$0xff] }
   0xd   :  { %233 = vmatpush.msra.mxu1 %v182_v43  ;;  %202 = vmatpush.msra.mxu0 %v179_v44 }
   0xe   :  { %v49_v15 = vadd.f32 %v781_v7, %v48_v10 }
   0xf   :  { %234 = vmatpush.msra.mxu1 %v180_v45  ;;  %203 = vmatpush.msra.mxu0 %v177_v46 }
  0x10   :  { %v907_v16 = vsel %vm50_vm1, %v781_v7, %v49_v15 }
  0x11   :  { %235 = vmatpush.msra.mxu1 %v178_v47  ;;  %204 = vmatpush.msra.mxu0 %v175_v48 }
  0x13   :  { %236 = vmatpush.msra.mxu1 %v176_v49  ;;  %205 = vmatpush.msra.mxu0 %v173_v50  ;;  %v684_v49 = vld [vmem:[%s1659_s5 + $0xb8] sm:$0xff] }
  0x15   :  { %237 = vmatpush.msra.mxu1 %v174_v51  ;;  %206 = vmatpush.msra.mxu0 %v171_v52 }
  0x17   :  { %238 = vmatpush.msra.mxu1 %v172_v53  ;;  %207 = vmatpush.msra.mxu0 %v169_v54 }
  0x19   :  { %239 = vmatpush.msra.mxu1 %v170_v55  ;;  %208 = vmatpush.msra.mxu0 %v167_v56 }
  0x1b   :  { %240 = vmatpush.msra.mxu1 %v168_v57  ;;  %209 = vmatpush.msra.mxu0 %v165_v58 }
  0x1d   :  { %241 = vmatpush.msra.mxu1 %v166_v59  ;;  %210 = vmatpush.msra.mxu0 %v163_v60 }
  0x1f   :  { %242 = vmatpush.msra.mxu1 %v164_v61  ;;  %211 = vmatpush.msra.mxu0 %v161_v62 }
  0x21   :  { %243 = vmatpush.msra.mxu1 %v162_v63 }
  0x75   :  { %v38_v17 = vpop.xlane.xlu1 %37  ;;  %v34_v18 = vpop.xlane.xlu0 %33 }
  0x76   :  { %v54_v19 = vmul.f32 %v907_v16, %v38_v17  ;;  %v52_v20 = vmul.f32 %v907_v16, %v34_v18 }
  0x77   :  { %v44_v25 = vpop.xlane.xlu2 %43 }
  0x78   :  { %v911_v21 = vsub.f32 %v28_v0, %v54_v19  ;;  %v913_v22 = vsub.f32 %v26_v1, %v52_v20  ;;  %v56_v28 = vmul.f32 %v907_v16, %v44_v25  ;;  %v159_v0 = vld [vmem:[%s1655_s3] sm:$0xff]  ;;  %v160_v1 = vld [vmem:[%s1655_s3 + $0x8] sm:$0xff] }
  0x79   :  { %212 = vmatpush.msra.mxu0 %v159_v0  ;;  %244 = vmatpush.msra.mxu1 %v160_v1 }
  0x7a   :  { %v64_v23 = vmul.f32 %v911_v21, %v911_v21  ;;  %v62_v24 = vmul.f32 %v913_v22, %v913_v22  ;;  %v926_v33 = vsub.f32 %v30_v2, %v56_v28 }
  0x7c   :  { %71 = vadd.xlane.f32.xlu1 %v64_v23  ;;  %67 = vadd.xlane.f32.xlu2 %v62_v24  ;;  %v66_v36 = vmul.f32 %v926_v33, %v926_v33 }
  0x7d   :  { %v40_v26 = vpop.xlane.xlu1 %39  ;;  %v36_v27 = vpop.xlane.xlu0 %35 }
  0x7e   :  { %v55_v29 = vmul.f32 %v907_v16, %v40_v26  ;;  %v53_v30 = vmul.f32 %v907_v16, %v36_v27  ;;  %v75_v37 = vsel %vm41_vm0, %v66_v36, 0.0 }
  0x80   :  { %v922_v31 = vsub.f32 %v29_v4, %v55_v29  ;;  %v924_v32 = vsub.f32 %v27_v5, %v53_v30 }
  0x82   :  { %v65_v34 = vmul.f32 %v922_v31, %v922_v31  ;;  %v63_v35 = vmul.f32 %v924_v32, %v924_v32 }
  0x84   :  { %73 = vadd.xlane.f32.xlu2 %v65_v34  ;;  %69 = vadd.xlane.f32.xlu0 %v63_v35 }
  0x8c   :  { %76 = vadd.xlane.f32.xlu0 %v75_v37  ;;  %v777_v37 = vld [vmem:[%s1656_s1] ss:$0 sm:$0xff] }
  0xef   :  { %v72_v2 = vpop.xlane.xlu1 %71  ;;  %v68_v3 = vpop.xlane.xlu2 %67 }
  0xf0   :  { %v80_v4 = vmul.f32 %v72_v2, %v907_v16  ;;  %v78_v5 = vmul.f32 %v68_v3, %v907_v16 }
  0xf2   :  { %v85_v6 = vadd.f32 1e-12, %v80_v4  ;;  %v83_v7 = vadd.f32 1e-12, %v78_v5 }
  0xf4   :  { %782 = vrsqrt.f32 %v85_v6  ;;  %vm94_vm3 = vweird.f32 %v83_v7  ;;  %vm114_vm5 = vweird.f32 %v85_v6 }
  0xf5   :  { %784 = vrsqrt.f32 %v83_v7 }
  0xf7   :  { %v74_v8 = vpop.xlane.xlu2 %73  ;;  %v70_v9 = vpop.xlane.xlu0 %69 }
  0xf8   :  { %v81_v10 = vmul.f32 %v74_v8, %v907_v16  ;;  %v79_v11 = vmul.f32 %v70_v9, %v907_v16  ;;  %v191_v8 = vld [vmem:[%s1658_s4] sm:$0x3]  ;;  %v692_v9 = vld [vmem:[%s1659_s5 + $0xf8] sm:$0xff] }
  0xf9   :  { %729 = vmatpush.msra.mxu3 %v692_v9  ;;  %v664_v9 = vld [vmem:[%s1659_s5 + $0x18] sm:$0xff] }
  0xfa   :  { %v783_v12 = vpop.eup %782  ;;  %v86_v13 = vadd.f32 1e-12, %v81_v10  ;;  %v84_v14 = vadd.f32 1e-12, %v79_v11  ;;  %v1050_v10 = vperm.slane %v191_v8, 0  ;;  %v675_v11 = vld [vmem:[%s1659_s5 + $0x70] sm:$0xff] }
  0xfb   :  { %v785_v15 = vpop.eup %784  ;;  %v109_v17 = vmul.f32 %v783_v12, %v85_v6  ;;  %vm115_vm6 = vweird.f32 %v783_v12 }
  0xfc   :  { %v89_v18 = vmul.f32 %v785_v15, %v83_v7  ;;  %786 = vrsqrt.f32 %v86_v13  ;;  %vm95_vm2 = vweird.f32 %v785_v15  ;;  %vm104_vm8 = vweird.f32 %v84_v14  ;;  %vm1031_vm9 = vmor %vm114_vm5, %vm115_vm6 }
  0xfd   :  { %788 = vrsqrt.f32 %v84_v14  ;;  %v110_v20 = vmul.f32 %v783_v12, %v109_v17  ;;  %vm96_vm4 = vmor %vm94_vm3, %vm95_vm2  ;;  %vm124_vm11 = vweird.f32 %v86_v13  ;;  %v690_v17 = vld [vmem:[%s1659_s5 + $0xe8] sm:$0xff] }
  0xfe   :  { %v90_v19 = vmul.f32 %v785_v15, %v89_v18 }
  0xff   :  { %v77_v23 = vpop.xlane.xlu0 %76  ;;  %v111_v30 = vmul.f32 0.5, %v110_v20  ;;  %v673_v20 = vld [vmem:[%s1659_s5 + $0x60] sm:$0xff] }
 0x100   :  { %v91_v24 = vmul.f32 0.5, %v90_v19  ;;  %v82_v25 = vmul.f32 %v77_v23, %v907_v16  ;;  %v689_v23 = vld [vmem:[%s1659_s5 + $0xe0] sm:$0xff] }
 0x101   :  { %v112_v41 = vsub.f32 1.5, %v111_v30  ;;  %v671_v30 = vld [vmem:[%s1659_s5 + $0x50] sm:$0xff] }
 0x102   :  { %v787_v26 = vpop.eup %786  ;;  %v92_v27 = vsub.f32 1.5, %v91_v24  ;;  %v87_v28 = vadd.f32 1e-12, %v82_v25 }
 0x103   :  { %v789_v29 = vpop.eup %788  ;;  %v119_v35 = vmul.f32 %v787_v26, %v86_v13  ;;  %v113_v48 = vmul.f32 %v783_v12, %v112_v41  ;;  %vm125_vm12 = vweird.f32 %v787_v26 }
 0x104   :  { %v93_v34 = vmul.f32 %v785_v15, %v92_v27  ;;  %v99_v36 = vmul.f32 %v789_v29, %v84_v14  ;;  %790 = vrsqrt.f32 %v87_v28  ;;  %vm105_vm7 = vweird.f32 %v789_v29  ;;  %vm126_vm13 = vmor %vm124_vm11, %vm125_vm12  ;;  %v688_v27 = vld [vmem:[%s1659_s5 + $0xd8] sm:$0xff] }
 0x105   :  { %v120_v42 = vmul.f32 %v787_v26, %v119_v35  ;;  %vm106_vm10 = vmor %vm104_vm8, %vm105_vm7  ;;  %v117_v56 = vsel %vm1031_vm9, %v783_v12, %v113_v48  ;;  %vm134_vm14 = vweird.f32 %v87_v28  ;;  %v691_v12 = vld [vmem:[%s1659_s5 + $0xf0] sm:$0xff]  ;;  %v668_v48 = vld [vmem:[%s1659_s5 + $0x38] sm:$0xff] }
 0x106   :  { %v100_v38 = vmul.f32 %v789_v29, %v99_v36  ;;  %v97_v39 = vsel %vm96_vm4, %v785_v15, %v93_v34  ;;  %v140_v59 = vmul.f32 %v117_v56, %v911_v21  ;;  %730 = vmatpush.msra.mxu3 %v691_v12  ;;  %v674_v15 = vld [vmem:[%s1659_s5 + $0x68] sm:$0xff]  ;;  %v687_v34 = vld [vmem:[%s1659_s5 + $0xd0] sm:$0xff] }
 0x107   :  { %v138_v16 = vmul.f32 %v97_v39, %v913_v22  ;;  %v121_v22 = vmul.f32 0.5, %v120_v42  ;;  %v670_v39 = vld [vmem:[%s1659_s5 + $0x48] sm:$0xff] }
 0x108   :  { %v101_v43 = vmul.f32 0.5, %v100_v38  ;;  %v148_v62 = vmul.f32 %v777_v37, %v140_v59  ;;  %731 = vmatpush.msra.mxu3 %v690_v17  ;;  %v666_v59 = vld [vmem:[%s1659_s5 + $0x28] sm:$0xff] }
 0x109   :  { %v146_v44 = vmul.f32 %v777_v37, %v138_v16  ;;  %v122_v54 = vsub.f32 1.5, %v121_v22  ;;  %v686_v16 = vld [vmem:[%s1659_s5 + $0xc8] sm:$0xff] }
 0x10a   :  { %v791_v45 = vpop.eup %790  ;;  %v102_v46 = vsub.f32 1.5, %v101_v43  ;;  %732 = vmatpush.msra.mxu3 %v689_v23  ;;  %v663_v23 = vld [vmem:[%s1659_s5 + $0x10] sm:$0xff] }
 0x10b   :  { %v154_v47 = vadd.f32 %v778_v40, %v146_v44  ;;  %v129_v51 = vmul.f32 %v791_v45, %v87_v28  ;;  %v123_v60 = vmul.f32 %v787_v26, %v122_v54  ;;  %vm135_vm15 = vweird.f32 %v791_v45  ;;  %v683_v54 = vld [vmem:[%s1659_s5 + $0xb0] sm:$0xff] }
 0x10c   :  { %v103_v50 = vmul.f32 %v789_v29, %v102_v46  ;;  %vm136_vm0 = vmor %vm134_vm14, %vm135_vm15  ;;  %733 = vmatpush.msra.mxu3 %v688_v27  ;;  %v685_v46 = vld [vmem:[%s1659_s5 + $0xc0] sm:$0xff]  ;;  %v662_v27 = vld [vmem:[%s1659_s5 + $0x8] sm:$0xff] }
 0x10d   :  { %213 = vmatmul.f32.vlgmr.msra.gmra.mxu0 %v154_v47  ;;  %245 = vmatmul.f32.vlgmr.msra.gmra.mxu1 %v154_v47  ;;  %v130_v55 = vmul.f32 %v791_v45, %v129_v51  ;;  %v127_v0 = vsel %vm126_vm13, %v787_v26, %v123_v60  ;;  %v672_v26 = vld [vmem:[%s1659_s5 + $0x58] sm:$0xff]  ;;  %v682_v60 = vld [vmem:[%s1659_s5 + $0xa8] sm:$0xff] }
 0x10e   :  { %v107_v52 = vsel %vm106_vm10, %v789_v29, %v103_v50  ;;  %v141_v1 = vmul.f32 %v127_v0, %v922_v31  ;;  %v676_v31 = vld [vmem:[%s1659_s5 + $0x78] sm:$0xff]  ;;  %734 = vmatpush.msra.mxu3 %v687_v34 }
 0x10f   :  { %v139_v53 = vmul.f32 %v107_v52, %v924_v32  ;;  %v131_v61 = vmul.f32 0.5, %v130_v55  ;;  %v156_v32 = vadd.f32 %v778_v40, %v148_v62  ;;  %697 = vmatpush.msra.mxu2 %v676_v31 }
 0x110   :  { %v149_v3 = vmul.f32 %v777_v37, %v141_v1  ;;  %735 = vmatpush.msra.mxu3 %v686_v16 }
 0x111   :  { %v147_v57 = vmul.f32 %v777_v37, %v139_v53  ;;  %v132_v63 = vsub.f32 1.5, %v131_v61  ;;  %698 = vmatpush.msra.mxu2 %v675_v11  ;;  %v667_v53 = vld [vmem:[%s1659_s5 + $0x30] sm:$0xff]  ;;  %v1662_v11 = vmov 1.0  }
 0x112   :  { %v157_v21 = vadd.f32 %v778_v40, %v149_v3  ;;  %736 = vmatpush.msra.mxu3 %v685_v46  ;;  %v681_v3 = vld [vmem:[%s1659_s5 + $0xa0] sm:$0xff] }
 0x113   :  { %v155_v58 = vadd.f32 %v778_v40, %v147_v57  ;;  %v133_v2 = vmul.f32 %v791_v45, %v132_v63  ;;  %699 = vmatpush.msra.mxu2 %v674_v15  ;;  %v680_v15 = vld [vmem:[%s1659_s5 + $0x98] sm:$0xff] }
 0x114   :  { %737 = vmatpush.msra.mxu3 %v684_v49 }
 0x115   :  { %216 = vmatmul.f32.gmra.mxu0 %v155_v58  ;;  %248 = vmatmul.f32.gmra.mxu1 %v155_v58  ;;  %v137_v4 = vsel %vm136_vm0, %v791_v45, %v133_v2  ;;  %v669_v45 = vld [vmem:[%s1659_s5 + $0x40] sm:$0xff] }
 0x116   :  { %v142_v5 = vmul.f32 %v137_v4, %v926_v33  ;;  %v1052_v33 = vperm.slane %v191_v8, 1  ;;  %700 = vmatpush.msra.mxu2 %v673_v20  ;;  %738 = vmatpush.msra.mxu3 %v683_v54  ;;  %v665_v2 = vld [vmem:[%s1659_s5 + $0x20] sm:$0xff] }
 0x118   :  { %v150_v6 = vmul.f32 %v777_v37, %v142_v5  ;;  %701 = vmatpush.msra.mxu2 %v672_v26  ;;  %739 = vmatpush.msra.mxu3 %v682_v60  ;;  %v679_v26 = vld [vmem:[%s1659_s5 + $0x90] sm:$0xff] }
 0x11a   :  { %v158_v7 = vadd.f32 %v778_v40, %v150_v6  ;;  %702 = vmatpush.msra.mxu2 %v671_v30  ;;  %740 = vmatpush.msra.mxu3 %v681_v3 }
 0x11c   :  { %703 = vmatpush.msra.mxu2 %v670_v39  ;;  %741 = vmatpush.msra.mxu3 %v680_v15 }
 0x11d   :  { %219 = vmatmul.f32.gmra.mxu0 %v156_v32  ;;  %251 = vmatmul.f32.gmra.mxu1 %v156_v32 }
 0x11e   :  { %704 = vmatpush.msra.mxu2 %v669_v45  ;;  %742 = vmatpush.msra.mxu3 %v679_v26 }
 0x120   :  { %705 = vmatpush.msra.mxu2 %v668_v48 }
 0x122   :  { %706 = vmatpush.msra.mxu2 %v667_v53 }
 0x124   :  { %707 = vmatpush.msra.mxu2 %v666_v59 }
 0x125   :  { %222 = vmatmul.f32.gmra.mxu0 %v157_v21  ;;  %254 = vmatmul.f32.gmra.mxu1 %v157_v21 }
 0x126   :  { %708 = vmatpush.msra.mxu2 %v665_v2 }
 0x128   :  { %709 = vmatpush.msra.mxu2 %v664_v9 }
 0x12a   :  { %710 = vmatpush.msra.mxu2 %v663_v23 }
 0x12c   :  { %711 = vmatpush.msra.mxu2 %v662_v27 }
 0x12d   :  { %225 = vmatmul.f32.gmra.mxu0 %v158_v7  ;;  %257 = vmatmul.f32.gmra.mxu1 %v158_v7 }
 0x18a   :  { %v214_v13 = vpop.f32.mrf.mxu0  ;;  %v246_v14 = vpop.f32.mrf.mxu1 }
 0x18b   :  { %v1067_v18 = vadd.f32 %v214_v13, %v1050_v10  ;;  %v1070_v19 = vadd.f32 %v246_v14, %v1052_v33 }
 0x18d   :  { %v1079_v24 = vmul.f32 0.70710677, %v1067_v18  ;;  %v1082_v25 = vmul.f32 0.70710677, %v1070_v19  ;;  %v1169_v4 = vmul.f32 0.5, %v1067_v18  ;;  %v1172_v21 = vmul.f32 0.5, %v1070_v19 }
 0x18f   :  { %v301_v28 = vand.u32 2147483647, %v1079_v24  ;;  %v302_v29 = vand.u32 2147483647, %v1082_v25  ;;  %vm281_vm1 = vcmp.lt.f32.partialorder %v1079_v24, 0.0  ;;  %vm282_vm2 = vcmp.lt.f32.partialorder %v1082_v25, 0.0 }
 0x190   :  { %v1188_v12 = vsel %vm281_vm1, -1.0, %v1662_v11  ;;  %v1198_v17 = vsel %vm282_vm2, -1.0, %v1662_v11 }
 0x191   :  { %v311_v35 = vmul.f32 0.3275911, %v301_v28  ;;  %v312_v36 = vmul.f32 0.3275911, %v302_v29  ;;  %v571_v41 = vsub.f32 0.0, %v301_v28  ;;  %v572_v22 = vsub.f32 0.0, %v302_v29 }
 0x192   :  { %v217_v37 = vpop.f32.mrf.mxu0  ;;  %v249_v38 = vpop.f32.mrf.mxu1 }
 0x193   :  { %v1104_v40 = vadd.f32 1.0, %v311_v35  ;;  %v1106_v42 = vadd.f32 1.0, %v312_v36  ;;  %v218_v43 = vadd.f32 %v217_v37, %v1050_v10  ;;  %v1110_v44 = vadd.f32 %v249_v38, %v1052_v33 }
 0x194   :  { %v581_v51 = vmul.f32 %v571_v41, %v301_v28  ;;  %v582_v62 = vmul.f32 %v572_v22, %v302_v29  ;;  %v678_v28 = vld [vmem:[%s1659_s5 + $0x88] sm:$0xff]  ;;  %v661_v41 = vld [vmem:[%s1659_s5] sm:$0xff] }
 0x195   :  { %792 = vrcp.f32 %v1104_v40  ;;  %v1119_v47 = vmul.f32 0.70710677, %v218_v43  ;;  %v1128_v50 = vmul.f32 0.70710677, %v1110_v44  ;;  %vm336_vm3 = vweird.f32 %v1104_v40  ;;  %743 = vmatpush.msra.mxu3 %v678_v28  ;;  %712 = vmatpush.msra.mxu2 %v661_v41 }
 0x196   :  { %794 = vrcp.f32 %v1106_v42  ;;  %v591_v32 = vmul.f32 1.442695, %v581_v51  ;;  %v593_v13 = vmul.f32 1.442695, %v582_v62  ;;  %v1200_v18 = vmul.f32 0.5, %v218_v43  ;;  %v677_v43 = vld [vmem:[%s1659_s5 + $0x80] sm:$0xff] }
 0x197   :  { %v1132_v52 = vand.u32 2147483647, %v1119_v47  ;;  %v1141_v55 = vand.u32 2147483647, %v1128_v50  ;;  %v340_v30 = vand.u32 2147483647, %v1104_v40  ;;  %744 = vmatpush.msra.mxu3 %v677_v43  ;;  %vm351_vm7 = vweird.f32 %v1106_v42 }
 0x198   :  { %796 = vpow2.f32 %v591_v32  ;;  %v342_v45 = vand.u32 2147483648, %v1104_v40  ;;  %vm283_vm9 = vcmp.lt.f32.partialorder %v1119_v47, 0.0  ;;  %vm284_vm11 = vcmp.lt.f32.partialorder %v1128_v50, 0.0 }
 0x199   :  { %v313_v56 = vmul.f32 0.3275911, %v1132_v52  ;;  %v314_v5 = vmul.f32 0.3275911, %v1141_v55  ;;  %v573_v14 = vsub.f32 0.0, %v1132_v52  ;;  %v574_v25 = vsub.f32 0.0, %v1141_v55 }
 0x19a   :  { %v220_v57 = vpop.f32.mrf.mxu0  ;;  %v252_v58 = vpop.f32.mrf.mxu1  ;;  %vm1260_vm5 = vcmp.eq.f32.partialorder %v340_v30, 8.507059e+37  ;;  %v343_v62 = vor.u32 1.1754944e-38, %v342_v45  ;;  %v1678_v47 = vmov 1.0  }
 0x19b   :  { %v1150_v61 = vpop.eup %792  ;;  %v1154_v63 = vadd.f32 %v220_v57, %v1050_v10  ;;  %v1160_v1 = vadd.f32 %v252_v58, %v1052_v33  ;;  %v1177_v8 = vadd.f32 1.0, %v313_v56  ;;  %v1226_v34 = vadd.f32 1.0, %v314_v5 }
 0x19c   :  { %v332_v0 = vmul.f32 %v1150_v61, %v1104_v40  ;;  %v1175_v6 = vpop.eup %794  ;;  %v583_v39 = vmul.f32 %v573_v14, %v1132_v52  ;;  %vm337_vm4 = vweird.f32 %v1150_v61  ;;  %v584_v51 = vmul.f32 %v574_v25, %v1141_v55 }
 0x19d   :  { %v1180_v31 = vmul.f32 0.70710677, %v1154_v63  ;;  %v1206_v20 = vmul.f32 0.70710677, %v1160_v1  ;;  %v347_v24 = vmul.f32 %v1175_v6, %v1106_v42  ;;  %798 = vrcp.f32 %v1177_v8  ;;  %vm1270_vm6 = vmor %vm336_vm3, %vm337_vm4 }
 0x19e   :  { %v333_v7 = vsub.f32 1.0, %v332_v0  ;;  %800 = vpow2.f32 %v593_v13  ;;  %v1252_v54 = vpop.eup %796  ;;  %v1255_v56 = vmul.f32 0.5, %v1110_v44  ;;  %v595_v32 = vmul.f32 1.442695, %v583_v39 }
 0x19f   :  { %v1203_v19 = vand.u32 2147483647, %v1180_v31  ;;  %v306_v36 = vand.u32 2147483647, %v1206_v20  ;;  %v348_v22 = vsub.f32 1.0, %v347_v24  ;;  %802 = vrcp.f32 %v1226_v34 }
 0x1a0   :  { %v334_v29 = vmul.f32 %v1150_v61, %v333_v7  ;;  %v357_v5 = vand.u32 2147483648, %v1106_v42  ;;  %v597_v7 = vmul.f32 1.442695, %v584_v51  ;;  %v1309_v39 = vmul.f32 0.5, %v1154_v63 }
 0x1a1   :  { %v315_v35 = vmul.f32 0.3275911, %v1203_v19  ;;  %v316_v46 = vmul.f32 0.3275911, %v306_v36  ;;  %v575_v55 = vsub.f32 0.0, %v1203_v19  ;;  %v576_v59 = vsub.f32 0.0, %v306_v36 }
 0x1a2   :  { %v223_v37 = vpop.f32.mrf.mxu0  ;;  %v255_v38 = vpop.f32.mrf.mxu1  ;;  %v335_v49 = vadd.f32 %v1150_v61, %v334_v29  ;;  %v349_v13 = vmul.f32 %v1175_v6, %v348_v22  ;;  %vm352_vm8 = vweird.f32 %v1175_v6  ;;  %vm366_vm14 = vweird.f32 %v1177_v8 }
 0x1a3   :  { %v1232_v16 = vadd.f32 %v223_v37, %v1050_v10  ;;  %v1242_v48 = vadd.f32 %v255_v38, %v1052_v33  ;;  %v1247_v52 = vadd.f32 1.0, %v315_v35  ;;  %v1258_v57 = vadd.f32 1.0, %v316_v46  ;;  %v1275_v0 = vpop.eup %798  ;;  %vm1333_vm10 = vmor %vm351_vm7, %vm352_vm8 }
 0x1a4   :  { %v339_v3 = vsel %vm1270_vm6, %v1150_v61, %v335_v49  ;;  %v1284_v40 = vpop.eup %800  ;;  %v362_v25 = vmul.f32 %v1275_v0, %v1177_v8  ;;  %v585_v26 = vmul.f32 %v575_v55, %v1203_v19  ;;  %v586_v27 = vmul.f32 %v576_v59, %v306_v36 }
 0x1a5   :  { %v1250_v53 = vmul.f32 0.70710677, %v1232_v16  ;;  %v1278_v2 = vmul.f32 0.70710677, %v1242_v48  ;;  %804 = vrcp.f32 %v1247_v52  ;;  %v1292_v61 = vsel %vm1260_vm5, %v343_v62, %v339_v3  ;;  %v1300_v29 = vpop.eup %802 }
 0x1a6   :  { %806 = vrcp.f32 %v1258_v57  ;;  %v481_v38 = vmul.f32 1.0614054, %v1292_v61  ;;  %v350_v19 = vadd.f32 %v1175_v6, %v349_v13  ;;  %v377_v43 = vmul.f32 %v1300_v29, %v1226_v34 }
 0x1a7   :  { %v307_v60 = vand.u32 2147483647, %v1250_v53  ;;  %v308_v15 = vand.u32 2147483647, %v1278_v2  ;;  %808 = vpow2.f32 %v595_v32  ;;  %v363_v22 = vsub.f32 1.0, %v362_v25 }
 0x1a8   :  { %810 = vpow2.f32 %v597_v7  ;;  %v491_v46 = vadd.f32 -1.4531521, %v481_v38  ;;  %v599_v51 = vmul.f32 1.442695, %v585_v26  ;;  %v601_v58 = vmul.f32 1.442695, %v586_v27 }
 0x1a9   :  { %v317_v9 = vmul.f32 0.3275911, %v307_v60  ;;  %v577_v14 = vsub.f32 0.0, %v307_v60  ;;  %v318_v35 = vmul.f32 0.3275911, %v308_v15  ;;  %v578_v63 = vsub.f32 0.0, %v308_v15 }
 0x1aa   :  { %v226_v23 = vpop.f32.mrf.mxu0  ;;  %v258_v24 = vpop.f32.mrf.mxu1  ;;  %v501_v44 = vmul.f32 %v491_v46, %v1292_v61  ;;  %v354_v62 = vsel %vm1333_vm10, %v1175_v6, %v350_v19  ;;  %v355_v7 = vand.u32 2147483647, %v1106_v42  ;;  %v1365_v25 = vmul.f32 0.5, %v1160_v1 }
 0x1ab   :  { %v1298_v28 = vadd.f32 %v226_v23, %v1050_v10  ;;  %v1302_v30 = vadd.f32 1.0, %v317_v9  ;;  %v1305_v37 = vadd.f32 %v258_v24, %v1052_v33  ;;  %v587_v10 = vmul.f32 %v577_v14, %v307_v60  ;;  %v1319_v33 = vpop.eup %804 }
 0x1ac   :  { %v1314_v36 = vadd.f32 1.0, %v318_v35  ;;  %v1326_v49 = vpop.eup %806  ;;  %v1349_v32 = vmul.f32 %v1319_v33, %v1247_v52  ;;  %v588_v14 = vmul.f32 %v578_v63, %v308_v15  ;;  %v511_v42 = vadd.f32 1.4214138, %v501_v44 }
 0x1ad   :  { %1672 = vst [vmem:[#allocation2_spill] sm:$0xff] %v1305_v37  ;;  %v1317_v41 = vmul.f32 0.70710677, %v1298_v28  ;;  %v1324_v45 = vmul.f32 0.70710677, %v1305_v37  ;;  %812 = vrcp.f32 %v1302_v30  ;;  %v1353_v9 = vpop.eup %808  ;;  %v1357_v13 = vmul.f32 %v1326_v49, %v1258_v57 }
 0x1ae   :  { %v603_v3 = vmul.f32 1.442695, %v587_v10  ;;  %814 = vrcp.f32 %v1314_v36  ;;  %v1361_v24 = vpop.eup %810  ;;  %v358_v26 = vor.u32 1.1754944e-38, %v357_v5  ;;  %v378_v27 = vsub.f32 1.0, %v377_v43 }
 0x1af   :  { %1673 = vst [vmem:[#allocation3_spill] sm:$0xff] %v1324_v45  ;;  %v1338_v59 = vand.u32 2147483647, %v1317_v41  ;;  %v1341_v60 = vand.u32 2147483647, %v1324_v45  ;;  %816 = vpow2.f32 %v599_v51  ;;  %vm356_vm12 = vcmp.eq.f32.partialorder %v355_v7, 8.507059e+37 }
 0x1b0   :  { %818 = vpow2.f32 %v601_v58  ;;  %v393_v38 = vsub.f32 1.0, %v1349_v32  ;;  %v521_v19 = vmul.f32 %v511_v42, %v1292_v61  ;;  %v1373_v10 = vsel %vm356_vm12, %v358_v26, %v354_v62 }
 0x1b1   :  { %v319_v23 = vmul.f32 0.3275911, %v1338_v59  ;;  %v320_v6 = vmul.f32 0.3275911, %v1341_v60  ;;  %v364_v63 = vmul.f32 %v1275_v0, %v363_v22  ;;  %820 = vpow2.f32 %v603_v3 }
 0x1b2   :  { %v1377_v46 = vmul.f32 1.442695, %v588_v14  ;;  %v531_v51 = vadd.f32 -0.28449672, %v521_v19  ;;  %v482_v58 = vmul.f32 1.0614054, %v1373_v10  ;;  %vm367_vm13 = vweird.f32 %v1275_v0 }
 0x1b3   :  { %v1367_v35 = vadd.f32 1.0, %v319_v23  ;;  %v1369_v15 = vpop.eup %812  ;;  %v1379_v5 = vadd.f32 1.0, %v320_v6  ;;  %v365_v55 = vadd.f32 %v1275_v0, %v364_v63  ;;  %v1394_v62 = vsel %vm283_vm9, -1.0, %v1662_v11  ;;  %vm1409_vm15 = vmor %vm366_vm14, %vm367_vm13 }
 0x1b4   :  { %v1381_v43 = vpop.eup %814  ;;  %v1388_v44 = vmul.f32 %v1369_v15, %v1302_v30  ;;  %v541_v3 = vmul.f32 %v531_v51, %v1292_v61  ;;  %v492_v7 = vadd.f32 -1.4531521, %v482_v58  ;;  %v370_v14 = vand.u32 2147483647, %v1177_v8 }
 0x1b5   :  { %822 = vrcp.f32 %v1367_v35  ;;  %v1397_v32 = vpop.eup %816  ;;  %v1406_v6 = vmul.f32 %v1381_v43, %v1314_v36  ;;  %v372_v42 = vand.u32 2147483648, %v1177_v8  ;;  %v379_v26 = vmul.f32 %v1300_v29, %v378_v27 }
 0x1b6   :  { %v1402_v23 = vpop.eup %818  ;;  %824 = vrcp.f32 %v1379_v5  ;;  %v551_v19 = vadd.f32 0.2548296, %v541_v3  ;;  %v502_v63 = vmul.f32 %v492_v7, %v1373_v10  ;;  %v369_v51 = vsel %vm1409_vm15, %v1275_v0, %v365_v55 }
 0x1b7   :  { %vm371_vm0 = vcmp.eq.f32.partialorder %v370_v14, 8.507059e+37  ;;  %v1419_v58 = vpop.eup %820  ;;  %v373_v22 = vor.u32 1.1754944e-38, %v372_v42  ;;  %v380_v1 = vadd.f32 %v1300_v29, %v379_v26  ;;  %vm382_vm1 = vweird.f32 %v1300_v29 }
 0x1b8   :  { %v385_v11 = vand.u32 2147483647, %v1226_v34  ;;  %v561_v27 = vmul.f32 %v551_v19, %v1292_v61  ;;  %v512_v3 = vadd.f32 1.4214138, %v502_v63  ;;  %vm381_vm2 = vweird.f32 %v1226_v34 }
 0x1b9   :  { %v387_v7 = vand.u32 2147483648, %v1226_v34  ;;  %v423_v0 = vsub.f32 1.0, %v1388_v44  ;;  %v1431_v14 = vsel %vm371_vm0, %v373_v22, %v369_v51  ;;  %v1436_v42 = vsel %vm284_vm11, -1.0, %v1678_v47  ;;  %vm383_vm3 = vmor %vm381_vm2, %vm382_vm1 }
 0x1ba   :  { %v611_v26 = vmul.f32 %v1252_v54, %v561_v27  ;;  %v522_v61 = vmul.f32 %v512_v3, %v1373_v10  ;;  %v483_v19 = vmul.f32 1.0614054, %v1431_v14  ;;  %v384_v34 = vsel %vm383_vm3, %v1300_v29, %v380_v1 }
 0x1bb   :  { %v1424_v8 = vpop.eup %822  ;;  %vm386_vm4 = vcmp.eq.f32.partialorder %v385_v11, 8.507059e+37  ;;  %v388_v22 = vor.u32 1.1754944e-38, %v387_v7  ;;  %v394_v50 = vmul.f32 %v1319_v33, %v393_v38  ;;  %vm396_vm5 = vweird.f32 %v1247_v52 }
 0x1bc   :  { %v1442_v63 = vpop.eup %824  ;;  %v1446_v44 = vmul.f32 %v1424_v8, %v1367_v35  ;;  %v621_v51 = vsub.f32 1.0, %v611_v26  ;;  %v532_v55 = vadd.f32 -0.28449672, %v522_v61  ;;  %v493_v37 = vadd.f32 -1.4531521, %v483_v19 }
 0x1bd   :  { %v1450_v54 = vsel %vm386_vm4, %v388_v22, %v384_v34  ;;  %v395_v27 = vadd.f32 %v1319_v33, %v394_v50  ;;  %vm397_vm6 = vweird.f32 %v1319_v33  ;;  %v400_v29 = vand.u32 2147483647, %v1247_v52 }
 0x1be   :  { %v631_v1 = vmul.f32 %v621_v51, %v1188_v12  ;;  %v542_v11 = vmul.f32 %v532_v55, %v1373_v10  ;;  %v503_v3 = vmul.f32 %v493_v37, %v1431_v14  ;;  %v484_v38 = vmul.f32 1.0614054, %v1450_v54  ;;  %vm1459_vm7 = vmor %vm396_vm5, %vm397_vm6 }
 0x1bf   :  { %v1465_v26 = vmul.f32 %v1442_v63, %v1379_v5  ;;  %v399_v61 = vsel %vm1459_vm7, %v1319_v33, %v395_v27  ;;  %vm401_vm8 = vcmp.eq.f32.partialorder %v400_v29, 8.507059e+37  ;;  %v402_v12 = vand.u32 2147483648, %v1247_v52 }
 0x1c0   :  { %v641_v55 = vadd.f32 1.0, %v631_v1  ;;  %v552_v19 = vadd.f32 0.2548296, %v542_v11  ;;  %v513_v37 = vadd.f32 1.4214138, %v503_v3  ;;  %v1681_v34 = vsub.f32 1.0, %v1357_v13 }
 0x1c1   :  { %v494_v50 = vadd.f32 -1.4531521, %v484_v38  ;;  %v403_v51 = vor.u32 1.1754944e-38, %v402_v12  ;;  %vm411_vm9 = vweird.f32 %v1258_v57  ;;  %vm412_vm10 = vweird.f32 %v1326_v49 }
 0x1c2   :  { %v409_v22 = vmul.f32 %v1326_v49, %v1681_v34  ;;  %v651_v45 = vmul.f32 %v641_v55, %v1169_v4  ;;  %v562_v33 = vmul.f32 %v552_v19, %v1373_v10  ;;  %v523_v27 = vmul.f32 %v513_v37, %v1431_v14  ;;  %vm1483_vm11 = vmor %vm411_vm9, %vm412_vm10 }
 0x1c3   :  { %v504_v29 = vmul.f32 %v494_v50, %v1450_v54  ;;  %v1481_v1 = vsel %vm401_vm8, %v403_v51, %v399_v61  ;;  %v415_v11 = vand.u32 2147483647, %v1258_v57  ;;  %v417_v3 = vand.u32 2147483648, %v1258_v57 }
 0x1c4   :  { %v410_v52 = vadd.f32 %v1326_v49, %v409_v22  ;;  %713 = vmatmul.f32.vlgmr.msra.gmra.mxu2 %v651_v45  ;;  %v612_v4 = vmul.f32 %v1284_v40, %v562_v33  ;;  %v533_v10 = vadd.f32 -0.28449672, %v523_v27  ;;  %v485_v38 = vmul.f32 1.0614054, %v1481_v1 }
 0x1c5   :  { %v453_v61 = vsub.f32 1.0, %v1446_v44  ;;  %v514_v12 = vadd.f32 1.4214138, %v504_v29  ;;  %vm416_vm12 = vcmp.eq.f32.partialorder %v415_v11, 8.507059e+37  ;;  %v418_v55 = vor.u32 1.1754944e-38, %v417_v3 }
 0x1c6   :  { %v414_v7 = vsel %vm1483_vm11, %v1326_v49, %v410_v52  ;;  %vm285_vm13 = vcmp.lt.f32.partialorder %v1180_v31, 0.0  ;;  %v622_v19 = vsub.f32 1.0, %v612_v4  ;;  %v543_v57 = vmul.f32 %v533_v10, %v1431_v14 }
 0x1c7   :  { %v495_v45 = vadd.f32 -1.4531521, %v485_v38  ;;  %v424_v40 = vmul.f32 %v1369_v15, %v423_v0  ;;  %v524_v37 = vmul.f32 %v514_v12, %v1450_v54  ;;  %v1499_v34 = vsel %vm416_vm12, %v418_v55, %v414_v7 }
 0x1c8   :  { %vm426_vm14 = vweird.f32 %v1302_v30  ;;  %vm427_vm15 = vweird.f32 %v1369_v15  ;;  %v632_v49 = vmul.f32 %v622_v19, %v1198_v17  ;;  %v553_v22 = vadd.f32 0.2548296, %v543_v57 }
 0x1c9   :  { %v505_v50 = vmul.f32 %v495_v45, %v1481_v1  ;;  %v486_v51 = vmul.f32 1.0614054, %v1499_v34  ;;  %v534_v33 = vadd.f32 -0.28449672, %v524_v37  ;;  %v425_v27 = vadd.f32 %v1369_v15, %v424_v40  ;;  %vm428_vm0 = vmor %vm426_vm14, %vm427_vm15 }
 0x1ca   :  { %v430_v0 = vand.u32 2147483647, %v1302_v30  ;;  %v432_v52 = vand.u32 2147483648, %v1302_v30  ;;  %v642_v29 = vadd.f32 1.0, %v632_v49  ;;  %v563_v13 = vmul.f32 %v553_v22, %v1431_v14 }
 0x1cb   :  { %v515_v11 = vadd.f32 1.4214138, %v505_v50  ;;  %v496_v3 = vadd.f32 -1.4531521, %v486_v51  ;;  %v544_v17 = vmul.f32 %v534_v33, %v1450_v54  ;;  %v429_v4 = vsel %vm428_vm0, %v1369_v15, %v425_v27 }
 0x1cc   :  { %vm431_vm1 = vcmp.eq.f32.partialorder %v430_v0, 8.507059e+37  ;;  %v433_v10 = vor.u32 1.1754944e-38, %v432_v52  ;;  %v652_v38 = vmul.f32 %v642_v29, %v1172_v21  ;;  %v613_v7 = vmul.f32 %v1353_v9, %v563_v13 }
 0x1cd   :  { %v525_v12 = vmul.f32 %v515_v11, %v1481_v1  ;;  %v506_v30 = vmul.f32 %v496_v3, %v1499_v34  ;;  %v468_v55 = vsub.f32 1.0, %v1465_v26  ;;  %v554_v14 = vadd.f32 0.2548296, %v544_v17 }
 0x1ce   :  { %v1517_v19 = vsel %vm431_vm1, %v433_v10, %v429_v4  ;;  %v1684_v57 = vsub.f32 1.0, %v1406_v6  ;;  %vm286_vm2 = vcmp.lt.f32.partialorder %v1206_v20, 0.0  ;;  %745 = vmatmul.f32.vlgmr.msra.gmra.mxu3 %v652_v38  ;;  %v623_v15 = vsub.f32 1.0, %v613_v7 }
 0x1cf   :  { %v535_v21 = vadd.f32 -0.28449672, %v525_v12  ;;  %v516_v40 = vadd.f32 1.4214138, %v506_v30  ;;  %vm441_vm3 = vweird.f32 %v1314_v36  ;;  %v564_v9 = vmul.f32 %v554_v14, %v1450_v54 }
 0x1d0   :  { %v439_v45 = vmul.f32 %v1381_v43, %v1684_v57  ;;  %v487_v37 = vmul.f32 1.0614054, %v1517_v19  ;;  %vm442_vm4 = vweird.f32 %v1381_v43  ;;  %v633_v6 = vmul.f32 %v623_v15, %v1394_v62 }
 0x1d1   :  { %v545_v22 = vmul.f32 %v535_v21, %v1481_v1  ;;  %v526_v50 = vmul.f32 %v516_v40, %v1499_v34  ;;  %v445_v51 = vand.u32 2147483647, %v1314_v36  ;;  %v614_v33 = vmul.f32 %v1361_v24, %v564_v9  ;;  %vm1536_vm5 = vmor %vm441_vm3, %vm442_vm4 }
 0x1d2   :  { %v440_v49 = vadd.f32 %v1381_v43, %v439_v45  ;;  %v295_v54 = vsel %vm285_vm13, -1.0, %v1678_v47  ;;  %v497_v27 = vadd.f32 -1.4531521, %v487_v37  ;;  %v447_v52 = vand.u32 2147483648, %v1314_v36 }
 0x1d3   :  { %v643_v62 = vadd.f32 1.0, %v633_v6  ;;  %v555_v29 = vadd.f32 0.2548296, %v545_v22  ;;  %v536_v13 = vadd.f32 -0.28449672, %v526_v50  ;;  %v624_v3 = vsub.f32 1.0, %v614_v33 }
 0x1d4   :  { %v444_v11 = vsel %vm1536_vm5, %v1381_v43, %v440_v49  ;;  %v507_v24 = vmul.f32 %v497_v27, %v1517_v19  ;;  %vm446_vm6 = vcmp.eq.f32.partialorder %v445_v51, 8.507059e+37  ;;  %v448_v31 = vor.u32 1.1754944e-38, %v447_v52 }
 0x1d5   :  { %v653_v17 = vmul.f32 %v643_v62, %v1200_v18  ;;  %v565_v4 = vmul.f32 %v555_v29, %v1481_v1  ;;  %v546_v10 = vmul.f32 %v536_v13, %v1499_v34  ;;  %v454_v36 = vmul.f32 %v1424_v8, %v453_v61 }
 0x1d6   :  { %v634_v38 = vmul.f32 %v624_v3, %v1436_v42  ;;  %v517_v7 = vadd.f32 1.4214138, %v507_v24  ;;  %v1552_v12 = vsel %vm446_vm6, %v448_v31, %v444_v11  ;;  %vm456_vm7 = vweird.f32 %v1367_v35 }
 0x1d7   :  { %716 = vmatmul.f32.gmra.mxu2 %v653_v17  ;;  %v615_v43 = vmul.f32 %v1397_v32, %v565_v4  ;;  %v556_v30 = vadd.f32 0.2548296, %v546_v10  ;;  %v488_v18 = vmul.f32 1.0614054, %v1552_v12  ;;  %v455_v1 = vadd.f32 %v1424_v8, %v454_v36 }
 0x1d8   :  { %v644_v14 = vadd.f32 1.0, %v634_v38  ;;  %v527_v44 = vmul.f32 %v517_v7, %v1517_v19  ;;  %vm457_vm8 = vweird.f32 %v1424_v8  ;;  %v460_v42 = vand.u32 2147483647, %v1367_v35 }
 0x1d9   :  { %v625_v61 = vsub.f32 1.0, %v615_v43  ;;  %v566_v57 = vmul.f32 %v556_v30, %v1499_v34  ;;  %v498_v45 = vadd.f32 -1.4531521, %v488_v18  ;;  %vm1562_vm9 = vmor %vm456_vm7, %vm457_vm8  ;;  %v462_v32 = vand.u32 2147483648, %v1367_v35 }
 0x1da   :  { %v654_v21 = vmul.f32 %v644_v14, %v1255_v56  ;;  %v296_v40 = vsel %vm286_vm2, -1.0, %v1678_v47  ;;  %v537_v9 = vadd.f32 -0.28449672, %v527_v44  ;;  %v459_v37 = vsel %vm1562_vm9, %v1424_v8, %v455_v1 }
 0x1db   :  { %v635_v49 = vmul.f32 %v625_v61, %v295_v54  ;;  %v616_v34 = vmul.f32 %v1402_v23, %v566_v57  ;;  %v508_v6 = vmul.f32 %v498_v45, %v1552_v12  ;;  %v463_v22 = vor.u32 1.1754944e-38, %v462_v32 }
 0x1dc   :  { %748 = vmatmul.f32.gmra.mxu3 %v654_v21  ;;  %v547_v35 = vmul.f32 %v537_v9, %v1517_v19  ;;  %vm461_vm10 = vcmp.eq.f32.partialorder %v460_v42, 8.507059e+37  ;;  %v469_v20 = vmul.f32 %v1442_v63, %v468_v55  ;;  %vm471_vm11 = vweird.f32 %v1379_v5 }
 0x1dd   :  { %v645_v56 = vadd.f32 1.0, %v635_v49  ;;  %v626_v50 = vsub.f32 1.0, %v616_v34  ;;  %v518_v51 = vadd.f32 1.4214138, %v508_v6  ;;  %v464_v8 = vsel %vm461_vm10, %v463_v22, %v459_v37 }
 0x1de   :  { %v557_v33 = vadd.f32 0.2548296, %v547_v35  ;;  %v489_v54 = vmul.f32 1.0614054, %v464_v8  ;;  %v470_v23 = vadd.f32 %v1442_v63, %v469_v20  ;;  %vm472_vm12 = vweird.f32 %v1442_v63 }
 0x1df   :  { %v655_v27 = vmul.f32 %v645_v56, %v1309_v39  ;;  %v636_v0 = vmul.f32 %v626_v50, %v296_v40  ;;  %v528_v52 = vmul.f32 %v518_v51, %v1552_v12  ;;  %v475_v26 = vand.u32 2147483647, %v1379_v5  ;;  %vm1592_vm13 = vmor %vm471_vm11, %vm472_vm12 }
 0x1e0   :  { %v1689_v55 = vsub.f32 0.0, %v1338_v59  ;;  %v567_v29 = vmul.f32 %v557_v33, %v1517_v19  ;;  %v499_v13 = vadd.f32 -1.4531521, %v489_v54  ;;  %v477_v39 = vand.u32 2147483648, %v1379_v5 }
 0x1e1   :  { %vm287_vm14 = vcmp.lt.f32.partialorder %v1250_v53, 0.0  ;;  %719 = vmatmul.f32.gmra.mxu2 %v655_v27  ;;  %v646_v3 = vadd.f32 1.0, %v636_v0  ;;  %v538_v24 = vadd.f32 -0.28449672, %v528_v52  ;;  %826 = vpow2.f32 %v1377_v46 }
 0x1e2   :  { %v589_v62 = vmul.f32 %v1689_v55, %v1338_v59  ;;  %v474_v59 = vsel %vm1592_vm13, %v1442_v63, %v470_v23  ;;  %v617_v19 = vmul.f32 %v1419_v58, %v567_v29  ;;  %v509_v31 = vmul.f32 %v499_v13, %v464_v8  ;;  %v1693_v29 = vld [vmem:[#allocation2_spill] sm:$0xff] }
 0x1e3   :  { %v478_v17 = vor.u32 1.1754944e-38, %v477_v39  ;;  %v580_v4 = vsub.f32 0.0, %v1341_v60  ;;  %v656_v10 = vmul.f32 %v646_v3, %v1365_v25  ;;  %v548_v5 = vmul.f32 %v538_v24, %v1552_v12  ;;  %v779_v3 = vld [vmem:[%s1660_s6] ss:$0 sm:$0xff] }
 0x1e4   :  { %vm476_vm15 = vcmp.eq.f32.partialorder %v475_v26, 8.507059e+37  ;;  %v607_v36 = vmul.f32 1.442695, %v589_v62  ;;  %v627_v38 = vsub.f32 1.0, %v617_v19  ;;  %v519_v7 = vadd.f32 1.4214138, %v509_v31 }
 0x1e5   :  { %v479_v43 = vsel %vm476_vm15, %v478_v17, %v474_v59  ;;  %751 = vmatmul.f32.gmra.mxu3 %v656_v10  ;;  %v297_v46 = vsel %vm287_vm14, -1.0, %v1678_v47  ;;  %v558_v63 = vadd.f32 0.2548296, %v548_v5  ;;  %v267_v44 = vmul.f32 0.5, %v1232_v16  ;;  %v832_v31 = vld [vmem:[%s1654_s0] sm:$0xff] }
 0x1e6   :  { %v490_v58 = vmul.f32 1.0614054, %v479_v43  ;;  %v637_v30 = vmul.f32 %v627_v38, %v297_v46  ;;  %v529_v18 = vmul.f32 %v519_v7, %v464_v8  ;;  %v590_v42 = vmul.f32 %v580_v4, %v1341_v60 }
 0x1e7   :  { %v568_v1 = vmul.f32 %v558_v63, %v1552_v12  ;;  %v827_v25 = vpop.eup %826  ;;  %vm288_vm0 = vcmp.lt.f32.partialorder %v1278_v2, 0.0  ;;  %828 = vpow2.f32 %v607_v36  ;;  %v268_v6 = vmul.f32 0.5, %v1242_v48  ;;  %v1692_v48 = vld [vmem:[#allocation3_spill] sm:$0xff] }
 0x1e8   :  { %v500_v14 = vadd.f32 -1.4531521, %v490_v58  ;;  %v647_v61 = vadd.f32 1.0, %v637_v30  ;;  %v539_v57 = vadd.f32 -0.28449672, %v529_v18  ;;  %v298_v12 = vsel %vm288_vm0, -1.0, %v1678_v47 }
 0x1e9   :  { %v618_v45 = vmul.f32 %v827_v25, %v568_v1  ;;  %v609_v9 = vmul.f32 1.442695, %v590_v42  ;;  %vm289_vm1 = vcmp.lt.f32.partialorder %v1317_v41, 0.0  ;;  %vm290_vm2 = vcmp.lt.f32.partialorder %v1692_v48, 0.0 }
 0x1ea   :  { %v510_v53 = vmul.f32 %v500_v14, %v479_v43  ;;  %v657_v15 = vmul.f32 %v647_v61, %v267_v44  ;;  %v549_v32 = vmul.f32 %v539_v57, %v464_v8  ;;  %v299_v51 = vsel %vm289_vm1, -1.0, %v1678_v47 }
 0x1eb   :  { %v628_v21 = vsub.f32 1.0, %v618_v45  ;;  %830 = vpow2.f32 %v609_v9  ;;  %v300_v55 = vsel %vm290_vm2, -1.0, %v1678_v47  ;;  %v270_v13 = vmul.f32 0.5, %v1693_v29 }
 0x1ec   :  { %v520_v40 = vadd.f32 1.4214138, %v510_v53  ;;  %722 = vmatmul.f32.gmra.mxu2 %v657_v15  ;;  %v559_v37 = vadd.f32 0.2548296, %v549_v32 }
 0x1ed   :  { %v638_v49 = vmul.f32 %v628_v21, %v298_v12  ;;  %v829_v60 = vpop.eup %828 }
 0x1ee   :  { %v530_v16 = vmul.f32 %v520_v40, %v479_v43  ;;  %v569_v34 = vmul.f32 %v559_v37, %v464_v8  ;;  %v269_v8 = vmul.f32 0.5, %v1298_v28 }
 0x1ef   :  { %v648_v22 = vadd.f32 1.0, %v638_v49 }
 0x1f0   :  { %v540_v2 = vadd.f32 -0.28449672, %v530_v16  ;;  %v619_v35 = vmul.f32 %v829_v60, %v569_v34 }
 0x1f1   :  { %v658_v20 = vmul.f32 %v648_v22, %v268_v6  ;;  %v831_v27 = vpop.eup %830 }
 0x1f2   :  { %v550_v56 = vmul.f32 %v540_v2, %v479_v43  ;;  %v629_v50 = vsub.f32 1.0, %v619_v35 }
 0x1f3   :  { %754 = vmatmul.f32.gmra.mxu3 %v658_v20 }
 0x1f4   :  { %v560_v33 = vadd.f32 0.2548296, %v550_v56  ;;  %v639_v54 = vmul.f32 %v629_v50, %v299_v51 }
 0x1f6   :  { %v570_v23 = vmul.f32 %v560_v33, %v479_v43  ;;  %v649_v0 = vadd.f32 1.0, %v639_v54 }
 0x1f8   :  { %v620_v52 = vmul.f32 %v831_v27, %v570_v23  ;;  %v659_v26 = vmul.f32 %v649_v0, %v269_v8 }
 0x1fa   :  { %v630_v41 = vsub.f32 1.0, %v620_v52  ;;  %725 = vmatmul.f32.gmra.mxu2 %v659_v26 }
 0x1fc   :  { %v640_v62 = vmul.f32 %v630_v41, %v300_v55 }
 0x1fe   :  { %v650_v11 = vadd.f32 1.0, %v640_v62 }
 0x200   :  { %v660_v39 = vmul.f32 %v650_v11, %v270_v13 }
 0x202   :  { %757 = vmatmul.f32.gmra.mxu3 %v660_v39 }
 0x247   :  { %v714_v28 = vpop.f32.mrf.mxu2 }
 0x248   :  { %v715_v24 = vadd.f32 %v779_v3, %v714_v28 }
 0x251   :  { %v746_v59 = vpop.f32.mrf.mxu3 }
 0x252   :  { %v747_v19 = vadd.f32 %v746_v59, %v715_v24 }
 0x254   :  { %v761_v17 = vadd.f32 %v832_v31, %v747_v19 }
 0x256   :  { %766 = vst [vmem:[%s1661_s7] sm:$0xff] %v761_v17 }
 0x25a   :  { %v717_v47 = vpop.f32.mrf.mxu2 }
 0x25b   :  { %v718_v4 = vadd.f32 %v779_v3, %v717_v47 }
 0x25d   :  { %v833_v36 = vld [vmem:[%s1654_s0 + $0x8] sm:$0xff] }
 0x25f   :  { %v749_v10 = vpop.f32.mrf.mxu3 }
 0x260   :  { %v750_v5 = vadd.f32 %v749_v10, %v718_v4 }
 0x262   :  { %v762_v38 = vadd.f32 %v833_v36, %v750_v5 }
 0x264   :  { %767 = vst [vmem:[%s1661_s7 + $0x8] sm:$0xff] %v762_v38  ;;  %v720_v7 = vpop.f32.mrf.mxu2 }
 0x265   :  { %v721_v43 = vadd.f32 %v779_v3, %v720_v7 }
 0x268   :  { %v752_v46 = vpop.f32.mrf.mxu3 }
 0x269   :  { %v753_v63 = vadd.f32 %v752_v46, %v721_v43 }
 0x26b   :  { %v834_v58 = vld [vmem:[%s1654_s0 + $0x10] sm:$0xff] }
 0x26c   :  { %v763_v30 = vadd.f32 %v834_v58, %v753_v63 }
 0x26e   :  { %768 = vst [vmem:[%s1661_s7 + $0x10] sm:$0xff] %v763_v30 }
 0x26f   :  { %v723_v18 = vpop.f32.mrf.mxu2 }
 0x270   :  { %v724_v1 = vadd.f32 %v779_v3, %v723_v18 }
 0x275   :  { %v835_v44 = vld [vmem:[%s1654_s0 + $0x18] sm:$0xff] }
 0x276   :  { %v755_v14 = vpop.f32.mrf.mxu3 }
 0x277   :  { %v756_v25 = vadd.f32 %v755_v14, %v724_v1 }
 0x279   :  { %v764_v42 = vadd.f32 %v835_v44, %v756_v25 }
 0x27b   :  { %769 = vst [vmem:[%s1661_s7 + $0x18] sm:$0xff] %v764_v42 }
 0x27d   :  { %v726_v61 = vpop.f32.mrf.mxu2 }
 0x27e   :  { %v727_v57 = vadd.f32 %v779_v3, %v726_v61 }
 0x282   :  { %v836_v15 = vld [vmem:[%s1654_s0 + $0x20] sm:$0x3] }
 0x285   :  { %v758_v45 = vpop.f32.mrf.mxu3 }
 0x286   :  { %v759_v53 = vadd.f32 %v758_v45, %v727_v57 }
 0x288   :  { %v765_v32 = vadd.f32 %v836_v15, %v759_v53 }
 0x28a   :  { %770 = vst [vmem:[%s1661_s7 + $0x20] sm:$0x3] %v765_v32 }

// kernel: vit_forward.10
= control target key start
LH: loop header
LB: loop body
LE: loop exit
PB: predicated region body
PF: predicated region fallthrough
CT: control target
= control target key end

     0   :  { %s1158_s15 = smov 0   ;;  %s1421_s0 = inlined_call_operand.vmem [shape: f32[2,17,384], index: 0, kind: input, shape index: {}]   ;;  %s1422_s1 = inlined_call_operand.vmem [shape: f32[2,17,128], index: 1, kind: input, shape index: {}, may-alias: {1,4}]   ;;  %s1423_s2 = inlined_call_operand.vmem [shape: f32[128,128], index: 2, kind: input, shape index: {}]   ;;  %s1424_s3 = inlined_call_operand.vmem [shape: f32[1,128], index: 3, kind: input, shape index: {}]   ;;  %s1425_s4 = inlined_call_operand.vmem [shape: f32[2,17,128], index: 4, kind: output, shape index: {}, may-alias: {1,4}]  }
   0x1 LB: > { %s983_s16 = sadd.s32 4294967295, %s1128_s15   ;;  %p987_p0 = scmp.ge.s32.totalorder %s1128_s15, 1  ;;  %s1128_s15 = sphi %s1158_s15, %s14_s15  }
   0x2   : > { %p172_p1 = scmp.lt.s32.totalorder %s1128_s15, 3 }
   0x4   : > { %p173_p2 = pnand %p987_p0, %p172_p1 }
   0x5   : > { %p203_p3 = scmp.lt.s32.totalorder (!%p173_p2), %s983_s16, 1  ;;  %s1130_s21 = smov (!%p173_p2), 96  }
   0x6   : > { %176 = sbr.rel (%p173_p2) target bundleno = 1393 (0x571), region = 36  ;;  %s1131_s22 = smov (!%p173_p2), 32  }
   0x7   : > { %s1132_s23 = smov (!%p173_p2), 64  }
   0xb   : > { %s1427_s16 = smov (!%p203_p3, %s983_s16), 1  ;;  %vm240_vm0 = vcmask 261120   ;;  %vm285_vm1 = vcmask 138240   ;;  %vm292_vm2 = vcmask 131072   ;;  %vm329_vm3 = vcmask 1040384  }
   0xc   : > { %s1045_s17 = smul.u32 72, %s1427_s16 }
   0xd   : > { %s1046_s14 = smul.u32 24, %s1427_s16 }
   0xe   : > { %s1172_s20 = scalar_lea.vmem %s1421_s0, %s1045_s17 }
   0xf   : > { %v1175_v0 = vld [vmem:[%s1172_s20 + $0x38] sm:$0x1]  ;;  %v1178_v1 = vld [vmem:[%s1172_s20 + $0x8] sm:$0xff]  ;;  %v1186_v3 = vld [vmem:[%s1172_s20 + $0x20] sm:$0xff]  ;;  %s1332_s19 = scalar_lea.vmem %s1422_s1, %s1046_s14  ;;  %s217_s17 = scalar_lea.vmem %s1425_s4, %s1046_s14 }
  0x10   : > { %411 = vrot.lane.b32.xlu0 %v1175_v0, %s1130_s21  ;;  %991 = vmatpush.xpose.msk.msra.mxu0 %vm240_vm0, %v1175_v0  ;;  %v221_v2 = vld [vmem:[%s1172_s20 + $0x18] sm:$0xff]  ;;  %v218_v5 = vld [vmem:[%s1172_s20] sm:$0xff]  ;;  %v224_v6 = vld [vmem:[%s1172_s20 + $0x30] sm:$0x1] }
  0x11   : > { %407 = vrot.lane.b32.xlu1 %v1178_v1, %s1130_s21  ;;  %v1190_v4 = vmul.f32 0.17677669, %v221_v2  ;;  %v1198_v7 = vmul.f32 0.17677669, %v218_v5  ;;  %v1206_v8 = vmul.f32 0.17677669, %v224_v6 }
  0x12   : > { %v1232_v42 = vld [vmem:[%s1172_s20 + $0x40] sm:$0x1]  ;;  %v220_v43 = vld [vmem:[%s1172_s20 + $0x10] sm:$0xff]  ;;  %v223_v44 = vld [vmem:[%s1172_s20 + $0x28] sm:$0xff] }
  0x13   : > { %403 = vrot.lane.b32.xlu2 %v1190_v4, %s1130_s21  ;;  %v1248_v45 = vpack.i.bf16 %v220_v43, %v223_v44  ;;  %997 = vmatpush.msk.msra.mxu1 %vm329_vm3, %v1232_v42 }
  0x14   : > { %992 = vmatpush.xpose.msk.msra.mxu0 %vm240_vm0, %v1186_v3 }
  0x15   : > { %347 = vmatpush.msra.mxu1 %v223_v44 }
  0x17   : > { %348 = vmatpush.msra.mxu1 %v220_v43 }
  0x18   : > { %409 = vrot.lane.b32.xlu0 %v1186_v3, %s1130_s21  ;;  %993 = vmatpush.xpose.msk.msra.mxu0 %vm240_vm0, %v1178_v1 }
  0x19   : > { %401 = vrot.lane.b32.xlu1 %v1198_v7, %s1130_s21 }
  0x1b   : > { %994 = vmatmul.msk.f32.vlgmr.msra.gmra.mxu0 %vm240_vm0, %v1198_v7  ;;  %405 = vrot.lane.b32.xlu2 %v1206_v8, %s1130_s21 }
  0x23   : > { %995 = vmatmul.msk.f32.gmra.mxu0 %vm240_vm0, %v1190_v4 }
  0x2b   : > { %996 = vmatmul.msk.f32.gmra.mxu0 %vm240_vm0, %v1206_v8 }
  0x6d   : > { %v404_v13 = vpop.permute.xlu2 %403 }
  0x75   : > { %v406_v16 = vpop.permute.xlu2 %405 }
  0x82   : > { %v412_v9 = vpop.permute.xlu0 %411 }
  0x83   : > { %1004 = vmatpush.xpose.msk.msra.mxu3 %vm240_vm0, %v412_v9  ;;  %v408_v10 = vpop.permute.xlu1 %407 }
  0x8a   : > { %v410_v11 = vpop.permute.xlu0 %409 }
  0x8b   : > { %1005 = vmatpush.xpose.msk.msra.mxu3 %vm240_vm0, %v410_v11  ;;  %v402_v12 = vpop.permute.xlu1 %401 }
  0x8f   : > { %1006 = vmatpush.xpose.msk.msra.mxu3 %vm240_vm0, %v408_v10 }
  0x92   : > { %1007 = vmatmul.msk.f32.vlgmr.msra.gmra.mxu3 %vm240_vm0, %v402_v12 }
  0x98   : > { %v276_v14 = vpop.f32.mrf.mxu0 }
  0x99   : > { %v286_v15 = vsel %vm285_vm1, %v276_v14, -inf }
  0x9a   : > { %1008 = vmatmul.msk.f32.gmra.mxu3 %vm240_vm0, %v404_v13  ;;  %287 = vmax.xlane.f32.xlu0 %v286_v15  ;;  %v362_v13 = vld [vmem:[%s1423_s2 + $0x18] sm:$0xff] }
  0x9b   : > { %384 = vmatpush.msra.mxu2 %v362_v13 }
  0xa0   : > { %v279_v17 = vpop.f32.mrf.mxu0 }
  0xa1   : > { %v289_v18 = vsel %vm285_vm1, %v279_v17, -inf }
  0xa2   : > { %1009 = vmatmul.msk.f32.gmra.mxu3 %vm240_vm0, %v406_v16  ;;  %290 = vmax.xlane.f32.xlu1 %v289_v18 }
  0xa8   : > { %v282_v19 = vpop.f32.mrf.mxu0 }
  0xa9   : > { %v293_v20 = vsel %vm292_vm2, %v282_v19, -inf }
  0xaa   : > { %294 = vmax.xlane.f32.xlu2 %v293_v20  ;;  %v534_v20 = vld [vmem:[%s1423_s2 + $0x38] sm:$0xff] }
 0x10d   : > { %v288_v21 = vpop.xlane.xlu0 %287 }
 0x10e   : > { %v296_v22 = vsub.f32 %v276_v14, %v288_v21 }
 0x110   : > { %v299_v23 = vmul.f32 1.442695, %v296_v22 }
 0x112   : > { %1074 = vpow2.f32 %v299_v23 }
 0x115   : > { %v442_v24 = vpop.f32.mrf.mxu3  ;;  %v291_v25 = vpop.xlane.xlu1 %290 }
 0x116   : > { %v297_v26 = vsub.f32 %v279_v17, %v291_v25  ;;  %v451_v27 = vsel %vm285_vm1, %v442_v24, -inf }
 0x117   : > { %452 = vmax.xlane.f32.xlu2 %v451_v27  ;;  %v533_v27 = vld [vmem:[%s1423_s2 + $0x30] sm:$0xff] }
 0x118   : > { %v301_v28 = vmul.f32 1.442695, %v297_v26  ;;  %v1075_v29 = vpop.eup %1074 }
 0x119   : > { %v305_v34 = vsel %vm285_vm1, %v1075_v29, 0.0 }
 0x11a   : > { %1076 = vpow2.f32 %v301_v28  ;;  %v532_v28 = vld [vmem:[%s1423_s2 + $0x28] sm:$0xff] }
 0x11d   : > { %v445_v30 = vpop.f32.mrf.mxu3  ;;  %v295_v31 = vpop.xlane.xlu2 %294 }
 0x11e   : > { %v298_v32 = vsub.f32 %v282_v19, %v295_v31  ;;  %v454_v33 = vsel %vm285_vm1, %v445_v30, -inf }
 0x11f   : > { %455 = vmax.xlane.f32.xlu0 %v454_v33  ;;  %306 = vadd.xlane.f32.xlu2 %v305_v34 }
 0x120   : > { %v303_v35 = vmul.f32 1.442695, %v298_v32  ;;  %v1077_v36 = vpop.eup %1076 }
 0x121   : > { %v308_v39 = vsel %vm285_vm1, %v1077_v36, 0.0 }
 0x122   : > { %1078 = vpow2.f32 %v303_v35 }
 0x125   : > { %v448_v37 = vpop.f32.mrf.mxu3 }
 0x126   : > { %v457_v38 = vsel %vm292_vm2, %v448_v37, -inf }
 0x127   : > { %458 = vmax.xlane.f32.xlu1 %v457_v38  ;;  %309 = vadd.xlane.f32.xlu0 %v308_v39 }
 0x128   : > { %v1079_v40 = vpop.eup %1078 }
 0x129   : > { %v311_v41 = vsel %vm292_vm2, %v1079_v40, 0.0 }
 0x12f   : > { %312 = vadd.xlane.f32.xlu1 %v311_v41 }
 0x13b   : > { %490 = vrot.lane.b32.xlu0 %v1232_v42, %s1130_s21 }
 0x143   : > { %753 = vrot.lane.b32.xlu0 %v1175_v0, %s1131_s22 }
 0x148   : > { %1059 = vrot.lane.b32.xlu1 %v1248_v45, %s1130_s21 }
 0x14b   : > { %581 = vrot.lane.b32.xlu0 %v1186_v3, %s1132_s23 }
 0x150   : > { %751 = vrot.lane.b32.xlu1 %v1186_v3, %s1131_s22 }
 0x153   : > { %743 = vrot.lane.b32.xlu0 %v1198_v7, %s1131_s22 }
 0x158   : > { %749 = vrot.lane.b32.xlu1 %v1178_v1, %s1131_s22 }
 0x15b   : > { %573 = vrot.lane.b32.xlu0 %v1198_v7, %s1132_s23 }
 0x160   : > { %579 = vrot.lane.b32.xlu1 %v1178_v1, %s1132_s23 }
 0x163   : > { %747 = vrot.lane.b32.xlu0 %v1206_v8, %s1131_s22 }
 0x168   : > { %575 = vrot.lane.b32.xlu1 %v1190_v4, %s1132_s23 }
 0x18a   : > { %v453_v46 = vpop.xlane.xlu2 %452 }
 0x18b   : > { %v460_v47 = vsub.f32 %v442_v24, %v453_v46 }
 0x18d   : > { %v463_v48 = vmul.f32 1.442695, %v460_v47 }
 0x18f   : > { %1080 = vpow2.f32 %v463_v48 }
 0x192   : > { %v456_v49 = vpop.xlane.xlu0 %455  ;;  %v307_v50 = vpop.xlane.xlu2 %306 }
 0x193   : > { %v461_v51 = vsub.f32 %v445_v30, %v456_v49  ;;  %1082 = vrcp.f32 %v307_v50 }
 0x195   : > { %v1081_v52 = vpop.eup %1080  ;;  %v465_v53 = vmul.f32 1.442695, %v461_v51 }
 0x196   : > { %v469_v54 = vsel %vm285_vm1, %v1081_v52, 0.0 }
 0x197   : > { %1084 = vpow2.f32 %v465_v53  ;;  %470 = vadd.xlane.f32.xlu2 %v469_v54 }
 0x199   : > { %v1083_v55 = vpop.eup %1082 }
 0x19a   : > { %v310_v56 = vpop.xlane.xlu0 %309  ;;  %v459_v57 = vpop.xlane.xlu1 %458  ;;  %v317_v58 = vmul.f32 %v1083_v55, %v1075_v29  ;;  %v531_v29 = vld [vmem:[%s1423_s2 + $0x20] sm:$0xff] }
 0x19b   : > { %1086 = vrcp.f32 %v310_v56  ;;  %v462_v59 = vsub.f32 %v448_v37, %v459_v57  ;;  %v1337_v55 = vld [vmem:[%s1424_s3] ss:$0 sm:$0xff] }
 0x19c   : > { %998 = vmatmul.msk.f32.vlgmr.msra.gmra.mxu1 %vm285_vm1, %v317_v58  ;;  %v227_v56 = vld [vmem:[%s1332_s19] sm:$0xff] }
 0x19d   : > { %v1085_v60 = vpop.eup %1084  ;;  %v467_v61 = vmul.f32 1.442695, %v462_v59  ;;  %v234_v58 = vadd.f32 %v1337_v55, %v227_v56 }
 0x19e   : > { %v472_v62 = vsel %vm285_vm1, %v1085_v60, 0.0 }
 0x19f   : > { %1088 = vpow2.f32 %v467_v61  ;;  %473 = vadd.xlane.f32.xlu2 %v472_v62 }
 0x1a1   : > { %v1087_v63 = vpop.eup %1086 }
 0x1a2   : > { %v313_v1 = vpop.xlane.xlu1 %312  ;;  %v318_v2 = vmul.f32 %v1087_v63, %v1077_v36 }
 0x1a3   : > { %1090 = vrcp.f32 %v313_v1 }
 0x1a4   : > { %999 = vmatmul.msk.f32.gmra.mxu1 %vm285_vm1, %v318_v2 }
 0x1a5   : > { %v1089_v3 = vpop.eup %1088 }
 0x1a6   : > { %v475_v5 = vsel %vm292_vm2, %v1089_v3, 0.0 }
 0x1a7   : > { %476 = vadd.xlane.f32.xlu2 %v475_v5 }
 0x1a9   : > { %v1091_v6 = vpop.eup %1090 }
 0x1aa   : > { %v319_v7 = vmul.f32 %v1091_v6, %v1079_v40 }
 0x1ac   : > { %1000 = vmatmul.msk.f32.gmra.mxu1 %vm285_vm1, %v319_v7 }
 0x1ad   : > { %v491_v9 = vpop.permute.xlu0 %490 }
 0x1ae   : > { %1010 = vmatpush.msk.msrb.mxu1 %vm329_vm3, %v491_v9 }
 0x1b5   : > { %v754_v15 = vpop.permute.xlu0 %753 }
 0x1ba   : > { %v1060_v10 = vpop.permute.xlu1 %1059 }
 0x1bb   : > { %v1061_v11 = vunpack.i.l.bf16 %v1060_v10  ;;  %v1062_v12 = vunpack.i.h.bf16 %v1060_v10 }
 0x1bd   : > { %519 = vmatpush.msrb.mxu1 %v1061_v11  ;;  %v582_v21 = vpop.permute.xlu0 %581 }
 0x1bf   : > { %583 = vrot.lane.b32.xlu2 %v1175_v0, %s1132_s23  ;;  %520 = vmatpush.msrb.mxu1 %v1062_v12  ;;  %v361_v0 = vld [vmem:[%s1423_s2 + $0x10] sm:$0xff] }
 0x1c0   : > { %385 = vmatpush.msra.mxu2 %v361_v0 }
 0x1c2   : > { %v752_v19 = vpop.permute.xlu1 %751 }
 0x1c5   : > { %v744_v32 = vpop.permute.xlu0 %743 }
 0x1c7   : > { %745 = vrot.lane.b32.xlu2 %v1190_v4, %s1131_s22  ;;  %v360_v4 = vld [vmem:[%s1423_s2 + $0x8] sm:$0xff] }
 0x1c8   : > { %386 = vmatpush.msra.mxu2 %v360_v4 }
 0x1ca   : > { %v750_v26 = vpop.permute.xlu1 %749 }
 0x1cd   : > { %v574_v37 = vpop.permute.xlu0 %573 }
 0x1cf   : > { %577 = vrot.lane.b32.xlu2 %v1206_v8, %s1132_s23  ;;  %v359_v8 = vld [vmem:[%s1423_s2] sm:$0xff] }
 0x1d0   : > { %387 = vmatpush.msra.mxu2 %v359_v8 }
 0x1d2   : > { %556 = vmatpush.msrb.mxu2 %v534_v20  ;;  %v580_v35 = vpop.permute.xlu1 %579 }
 0x1d4   : > { %557 = vmatpush.msrb.mxu2 %v533_v27 }
 0x1d5   : > { %v748_v50 = vpop.permute.xlu0 %747 }
 0x1d6   : > { %558 = vmatpush.msrb.mxu2 %v532_v28 }
 0x1d8   : > { %559 = vmatpush.msrb.mxu2 %v531_v29 }
 0x1da   : > { %v576_v39 = vpop.permute.xlu1 %575 }
 0x20a   : > { %v471_v14 = vpop.xlane.xlu2 %470 }
 0x20b   : > { %1092 = vrcp.f32 %v471_v14 }
 0x211   : > { %v1093_v16 = vpop.eup %1092 }
 0x212   : > { %v474_v17 = vpop.xlane.xlu2 %473  ;;  %v481_v18 = vmul.f32 %v1093_v16, %v1081_v52 }
 0x213   : > { %1094 = vrcp.f32 %v474_v17 }
 0x214   : > { %1011 = vmatmul.msk.f32.vlgmr.msrb.gmra.mxu1 %vm285_vm1, %v481_v18 }
 0x219   : > { %v1095_v22 = vpop.eup %1094  ;;  %v350_v23 = vpop.f32.mrf.mxu1 }
 0x21a   : > { %1001 = vmatmul.msk.f32.vlgmr.msra.gmra.mxu2 %vm240_vm0, %v350_v23  ;;  %v477_v24 = vpop.xlane.xlu2 %476  ;;  %v482_v25 = vmul.f32 %v1095_v22, %v1085_v60  ;;  %v228_v60 = vld [vmem:[%s1332_s19 + $0x8] sm:$0xff] }
 0x21b   : > { %1096 = vrcp.f32 %v477_v24  ;;  %1030 = vmatpush.xpose.msk.msra.mxu2 %vm240_vm0, %v754_v15  ;;  %v235_v63 = vadd.f32 %v1337_v55, %v228_v60 }
 0x21c   : > { %1012 = vmatmul.msk.f32.gmra.mxu1 %vm285_vm1, %v482_v25 }
 0x21f   : > { %1031 = vmatpush.xpose.msk.msra.mxu2 %vm240_vm0, %v752_v19 }
 0x221   : > { %v1097_v30 = vpop.eup %1096  ;;  %v353_v31 = vpop.f32.mrf.mxu1 }
 0x222   : > { %1002 = vmatmul.msk.f32.gmra.mxu2 %vm240_vm0, %v353_v31  ;;  %v584_v33 = vpop.permute.xlu2 %583  ;;  %v483_v34 = vmul.f32 %v1097_v30, %v1089_v3 }
 0x223   : > { %1017 = vmatpush.xpose.msk.msrb.mxu0 %vm240_vm0, %v584_v33  ;;  %1032 = vmatpush.xpose.msk.msra.mxu2 %vm240_vm0, %v750_v26 }
 0x224   : > { %1013 = vmatmul.msk.f32.gmra.mxu1 %vm285_vm1, %v483_v34 }
 0x227   : > { %1018 = vmatpush.xpose.msk.msrb.mxu0 %vm240_vm0, %v582_v21 }
 0x229   : > { %v356_v36 = vpop.f32.mrf.mxu1 }
 0x22a   : > { %1003 = vmatmul.msk.f32.gmra.mxu2 %vm240_vm0, %v356_v36  ;;  %v746_v38 = vpop.permute.xlu2 %745 }
 0x22b   : > { %1019 = vmatpush.xpose.msk.msrb.mxu0 %vm240_vm0, %v580_v35 }
 0x22e   : > { %1020 = vmatmul.msk.f32.vlgmr.msrb.gmra.mxu0 %vm240_vm0, %v574_v37 }
 0x232   : > { %v578_v40 = vpop.permute.xlu2 %577 }
 0x236   : > { %1021 = vmatmul.msk.f32.gmra.mxu0 %vm240_vm0, %v576_v39 }
 0x23e   : > { %1022 = vmatmul.msk.f32.gmra.mxu0 %vm240_vm0, %v578_v40 }
 0x291   : > { %v522_v41 = vpop.f32.mrf.mxu1 }
 0x292   : > { %1014 = vmatmul.msk.f32.vlgmr.msrb.gmra.mxu2 %vm240_vm0, %v522_v41 }
 0x299   : > { %v525_v43 = vpop.f32.mrf.mxu1 }
 0x29a   : > { %1015 = vmatmul.msk.f32.gmra.mxu2 %vm240_vm0, %v525_v43 }
 0x29d   : > { %v389_v53 = vpop.f32.mrf.mxu2 }
 0x29e   : > { %v398_v59 = vadd.f32 %v389_v53, %v234_v58  ;;  %v702_v53 = vld [vmem:[%s1423_s2 + $0x48] sm:$0xff] }
 0x2a1   : > { %v528_v44 = vpop.f32.mrf.mxu1 }
 0x2a2   : > { %1016 = vmatmul.msk.f32.gmra.mxu2 %vm240_vm0, %v528_v44 }
 0x2a5   : > { %v392_v54 = vpop.f32.mrf.mxu2 }
 0x2a6   : > { %v399_v1 = vadd.f32 %v392_v54, %v235_v63  ;;  %v701_v54 = vld [vmem:[%s1423_s2 + $0x40] sm:$0xff] }
 0x2aa   : > { %1033 = vmatmul.msk.f32.vlgmr.msra.gmra.mxu2 %vm240_vm0, %v744_v32 }
 0x2ab   : > { %v614_v46 = vpop.f32.mrf.mxu0 }
 0x2ac   : > { %v623_v47 = vsel %vm285_vm1, %v614_v46, -inf }
 0x2ad   : > { %624 = vmax.xlane.f32.xlu1 %v623_v47  ;;  %v1340_v57 = vpop.f32.mrf.mxu2 }
 0x2b2   : > { %1034 = vmatmul.msk.f32.gmra.mxu2 %vm240_vm0, %v746_v38 }
 0x2b3   : > { %v617_v48 = vpop.f32.mrf.mxu0 }
 0x2b4   : > { %v626_v49 = vsel %vm285_vm1, %v617_v48, -inf }
 0x2b5   : > { %627 = vmax.xlane.f32.xlu2 %v626_v49 }
 0x2ba   : > { %1035 = vmatmul.msk.f32.gmra.mxu2 %vm240_vm0, %v748_v50 }
 0x2bb   : > { %v1322_v51 = vpop.f32.mrf.mxu0 }
 0x2bc   : > { %v629_v52 = vsel %vm292_vm2, %v1322_v51, -inf }
 0x2bd   : > { %630 = vmax.xlane.f32.xlu0 %v629_v52  ;;  %v704_v52 = vld [vmem:[%s1423_s2 + $0x58] sm:$0xff] }
 0x2be   : > { %726 = vmatpush.msra.mxu1 %v704_v52 }
 0x315   : > { %v561_v61 = vpop.f32.mrf.mxu2 }
 0x316   : > { %v1344_v62 = vadd.f32 %v561_v61, %v398_v59 }
 0x31d   : > { %v564_v2 = vpop.f32.mrf.mxu2 }
 0x31e   : > { %v1347_v3 = vadd.f32 %v564_v2, %v399_v1 }
 0x320   : > { %v625_v5 = vpop.xlane.xlu1 %624 }
 0x321   : > { %v632_v6 = vsub.f32 %v614_v46, %v625_v5 }
 0x323   : > { %v635_v7 = vmul.f32 1.442695, %v632_v6 }
 0x325   : > { %1098 = vpow2.f32 %v635_v7  ;;  %v1349_v9 = vpop.f32.mrf.mxu2 }
 0x328   : > { %v628_v15 = vpop.xlane.xlu2 %627 }
 0x329   : > { %v633_v16 = vsub.f32 %v617_v48, %v628_v15 }
 0x32b   : > { %v1099_v10 = vpop.eup %1098  ;;  %v637_v17 = vmul.f32 1.442695, %v633_v16  ;;  %v871_v16 = vld [vmem:[%s1423_s2 + $0x60] sm:$0xff] }
 0x32c   : > { %v641_v11 = vsel %vm285_vm1, %v1099_v10, 0.0 }
 0x32d   : > { %v784_v12 = vpop.f32.mrf.mxu2  ;;  %642 = vadd.xlane.f32.xlu1 %v641_v11  ;;  %1100 = vpow2.f32 %v637_v17 }
 0x32e   : > { %v793_v13 = vsel %vm285_vm1, %v784_v12, -inf }
 0x32f   : > { %794 = vmax.xlane.f32.xlu0 %v793_v13  ;;  %v874_v13 = vld [vmem:[%s1423_s2 + $0x78] sm:$0xff] }
 0x330   : > { %v631_v20 = vpop.xlane.xlu0 %630 }
 0x331   : > { %v634_v44 = vsub.f32 %v1322_v51, %v631_v20  ;;  %v703_v51 = vld [vmem:[%s1423_s2 + $0x50] sm:$0xff] }
 0x332   : > { %727 = vmatpush.msra.mxu1 %v703_v51 }
 0x333   : > { %v1101_v18 = vpop.eup %1100  ;;  %v639_v46 = vmul.f32 1.442695, %v634_v44 }
 0x334   : > { %v644_v19 = vsel %vm285_vm1, %v1101_v18, 0.0  ;;  %728 = vmatpush.msra.mxu1 %v702_v53 }
 0x335   : > { %v787_v0 = vpop.f32.mrf.mxu2 }
 0x336   : > { %v796_v4 = vsel %vm285_vm1, %v787_v0, -inf  ;;  %729 = vmatpush.msra.mxu1 %v701_v54 }
 0x337   : > { %797 = vmax.xlane.f32.xlu1 %v796_v4  ;;  %v872_v4 = vld [vmem:[%s1423_s2 + $0x68] sm:$0xff] }
 0x33d   : > { %v790_v8 = vpop.f32.mrf.mxu2 }
 0x33e   : > { %v799_v14 = vsel %vm292_vm2, %v790_v8, -inf }
 0x33f   : > { %800 = vmax.xlane.f32.xlu2 %v799_v14 }
 0x343   : > { %830 = vrot.lane.b32.xlu0 %v1232_v42, %s1131_s22 }
 0x350   : > { %1064 = vrot.lane.b32.xlu1 %v1248_v45, %s1132_s23 }
 0x357   : > { %660 = vrot.lane.b32.xlu2 %v1232_v42, %s1132_s23 }
 0x380   : > { %645 = vadd.xlane.f32.xlu2 %v644_v19 }
 0x3a0   : > { %v643_v21 = vpop.xlane.xlu1 %642 }
 0x3a2   : > { %v795_v22 = vpop.xlane.xlu0 %794 }
 0x3a3   : > { %v802_v23 = vsub.f32 %v784_v12, %v795_v22 }
 0x3a5   : > { %v805_v24 = vmul.f32 1.442695, %v802_v23 }
 0x3a7   : > { %1102 = vpow2.f32 %v805_v24 }
 0x3aa   : > { %v798_v25 = vpop.xlane.xlu1 %797 }
 0x3ab   : > { %v803_v26 = vsub.f32 %v787_v0, %v798_v25  ;;  %v873_v0 = vld [vmem:[%s1423_s2 + $0x70] sm:$0xff] }
 0x3ac   : > { %v229_v25 = vld [vmem:[%s1332_s19 + $0x10] sm:$0x1] }
 0x3ad   : > { %v1103_v27 = vpop.eup %1102  ;;  %v807_v28 = vmul.f32 1.442695, %v803_v26 }
 0x3ae   : > { %v811_v42 = vsel %vm285_vm1, %v1103_v27, 0.0 }
 0x3af   : > { %1104 = vpow2.f32 %v807_v28  ;;  %812 = vadd.xlane.f32.xlu0 %v811_v42 }
 0x3b2   : > { %v801_v29 = vpop.xlane.xlu2 %800 }
 0x3b3   : > { %v804_v30 = vsub.f32 %v790_v8, %v801_v29  ;;  %v236_v29 = vadd.f32 %v1337_v55, %v229_v25 }
 0x3b5   : > { %v1105_v31 = vpop.eup %1104  ;;  %v809_v32 = vmul.f32 1.442695, %v804_v30  ;;  %v831_v43 = vpop.permute.xlu0 %830  ;;  %v400_v30 = vadd.f32 %v1340_v57, %v236_v29 }
 0x3b6   : > { %v814_v33 = vsel %vm285_vm1, %v1105_v31, 0.0  ;;  %1036 = vmatpush.msk.msra.mxu0 %vm329_vm3, %v831_v43 }
 0x3b7   : > { %1106 = vpow2.f32 %v809_v32  ;;  %815 = vadd.xlane.f32.xlu1 %v814_v33 }
 0x3b8   : > { %1108 = vrcp.f32 %v643_v21 }
 0x3b9   : > { %1110 = vpow2.f32 %v639_v46 }
 0x3ba   : > { %v661_v34 = vpop.permute.xlu2 %660 }
 0x3bb   : > { %1023 = vmatpush.msk.msrb.mxu3 %vm329_vm3, %v661_v34 }
 0x3bd   : > { %v1107_v35 = vpop.eup %1106 }
 0x3be   : > { %v817_v36 = vsel %vm292_vm2, %v1107_v35, 0.0  ;;  %v1109_v38 = vpop.eup %1108 }
 0x3bf   : > { %818 = vadd.xlane.f32.xlu2 %v817_v36  ;;  %v653_v41 = vmul.f32 %v1109_v38, %v1099_v10  ;;  %v1111_v47 = vpop.eup %1110 }
 0x3c0   : > { %v647_v48 = vsel %vm292_vm2, %v1111_v47, 0.0 }
 0x3c2   : > { %v1065_v37 = vpop.permute.xlu1 %1064 }
 0x3c3   : > { %1069 = vrot.lane.b32.xlu0 %v1248_v45, %s1131_s22  ;;  %v1066_v39 = vunpack.i.l.bf16 %v1065_v37  ;;  %v1067_v40 = vunpack.i.h.bf16 %v1065_v37 }
 0x3c5   : > { %689 = vmatpush.msrb.mxu3 %v1066_v39 }
 0x3c7   : > { %690 = vmatpush.msrb.mxu3 %v1067_v40 }
 0x3c8   : > { %1024 = vmatmul.msk.f32.vlgmr.msrb.gmra.mxu3 %vm285_vm1, %v653_v41 }
 0x3c9   : > { %896 = vmatpush.msra.mxu3 %v874_v13 }
 0x3cb   : > { %897 = vmatpush.msra.mxu3 %v873_v0 }
 0x3cd   : > { %898 = vmatpush.msra.mxu3 %v872_v4 }
 0x3cf   : > { %899 = vmatpush.msra.mxu3 %v871_v16 }
 0x3ed   : > { %648 = vadd.xlane.f32.xlu0 %v647_v48 }
 0x3f3   : > { %v646_v49 = vpop.xlane.xlu2 %645 }
 0x3f4   : > { %1112 = vrcp.f32 %v646_v49 }
 0x3fa   : > { %v1113_v45 = vpop.eup %1112 }
 0x3fb   : > { %v654_v50 = vmul.f32 %v1113_v45, %v1101_v18 }
 0x3fd   : > { %1025 = vmatmul.msk.f32.gmra.mxu3 %vm285_vm1, %v654_v50 }
 0x422   : > { %v813_v56 = vpop.xlane.xlu0 %812 }
 0x423   : > { %1114 = vrcp.f32 %v813_v56 }
 0x429   : > { %v1115_v60 = vpop.eup %1114 }
 0x42a   : > { %v816_v58 = vpop.xlane.xlu1 %815  ;;  %v823_v1 = vmul.f32 %v1115_v60, %v1103_v27 }
 0x42b   : > { %1116 = vrcp.f32 %v816_v58 }
 0x431   : > { %v1117_v5 = vpop.eup %1116 }
 0x432   : > { %v819_v2 = vpop.xlane.xlu2 %818  ;;  %v824_v6 = vmul.f32 %v1117_v5, %v1105_v31 }
 0x433   : > { %1118 = vrcp.f32 %v819_v2 }
 0x435   : > { %v1070_v59 = vpop.permute.xlu0 %1069 }
 0x436   : > { %v1071_v61 = vunpack.i.l.bf16 %v1070_v59  ;;  %v1072_v63 = vunpack.i.h.bf16 %v1070_v59 }
 0x438   : > { %859 = vmatpush.msra.mxu0 %v1071_v61 }
 0x439   : > { %v1119_v7 = vpop.eup %1118 }
 0x43a   : > { %860 = vmatpush.msra.mxu0 %v1072_v63  ;;  %v825_v10 = vmul.f32 %v1119_v7, %v1107_v35 }
 0x43b   : > { %1037 = vmatmul.msk.f32.vlgmr.msra.gmra.mxu0 %vm285_vm1, %v823_v1 }
 0x443   : > { %1038 = vmatmul.msk.f32.gmra.mxu0 %vm285_vm1, %v824_v6 }
 0x44b   : > { %v692_v11 = vpop.f32.mrf.mxu3  ;;  %1039 = vmatmul.msk.f32.gmra.mxu0 %vm285_vm1, %v825_v10 }
 0x44c   : > { %1027 = vmatmul.msk.f32.vlgmr.msra.gmra.mxu1 %vm240_vm0, %v692_v11 }
 0x460   : > { %v649_v12 = vpop.xlane.xlu0 %648 }
 0x461   : > { %1120 = vrcp.f32 %v649_v12 }
 0x467   : > { %v1121_v8 = vpop.eup %1120 }
 0x468   : > { %v655_v14 = vmul.f32 %v1121_v8, %v1111_v47 }
 0x46a   : > { %1026 = vmatmul.msk.f32.gmra.mxu3 %vm285_vm1, %v655_v14 }
 0x480   : > { %v695_v15 = vpop.f32.mrf.mxu3 }
 0x481   : > { %1028 = vmatmul.msk.f32.gmra.mxu1 %vm240_vm0, %v695_v15 }
 0x4b8   : > { %v862_v17 = vpop.f32.mrf.mxu0 }
 0x4b9   : > { %1040 = vmatmul.msk.f32.vlgmr.msra.gmra.mxu3 %vm240_vm0, %v862_v17 }
 0x4c0   : > { %v865_v18 = vpop.f32.mrf.mxu0 }
 0x4c1   : > { %1041 = vmatmul.msk.f32.gmra.mxu3 %vm240_vm0, %v865_v18 }
 0x4c8   : > { %v868_v19 = vpop.f32.mrf.mxu0 }
 0x4c9   : > { %1042 = vmatmul.msk.f32.gmra.mxu3 %vm240_vm0, %v868_v19  ;;  %v731_v21 = vpop.f32.mrf.mxu1 }
 0x4ca   : > { %v740_v22 = vadd.f32 %v731_v21, %v1344_v62  ;;  %v572_v62 = vadd.f32 %v1349_v9, %v400_v30 }
 0x4ed   : > { %v698_v20 = vpop.f32.mrf.mxu3 }
 0x4ee   : > { %1029 = vmatmul.msk.f32.gmra.mxu1 %vm240_vm0, %v698_v20 }
 0x4fe   : > { %v734_v26 = vpop.f32.mrf.mxu1 }
 0x4ff   : > { %v741_v27 = vadd.f32 %v734_v26, %v1347_v3 }
 0x53c   : > { %v901_v23 = vpop.f32.mrf.mxu3 }
 0x53d   : > { %v910_v24 = vadd.f32 %v901_v23, %v740_v22 }
 0x53f   : > { %913 = vst [vmem:[%s217_s17] sm:$0xff] %v910_v24 }
 0x544   : > { %v904_v28 = vpop.f32.mrf.mxu3 }
 0x545   : > { %v911_v42 = vadd.f32 %v904_v28, %v741_v27 }
 0x547   : > { %914 = vst [vmem:[%s217_s17 + $0x8] sm:$0xff] %v911_v42 }
 0x54c   : > { %v907_v33 = vpop.f32.mrf.mxu3 }
 0x56b   : > { %v737_v31 = vpop.f32.mrf.mxu1 }
 0x56c   : > { %v742_v32 = vadd.f32 %v737_v31, %v572_v62 }
 0x56e   : > { %v912_v34 = vadd.f32 %v907_v33, %v742_v32 }
 0x570   : > { %915 = vst [vmem:[%s217_s17 + $0x10] sm:$0x1] %v912_v34 }
 0x571 PF: > { %s14_s15 = sadd.s32 1, %s1128_s15  }
 0x572   : > { %p11_p4 = scmp.ge.s32.totalorder %s14_s15, 4  }
 0x574   :  { %13 = sbr.rel (!%p11_p4) target bundleno = 1 (0x1), region = 69 }

</bundles_post_ra>
